<compile_context>
chip_gen: v7x
topology: tpu7x:2x2x1
jax: 0.10.0
libtpu: 0.0.40
codegen_flags: <defaults>
</compile_context>

<pallas_src>
import math

import jax
import jax.numpy as jnp
import numpy as np
from jax.experimental import pallas as pl
from jax.experimental.pallas import tpu as pltpu

EMB = 768
NLI_CLASSES = 2
_H1, _H2, _H3, _H5 = 512, 64, 64, 8


# ---------------------------------------------------------------------------
# Fused kernel: NLI MLP (3072 -> 512 -> 64 -> 64 -> 2) + softmax + sentiment head
# ---------------------------------------------------------------------------
def _build_kernel(group):
    def fused_kernel(c_ref, h_ref, p_ref,
                     w1_ref, b1_ref, w2_ref, b2_ref, w3_ref, b3_ref,
                     w4_ref, b4_ref, w5a_ref, wsel0_ref, wsel1_ref,
                     b5_ref, w6_ref, b6_ref,
                     logits_ref, clf_ref):
        c = c_ref[...]                      # (tile_b, 768) bf16, streamed as bf16
        h = h_ref[...]

        # ---- NLI classifier: cat([c, h, |c-h|, c*h]) @ W1 as 4 row-block matmuls
        # bf16 operands feed the MXU at full rate; accumulation stays f32.
        x = jnp.dot(c, w1_ref[0], preferred_element_type=jnp.float32)
        x += jnp.dot(h, w1_ref[1], preferred_element_type=jnp.float32)
        x += jnp.dot(jnp.abs(c - h), w1_ref[2], preferred_element_type=jnp.float32)
        x += jnp.dot(c * h, w1_ref[3], preferred_element_type=jnp.float32)
        x = jnp.maximum(x + b1_ref[...], 0.0)

        x = jnp.maximum(jnp.dot(x.astype(jnp.bfloat16), w2_ref[...],
                                preferred_element_type=jnp.float32) + b2_ref[...], 0.0)
        x = jnp.maximum(jnp.dot(x.astype(jnp.bfloat16), w3_ref[...],
                                preferred_element_type=jnp.float32) + b3_ref[...], 0.0)
        logits = jnp.dot(x.astype(jnp.bfloat16), w4_ref[...],
                         preferred_element_type=jnp.float32) + b4_ref[...]
        logits_ref[...] = logits

        # ---- 2-class softmax as a numerically-stable sigmoid (no cross-lane
        # reductions over a 2-lane-wide tile): p0 = sigmoid(l0 - l1), p1 = 1 - p0.
        d = logits[:, 0:1] - logits[:, 1:2]             # (tile_b, 1)
        e = jnp.exp(-jnp.abs(d))                        # in (0, 1], never overflows
        p_big = pl.reciprocal(1.0 + e, approx=True)     # EUP slot
        p0 = jnp.where(d >= 0.0, p_big, 1.0 - p_big)
        p1 = 1.0 - p0

        # ---- fused sentiment head (no reshape of probs, no HBM round-trip) ----
        # probs_1 @ W5b == ssel @ (p0*W5b_even_rows + p1*W5b_odd_rows), with
        # ssel[g, i] = (i // group == g) generated on the VPU each step.
        a = (p0 * wsel0_ref[...] + p1 * wsel1_ref[...]).astype(jnp.bfloat16)
        g_tile, tile_b = clf_ref.shape[0], c.shape[0]
        row = jax.lax.broadcasted_iota(jnp.int32, (g_tile, tile_b), 0)
        col = jax.lax.broadcasted_iota(jnp.int32, (g_tile, tile_b), 1)
        in_group = (col >= row * group) & (col < (row + 1) * group)
        ssel = jnp.where(in_group, 1.0, 0.0).astype(jnp.bfloat16)

        hidden = jnp.dot(p_ref[...], w5a_ref[...], preferred_element_type=jnp.float32)
        hidden += jnp.dot(ssel, a, preferred_element_type=jnp.float32)
        hidden += b5_ref[...]
        clf_ref[...] = jnp.dot(hidden, w6_ref[...],
                               preferred_element_type=jnp.float32) + b6_ref[...]

    return fused_kernel


# ---------------------------------------------------------------------------
# Wrapper
# ---------------------------------------------------------------------------
def _round_up(x, m):
    return ((x + m - 1) // m) * m


def _choose_tile_b(B, group):
    """Rows per grid step. Always a multiple of 8*group (so both tile_b and
    tile_b//group satisfy the sublane rule). Large batches prefer
    lcm(8*group, 256)-aligned tiles (clean 256-tall MXU passes, amortizes the
    ~0.35us/step overhead); padding waste is capped at ~12% of B; tiles are
    capped at 2048 rows so double-buffered bf16 inputs fit v7x's VMEM."""
    unit = 8 * group
    align = unit * 256 // math.gcd(unit, 256)          # lcm(8*group, 256)
    b_unit = _round_up(B, unit)
    if b_unit <= align:
        return b_unit                                   # small batch: one small tile
    waste_cap = max(B // 8, unit)
    for cand in (2 * align, align):                     # e.g. 1536 / 768 for group=6
        if cand <= 2048 and _round_up(B, cand) - B <= waste_cap:
            return cand
    # Ragged batch: split into ~`align`-sized unit-aligned tiles, minimal padding.
    n_tiles = -(-b_unit // align)
    return _round_up(-(-b_unit // n_tiles), unit)


def nli_classification_forward(params, c_emb, h_emb, n_classes):
    B = c_emb.shape[0]
    group = NLI_CLASSES * n_classes
    assert B % group == 0, "batch must be a multiple of nli_classes * sentiment_classes"
    G = B // group

    f32, bf16 = jnp.float32, jnp.bfloat16

    tile_b = _choose_tile_b(B, group)
    b_pad = _round_up(B, tile_b)
    num_tiles = b_pad // tile_b
    g_tile = tile_b // group
    g_pad = b_pad // group

    # bf16 streaming activations: halves HBM bytes for the only large inputs.
    c_p = jnp.pad(c_emb.astype(bf16), ((0, b_pad - B), (0, 0)))
    h_p = jnp.pad(h_emb.astype(bf16), ((0, b_pad - B), (0, 0)))
    premise = jnp.pad(c_emb[0::group, :].astype(bf16), ((0, g_pad - G), (0, 0)))

    # Weight prep: stacked bf16 W1 (single contiguous DMA), bf16 W2/W3/W4/W5a,
    # pre-tiled even/odd W5b rows for the probability-scaled selection trick.
    w1 = jnp.stack([params["w1a"], params["w1b"],
                    params["w1c"], params["w1d"]]).astype(bf16)        # (4, 768, 512)
    w2 = params["w2"].astype(bf16)
    w3 = params["w3"].astype(bf16)
    w4 = params["w4"].astype(bf16)
    w5a = params["w5a"].astype(bf16)
    w5b = params["w5b"]                                                # (2*group, 8)
    wsel0 = jnp.tile(w5b[0::2, :], (g_tile, 1))                        # (tile_b, 8)
    wsel1 = jnp.tile(w5b[1::2, :], (g_tile, 1))                        # (tile_b, 8)

    const2 = lambda i: (0, 0)
    grid_spec = pltpu.PrefetchScalarGridSpec(
        num_scalar_prefetch=0,
        grid=(num_tiles,),
        in_specs=[
            pl.BlockSpec((tile_b, EMB), lambda i: (i, 0)),             # c (bf16)
            pl.BlockSpec((tile_b, EMB), lambda i: (i, 0)),             # h (bf16)
            pl.BlockSpec((g_tile, EMB), lambda i: (i, 0)),             # premise rows
            pl.BlockSpec((4, EMB, _H1), lambda i: (0, 0, 0)),          # W1 (stacked)
            pl.BlockSpec((1, _H1), const2),                            # b1
            pl.BlockSpec((_H1, _H2), const2),                          # W2
            pl.BlockSpec((1, _H2), const2),                            # b2
            pl.BlockSpec((_H2, _H3), const2),                          # W3
            pl.BlockSpec((1, _H3), const2),                            # b3
            pl.BlockSpec((_H3, NLI_CLASSES), const2),                  # W4
            pl.BlockSpec((1, NLI_CLASSES), const2),                    # b4
            pl.BlockSpec((EMB, _H5), const2),                          # W5a
            pl.BlockSpec((tile_b, _H5), const2),                       # wsel0
            pl.BlockSpec((tile_b, _H5), const2),                       # wsel1
            pl.BlockSpec((1, _H5), const2),                            # b5
            pl.BlockSpec((_H5, n_classes), const2),                    # W6
            pl.BlockSpec((1, n_classes), const2),                      # b6
        ],
        out_specs=(
            pl.BlockSpec((tile_b, NLI_CLASSES), lambda i: (i, 0)),     # nli logits
            pl.BlockSpec((g_tile, n_classes), lambda i: (i, 0)),       # clf output
        ),
    )

    logits_pad, clf_pad = pl.pallas_call(
        _build_kernel(group),
        out_shape=(jax.ShapeDtypeStruct((b_pad, NLI_CLASSES), f32),
                   jax.ShapeDtypeStruct((g_pad, n_classes), f32)),
        grid_spec=grid_spec,
        compiler_params=pltpu.CompilerParams(
            dimension_semantics=("parallel",),            # megacore batch sharding
            vmem_limit_bytes=48 * 1024 * 1024),           # fits v7x's 64 MiB VMEM
    )(c_p, h_p, premise,
      w1, params["b1"], w2, params["b2"], w3, params["b3"],
      w4, params["b4"], w5a, wsel0, wsel1, params["b5"], params["w6"], params["b6"])

    return logits_pad[:B], clf_pad[:G]


# ---------------------------------------------------------------------------
# Deterministic synthetic parameter init (PyTorch-Linear-style uniform)
# ---------------------------------------------------------------------------
def init_params(key, n_classes):
    group2 = NLI_CLASSES * n_classes * NLI_CLASSES  # nli_classes * sent_classes * 2

    def linear(key, fan_in, fan_out):
        kw, kb = jax.random.split(key)
        bound = 1.0 / np.sqrt(fan_in)
        w = jax.random.uniform(kw, (fan_in, fan_out), jnp.float32, -bound, bound)
        b = jax.random.uniform(kb, (1, fan_out), jnp.float32, -bound, bound)
        return w, b

    keys = jax.random.split(key, 6)
    w1, b1 = linear(keys[0], 4 * EMB, _H1)        # Linear(4*768, 512)
    w2, b2 = linear(keys[1], _H1, _H2)            # Linear(512, 64)
    w3, b3 = linear(keys[2], _H2, _H3)            # Linear(64, 64)
    w4, b4 = linear(keys[3], _H3, NLI_CLASSES)    # Linear(64, 2)
    w5, b5 = linear(keys[4], group2 + EMB, _H5)   # Linear(2*n*2 + 768, 8)
    w6, b6 = linear(keys[5], _H5, n_classes)      # Linear(8, n_classes)

    return {
        # W1 split by row-blocks matching cat([c, h, |c-h|, c*h]) order
        "w1a": w1[0 * EMB:1 * EMB], "w1b": w1[1 * EMB:2 * EMB],
        "w1c": w1[2 * EMB:3 * EMB], "w1d": w1[3 * EMB:4 * EMB], "b1": b1,
        "w2": w2, "b2": b2, "w3": w3, "b3": b3, "w4": w4, "b4": b4,
        # W5 split: rows [0:768] multiply premise, rows [768:] multiply nli probs
        "w5a": w5[:EMB], "w5b": w5[EMB:], "b5": b5,
        "w6": w6, "b6": b6,
    }


# ---------------------------------------------------------------------------
# Pure-JAX reference (mirrors PyTorch forward; bf16 dots mirrored for tight check)
# ---------------------------------------------------------------------------
def reference_forward(params, c_emb, h_emb, n_classes):
    bf16, f32 = jnp.bfloat16, jnp.float32
    group = NLI_CLASSES * n_classes
    cb, hb = c_emb.astype(bf16), h_emb.astype(bf16)
    feats = jnp.concatenate([cb, hb, jnp.abs(cb - hb), cb * hb], axis=1)
    w1 = jnp.concatenate(
        [params["w1a"], params["w1b"], params["w1c"], params["w1d"]], axis=0).astype(bf16)
    x = jnp.dot(feats, w1, preferred_element_type=f32) + params["b1"]
    x = jnp.maximum(x, 0.0)
    x = jnp.maximum(jnp.dot(x.astype(bf16), params["w2"].astype(bf16),
                            preferred_element_type=f32) + params["b2"], 0.0)
    x = jnp.maximum(jnp.dot(x.astype(bf16), params["w3"].astype(bf16),
                            preferred_element_type=f32) + params["b3"], 0.0)
    logits = jnp.dot(x.astype(bf16), params["w4"].astype(bf16),
                     preferred_element_type=f32) + params["b4"]
    probs = jax.nn.softmax(logits, axis=1)
    G = c_emb.shape[0] // group
    probs_1 = probs.reshape(G, group * NLI_CLASSES)
    premise = c_emb[0::group, :].astype(bf16)
    hidden = (jnp.dot(premise, params["w5a"].astype(bf16),
                      preferred_element_type=f32)
              + probs_1 @ params["w5b"] + params["b5"])
    clf = hidden @ params["w6"] + params["b6"]
    return logits, clf


if __name__ == "__main__":
    n_classes = 3                                # sentiment classes
    group = NLI_CLASSES * n_classes              # = 6
    B = 2 * group                                # batch = 12 (2 premise groups)

    key = jax.random.PRNGKey(0)
    k_c, k_h, k_p = jax.random.split(key, 3)
    c_emb = jax.random.normal(k_c, (B, EMB), jnp.float32)
    h_emb = jax.random.normal(k_h, (B, EMB), jnp.float32)
    params = init_params(k_p, n_classes)

    fwd = jax.jit(lambda p, c, h: nli_classification_forward(p, c, h, n_classes))
    nli_out, clf_out = fwd(params, c_emb, h_emb)
    jax.block_until_ready((nli_out, clf_out))

    ref_nli, ref_clf = reference_forward(params, c_emb, h_emb, n_classes)
    # bf16 MXU operands + bf16-streamed inputs + approx reciprocal in the
    # in-kernel sigmoid-form softmax -> relaxed (but mirrored) tolerance.
    np.testing.assert_allclose(np.asarray(nli_out), np.asarray(ref_nli),
                               rtol=5e-3, atol=5e-3)
    np.testing.assert_allclose(np.asarray(clf_out), np.asarray(ref_clf),
                               rtol=5e-3, atol=5e-3)

    print("KERNEL_OK")
</pallas_src>

<mosaic_0001>
module attributes {stable_mosaic.version = 11 : i64} {
  func.func @fused_kernel(%arg0: i32, %arg1: memref<48x768xbf16, #tpu.memory_space<vmem>>, %arg2: memref<48x768xbf16, #tpu.memory_space<vmem>>, %arg3: memref<8x768xbf16, #tpu.memory_space<vmem>>, %arg4: memref<4x768x512xbf16, #tpu.memory_space<vmem>>, %arg5: memref<1x512xf32, #tpu.memory_space<vmem>>, %arg6: memref<512x64xbf16, #tpu.memory_space<vmem>>, %arg7: memref<1x64xf32, #tpu.memory_space<vmem>>, %arg8: memref<64x64xbf16, #tpu.memory_space<vmem>>, %arg9: memref<1x64xf32, #tpu.memory_space<vmem>>, %arg10: memref<64x2xbf16, #tpu.memory_space<vmem>>, %arg11: memref<1x2xf32, #tpu.memory_space<vmem>>, %arg12: memref<768x8xbf16, #tpu.memory_space<vmem>>, %arg13: memref<48x8xf32, #tpu.memory_space<vmem>>, %arg14: memref<48x8xf32, #tpu.memory_space<vmem>>, %arg15: memref<1x8xf32, #tpu.memory_space<vmem>>, %arg16: memref<8x3xf32, #tpu.memory_space<vmem>>, %arg17: memref<1x3xf32, #tpu.memory_space<vmem>>, %arg18: memref<48x2xf32, #tpu.memory_space<vmem>>, %arg19: memref<8x3xf32, #tpu.memory_space<vmem>>) attributes {dimension_semantics = [#tpu.dimension_semantics<parallel>], iteration_bounds = array<i64: 1>, scalar_prefetch = 0 : i64, scratch_operands = 0 : i64, tpu.core_type = #tpu.core_type<tc>, window_params = [{transform_indices = @transform_0, window_bounds = array<i64: 48, 768>}, {transform_indices = @transform_1, window_bounds = array<i64: 48, 768>}, {transform_indices = @transform_2, window_bounds = array<i64: 8, 768>}, {pipeline_mode = #tpu.pipeline_mode<synchronous>, transform_indices = @transform_3, window_bounds = array<i64: 4, 768, 512>}, {pipeline_mode = #tpu.pipeline_mode<synchronous>, transform_indices = @transform_4, window_bounds = array<i64: 1, 512>}, {pipeline_mode = #tpu.pipeline_mode<synchronous>, transform_indices = @transform_5, window_bounds = array<i64: 512, 64>}, {pipeline_mode = #tpu.pipeline_mode<synchronous>, transform_indices = @transform_6, window_bounds = array<i64: 1, 64>}, {pipeline_mode = #tpu.pipeline_mode<synchronous>, transform_indices = @transform_7, window_bounds = array<i64: 64, 64>}, {pipeline_mode = #tpu.pipeline_mode<synchronous>, transform_indices = @transform_8, window_bounds = array<i64: 1, 64>}, {pipeline_mode = #tpu.pipeline_mode<synchronous>, transform_indices = @transform_9, window_bounds = array<i64: 64, 2>}, {pipeline_mode = #tpu.pipeline_mode<synchronous>, transform_indices = @transform_10, window_bounds = array<i64: 1, 2>}, {pipeline_mode = #tpu.pipeline_mode<synchronous>, transform_indices = @transform_11, window_bounds = array<i64: 768, 8>}, {pipeline_mode = #tpu.pipeline_mode<synchronous>, transform_indices = @transform_12, window_bounds = array<i64: 48, 8>}, {pipeline_mode = #tpu.pipeline_mode<synchronous>, transform_indices = @transform_13, window_bounds = array<i64: 48, 8>}, {pipeline_mode = #tpu.pipeline_mode<synchronous>, transform_indices = @transform_14, window_bounds = array<i64: 1, 8>}, {pipeline_mode = #tpu.pipeline_mode<synchronous>, transform_indices = @transform_15, window_bounds = array<i64: 8, 3>}, {pipeline_mode = #tpu.pipeline_mode<synchronous>, transform_indices = @transform_16, window_bounds = array<i64: 1, 3>}, {transform_indices = @transform_17, window_bounds = array<i64: 48, 2>}, {transform_indices = @transform_18, window_bounds = array<i64: 8, 3>}]} {
    %c0 = arith.constant 0 : index
    %c0_0 = arith.constant 0 : index
    %0 = vector.load %arg1[%c0, %c0_0] : memref<48x768xbf16, #tpu.memory_space<vmem>>, vector<48x768xbf16>
    %c0_1 = arith.constant 0 : index
    %c0_2 = arith.constant 0 : index
    %1 = vector.load %arg2[%c0_1, %c0_2] : memref<48x768xbf16, #tpu.memory_space<vmem>>, vector<48x768xbf16>
    %c0_3 = arith.constant 0 : index
    %c0_4 = arith.constant 0 : index
    %c0_5 = arith.constant 0 : index
    %2 = vector.load %arg4[%c0_3, %c0_4, %c0_5] : memref<4x768x512xbf16, #tpu.memory_space<vmem>>, vector<1x768x512xbf16>
    %3 = vector.shape_cast %2 : vector<1x768x512xbf16> to vector<768x512xbf16>
    %cst = arith.constant dense<0.000000e+00> : vector<48x512xf32>
    %4 = tpu.matmul %0, %3, %cst {dimension_numbers = #tpu.dot_dimension_numbers<[1], [0], [0], [1], [0, 0, 1, 1], [], []>} : vector<48x768xbf16>, vector<768x512xbf16>, vector<48x512xf32> -> vector<48x512xf32>
    %c1 = arith.constant 1 : index
    %c0_6 = arith.constant 0 : index
    %c0_7 = arith.constant 0 : index
    %5 = vector.load %arg4[%c1, %c0_6, %c0_7] : memref<4x768x512xbf16, #tpu.memory_space<vmem>>, vector<1x768x512xbf16>
    %6 = vector.shape_cast %5 : vector<1x768x512xbf16> to vector<768x512xbf16>
    %cst_8 = arith.constant dense<0.000000e+00> : vector<48x512xf32>
    %7 = tpu.matmul %1, %6, %cst_8 {dimension_numbers = #tpu.dot_dimension_numbers<[1], [0], [0], [1], [0, 0, 1, 1], [], []>} : vector<48x768xbf16>, vector<768x512xbf16>, vector<48x512xf32> -> vector<48x512xf32>
    %8 = arith.addf %4, %7 : vector<48x512xf32>
    %9 = arith.subf %0, %1 : vector<48x768xbf16>
    %10 = math.absf %9 : vector<48x768xbf16>
    %c2 = arith.constant 2 : index
    %c0_9 = arith.constant 0 : index
    %c0_10 = arith.constant 0 : index
    %11 = vector.load %arg4[%c2, %c0_9, %c0_10] : memref<4x768x512xbf16, #tpu.memory_space<vmem>>, vector<1x768x512xbf16>
    %12 = vector.shape_cast %11 : vector<1x768x512xbf16> to vector<768x512xbf16>
    %cst_11 = arith.constant dense<0.000000e+00> : vector<48x512xf32>
    %13 = tpu.matmul %10, %12, %cst_11 {dimension_numbers = #tpu.dot_dimension_numbers<[1], [0], [0], [1], [0, 0, 1, 1], [], []>} : vector<48x768xbf16>, vector<768x512xbf16>, vector<48x512xf32> -> vector<48x512xf32>
    %14 = arith.addf %8, %13 : vector<48x512xf32>
    %15 = arith.mulf %0, %1 : vector<48x768xbf16>
    %c3 = arith.constant 3 : index
    %c0_12 = arith.constant 0 : index
    %c0_13 = arith.constant 0 : index
    %16 = vector.load %arg4[%c3, %c0_12, %c0_13] : memref<4x768x512xbf16, #tpu.memory_space<vmem>>, vector<1x768x512xbf16>
    %17 = vector.shape_cast %16 : vector<1x768x512xbf16> to vector<768x512xbf16>
    %cst_14 = arith.constant dense<0.000000e+00> : vector<48x512xf32>
    %18 = tpu.matmul %15, %17, %cst_14 {dimension_numbers = #tpu.dot_dimension_numbers<[1], [0], [0], [1], [0, 0, 1, 1], [], []>} : vector<48x768xbf16>, vector<768x512xbf16>, vector<48x512xf32> -> vector<48x512xf32>
    %19 = arith.addf %14, %18 : vector<48x512xf32>
    %c0_15 = arith.constant 0 : index
    %c0_16 = arith.constant 0 : index
    %20 = vector.load %arg5[%c0_15, %c0_16] : memref<1x512xf32, #tpu.memory_space<vmem>>, vector<1x512xf32>
    %21 = vector.broadcast %20 : vector<1x512xf32> to vector<48x512xf32>
    %22 = arith.addf %19, %21 : vector<48x512xf32>
    %cst_17 = arith.constant 0.000000e+00 : f32
    %23 = vector.broadcast %cst_17 : f32 to vector<48x512xf32>
    %24 = arith.maximumf %22, %23 : vector<48x512xf32>
    %25 = arith.truncf %24 : vector<48x512xf32> to vector<48x512xbf16>
    %c0_18 = arith.constant 0 : index
    %c0_19 = arith.constant 0 : index
    %26 = vector.load %arg6[%c0_18, %c0_19] : memref<512x64xbf16, #tpu.memory_space<vmem>>, vector<512x64xbf16>
    %cst_20 = arith.constant dense<0.000000e+00> : vector<48x64xf32>
    %27 = tpu.matmul %25, %26, %cst_20 {dimension_numbers = #tpu.dot_dimension_numbers<[1], [0], [0], [1], [0, 0, 1, 1], [], []>} : vector<48x512xbf16>, vector<512x64xbf16>, vector<48x64xf32> -> vector<48x64xf32>
    %c0_21 = arith.constant 0 : index
    %c0_22 = arith.constant 0 : index
    %28 = vector.load %arg7[%c0_21, %c0_22] : memref<1x64xf32, #tpu.memory_space<vmem>>, vector<1x64xf32>
    %29 = vector.broadcast %28 : vector<1x64xf32> to vector<48x64xf32>
    %30 = arith.addf %27, %29 : vector<48x64xf32>
    %cst_23 = arith.constant 0.000000e+00 : f32
    %31 = vector.broadcast %cst_23 : f32 to vector<48x64xf32>
    %32 = arith.maximumf %30, %31 : vector<48x64xf32>
    %33 = arith.truncf %32 : vector<48x64xf32> to vector<48x64xbf16>
    %c0_24 = arith.constant 0 : index
    %c0_25 = arith.constant 0 : index
    %34 = vector.load %arg8[%c0_24, %c0_25] : memref<64x64xbf16, #tpu.memory_space<vmem>>, vector<64x64xbf16>
    %cst_26 = arith.constant dense<0.000000e+00> : vector<48x64xf32>
    %35 = tpu.matmul %33, %34, %cst_26 {dimension_numbers = #tpu.dot_dimension_numbers<[1], [0], [0], [1], [0, 0, 1, 1], [], []>} : vector<48x64xbf16>, vector<64x64xbf16>, vector<48x64xf32> -> vector<48x64xf32>
    %c0_27 = arith.constant 0 : index
    %c0_28 = arith.constant 0 : index
    %36 = vector.load %arg9[%c0_27, %c0_28] : memref<1x64xf32, #tpu.memory_space<vmem>>, vector<1x64xf32>
    %37 = vector.broadcast %36 : vector<1x64xf32> to vector<48x64xf32>
    %38 = arith.addf %35, %37 : vector<48x64xf32>
    %cst_29 = arith.constant 0.000000e+00 : f32
    %39 = vector.broadcast %cst_29 : f32 to vector<48x64xf32>
    %40 = arith.maximumf %38, %39 : vector<48x64xf32>
    %41 = arith.truncf %40 : vector<48x64xf32> to vector<48x64xbf16>
    %c0_30 = arith.constant 0 : index
    %c0_31 = arith.constant 0 : index
    %42 = vector.load %arg10[%c0_30, %c0_31] : memref<64x2xbf16, #tpu.memory_space<vmem>>, vector<64x2xbf16>
    %cst_32 = arith.constant dense<0.000000e+00> : vector<48x2xf32>
    %43 = tpu.matmul %41, %42, %cst_32 {dimension_numbers = #tpu.dot_dimension_numbers<[1], [0], [0], [1], [0, 0, 1, 1], [], []>} : vector<48x64xbf16>, vector<64x2xbf16>, vector<48x2xf32> -> vector<48x2xf32>
    %c0_33 = arith.constant 0 : index
    %c0_34 = arith.constant 0 : index
    %44 = vector.load %arg11[%c0_33, %c0_34] : memref<1x2xf32, #tpu.memory_space<vmem>>, vector<1x2xf32>
    %45 = vector.broadcast %44 : vector<1x2xf32> to vector<48x2xf32>
    %46 = arith.addf %43, %45 : vector<48x2xf32>
    %c0_35 = arith.constant 0 : index
    %c0_36 = arith.constant 0 : index
    %47 = vector.load %arg18[%c0_35, %c0_36] : memref<48x2xf32, #tpu.memory_space<vmem>>, vector<48x2xf32>
    tpu.vector_store %arg18[%c0_35, %c0_36], %46 {strides = array<i32>} : memref<48x2xf32, #tpu.memory_space<vmem>>, vector<48x2xf32>,
    %48 = vector.extract_strided_slice %46 {offsets = [0, 0], sizes = [48, 1], strides = [1, 1]} : vector<48x2xf32> to vector<48x1xf32>
    %49 = vector.extract_strided_slice %46 {offsets = [0, 1], sizes = [48, 1], strides = [1, 1]} : vector<48x2xf32> to vector<48x1xf32>
    %50 = arith.subf %48, %49 : vector<48x1xf32>
    %51 = math.absf %50 : vector<48x1xf32>
    %cst_37 = arith.constant 0.000000e+00 : f32
    %52 = vector.broadcast %cst_37 : f32 to vector<48x1xf32>
    %53 = arith.subf %52, %51 : vector<48x1xf32>
    %54 = math.exp %53 : vector<48x1xf32>
    %cst_38 = arith.constant 1.000000e+00 : f32
    %55 = vector.broadcast %cst_38 : f32 to vector<48x1xf32>
    %56 = arith.addf %55, %54 : vector<48x1xf32>
    %57 = tpu.reciprocal %56 {approx = true} : vector<48x1xf32> -> vector<48x1xf32>
    %cst_39 = arith.constant 0.000000e+00 : f32
    %58 = vector.broadcast %cst_39 : f32 to vector<48x1xf32>
    %59 = arith.cmpf oge, %50, %58 : vector<48x1xf32>
    %cst_40 = arith.constant 1.000000e+00 : f32
    %60 = vector.broadcast %cst_40 : f32 to vector<48x1xf32>
    %61 = arith.subf %60, %57 : vector<48x1xf32>
    %62 = arith.select %59, %57, %61 : vector<48x1xi1>, vector<48x1xf32>
    %cst_41 = arith.constant 1.000000e+00 : f32
    %63 = vector.broadcast %cst_41 : f32 to vector<48x1xf32>
    %64 = arith.subf %63, %62 : vector<48x1xf32>
    %c0_42 = arith.constant 0 : index
    %c0_43 = arith.constant 0 : index
    %65 = vector.load %arg13[%c0_42, %c0_43] : memref<48x8xf32, #tpu.memory_space<vmem>>, vector<48x8xf32>
    %66 = vector.broadcast %62 : vector<48x1xf32> to vector<48x8xf32>
    %67 = arith.mulf %66, %65 : vector<48x8xf32>
    %c0_44 = arith.constant 0 : index
    %c0_45 = arith.constant 0 : index
    %68 = vector.load %arg14[%c0_44, %c0_45] : memref<48x8xf32, #tpu.memory_space<vmem>>, vector<48x8xf32>
    %69 = vector.broadcast %64 : vector<48x1xf32> to vector<48x8xf32>
    %70 = arith.mulf %69, %68 : vector<48x8xf32>
    %71 = arith.addf %67, %70 : vector<48x8xf32>
    %72 = arith.truncf %71 : vector<48x8xf32> to vector<48x8xbf16>
    %73 = tpu.iota {dimensions = array<i32: 0>} : vector<8x48xi32>
    %74 = tpu.iota {dimensions = array<i32: 1>} : vector<8x48xi32>
    %c6_i32 = arith.constant 6 : i32
    %75 = vector.broadcast %c6_i32 : i32 to vector<8x48xi32>
    %76 = arith.muli %73, %75 : vector<8x48xi32>
    %77 = arith.cmpi sge, %74, %76 : vector<8x48xi32>
    %c1_i32 = arith.constant 1 : i32
    %78 = vector.broadcast %c1_i32 : i32 to vector<8x48xi32>
    %79 = arith.addi %73, %78 : vector<8x48xi32>
    %c6_i32_46 = arith.constant 6 : i32
    %80 = vector.broadcast %c6_i32_46 : i32 to vector<8x48xi32>
    %81 = arith.muli %79, %80 : vector<8x48xi32>
    %82 = arith.cmpi slt, %74, %81 : vector<8x48xi32>
    %83 = arith.andi %77, %82 : vector<8x48xi1>
    %cst_47 = arith.constant 1.000000e+00 : f32
    %cst_48 = arith.constant 0.000000e+00 : f32
    %84 = vector.broadcast %cst_47 : f32 to vector<8x48xf32>
    %85 = vector.broadcast %cst_48 : f32 to vector<8x48xf32>
    %86 = arith.select %83, %84, %85 : vector<8x48xi1>, vector<8x48xf32>
    %87 = arith.truncf %86 : vector<8x48xf32> to vector<8x48xbf16>
    %c0_49 = arith.constant 0 : index
    %c0_50 = arith.constant 0 : index
    %88 = vector.load %arg3[%c0_49, %c0_50] : memref<8x768xbf16, #tpu.memory_space<vmem>>, vector<8x768xbf16>
    %c0_51 = arith.constant 0 : index
    %c0_52 = arith.constant 0 : index
    %89 = vector.load %arg12[%c0_51, %c0_52] : memref<768x8xbf16, #tpu.memory_space<vmem>>, vector<768x8xbf16>
    %cst_53 = arith.constant dense<0.000000e+00> : vector<8x8xf32>
    %90 = tpu.matmul %88, %89, %cst_53 {dimension_numbers = #tpu.dot_dimension_numbers<[1], [0], [0], [1], [0, 0, 1, 1], [], []>} : vector<8x768xbf16>, vector<768x8xbf16>, vector<8x8xf32> -> vector<8x8xf32>
    %cst_54 = arith.constant dense<0.000000e+00> : vector<8x8xf32>
    %91 = tpu.matmul %87, %72, %cst_54 {dimension_numbers = #tpu.dot_dimension_numbers<[1], [0], [0], [1], [0, 0, 1, 1], [], []>} : vector<8x48xbf16>, vector<48x8xbf16>, vector<8x8xf32> -> vector<8x8xf32>
    %92 = arith.addf %90, %91 : vector<8x8xf32>
    %c0_55 = arith.constant 0 : index
    %c0_56 = arith.constant 0 : index
    %93 = vector.load %arg15[%c0_55, %c0_56] : memref<1x8xf32, #tpu.memory_space<vmem>>, vector<1x8xf32>
    %94 = vector.broadcast %93 : vector<1x8xf32> to vector<8x8xf32>
    %95 = arith.addf %92, %94 : vector<8x8xf32>
    %c0_57 = arith.constant 0 : index
    %c0_58 = arith.constant 0 : index
    %96 = vector.load %arg16[%c0_57, %c0_58] : memref<8x3xf32, #tpu.memory_space<vmem>>, vector<8x3xf32>
    %cst_59 = arith.constant dense<0.000000e+00> : vector<8x3xf32>
    %97 = tpu.matmul %95, %96, %cst_59 {dimension_numbers = #tpu.dot_dimension_numbers<[1], [0], [0], [1], [0, 0, 1, 1], [], []>} : vector<8x8xf32>, vector<8x3xf32>, vector<8x3xf32> -> vector<8x3xf32>
    %c0_60 = arith.constant 0 : index
    %c0_61 = arith.constant 0 : index
    %98 = vector.load %arg17[%c0_60, %c0_61] : memref<1x3xf32, #tpu.memory_space<vmem>>, vector<1x3xf32>
    %99 = vector.broadcast %98 : vector<1x3xf32> to vector<8x3xf32>
    %100 = arith.addf %97, %99 : vector<8x3xf32>
    %c0_62 = arith.constant 0 : index
    %c0_63 = arith.constant 0 : index
    %101 = vector.load %arg19[%c0_62, %c0_63] : memref<8x3xf32, #tpu.memory_space<vmem>>, vector<8x3xf32>
    tpu.vector_store %arg19[%c0_62, %c0_63], %100 {strides = array<i32>} : memref<8x3xf32, #tpu.memory_space<vmem>>, vector<8x3xf32>,
    return
  }
  func.func @transform_0(%arg0: i32) -> (i32, i32) {
    %c0_i32 = arith.constant 0 : i32
    %c0_i32_0 = arith.constant 0 : i32
    return %arg0, %c0_i32 : i32, i32
  }
  func.func @transform_1(%arg0: i32) -> (i32, i32) {
    %c0_i32 = arith.constant 0 : i32
    %c0_i32_0 = arith.constant 0 : i32
    return %arg0, %c0_i32 : i32, i32
  }
  func.func @transform_2(%arg0: i32) -> (i32, i32) {
    %c0_i32 = arith.constant 0 : i32
    %c0_i32_0 = arith.constant 0 : i32
    return %arg0, %c0_i32 : i32, i32
  }
  func.func @transform_3(%arg0: i32) -> (i32, i32, i32) {
    %c0_i32 = arith.constant 0 : i32
    %c0_i32_0 = arith.constant 0 : i32
    %c0_i32_1 = arith.constant 0 : i32
    %c0_i32_2 = arith.constant 0 : i32
    return %c0_i32, %c0_i32_0, %c0_i32_1 : i32, i32, i32
  }
  func.func @transform_4(%arg0: i32) -> (i32, i32) {
    %c0_i32 = arith.constant 0 : i32
    %c0_i32_0 = arith.constant 0 : i32
    %c0_i32_1 = arith.constant 0 : i32
    return %c0_i32, %c0_i32_0 : i32, i32
  }
  func.func @transform_5(%arg0: i32) -> (i32, i32) {
    %c0_i32 = arith.constant 0 : i32
    %c0_i32_0 = arith.constant 0 : i32
    %c0_i32_1 = arith.constant 0 : i32
    return %c0_i32, %c0_i32_0 : i32, i32
  }
  func.func @transform_6(%arg0: i32) -> (i32, i32) {
    %c0_i32 = arith.constant 0 : i32
    %c0_i32_0 = arith.constant 0 : i32
    %c0_i32_1 = arith.constant 0 : i32
    return %c0_i32, %c0_i32_0 : i32, i32
  }
  func.func @transform_7(%arg0: i32) -> (i32, i32) {
    %c0_i32 = arith.constant 0 : i32
    %c0_i32_0 = arith.constant 0 : i32
    %c0_i32_1 = arith.constant 0 : i32
    return %c0_i32, %c0_i32_0 : i32, i32
  }
  func.func @transform_8(%arg0: i32) -> (i32, i32) {
    %c0_i32 = arith.constant 0 : i32
    %c0_i32_0 = arith.constant 0 : i32
    %c0_i32_1 = arith.constant 0 : i32
    return %c0_i32, %c0_i32_0 : i32, i32
  }
  func.func @transform_9(%arg0: i32) -> (i32, i32) {
    %c0_i32 = arith.constant 0 : i32
    %c0_i32_0 = arith.constant 0 : i32
    %c0_i32_1 = arith.constant 0 : i32
    return %c0_i32, %c0_i32_0 : i32, i32
  }
  func.func @transform_10(%arg0: i32) -> (i32, i32) {
    %c0_i32 = arith.constant 0 : i32
    %c0_i32_0 = arith.constant 0 : i32
    %c0_i32_1 = arith.constant 0 : i32
    return %c0_i32, %c0_i32_0 : i32, i32
  }
  func.func @transform_11(%arg0: i32) -> (i32, i32) {
    %c0_i32 = arith.constant 0 : i32
    %c0_i32_0 = arith.constant 0 : i32
    %c0_i32_1 = arith.constant 0 : i32
    return %c0_i32, %c0_i32_0 : i32, i32
  }
  func.func @transform_12(%arg0: i32) -> (i32, i32) {
    %c0_i32 = arith.constant 0 : i32
    %c0_i32_0 = arith.constant 0 : i32
    %c0_i32_1 = arith.constant 0 : i32
    return %c0_i32, %c0_i32_0 : i32, i32
  }
  func.func @transform_13(%arg0: i32) -> (i32, i32) {
    %c0_i32 = arith.constant 0 : i32
    %c0_i32_0 = arith.constant 0 : i32
    %c0_i32_1 = arith.constant 0 : i32
    return %c0_i32, %c0_i32_0 : i32, i32
  }
  func.func @transform_14(%arg0: i32) -> (i32, i32) {
    %c0_i32 = arith.constant 0 : i32
    %c0_i32_0 = arith.constant 0 : i32
    %c0_i32_1 = arith.constant 0 : i32
    return %c0_i32, %c0_i32_0 : i32, i32
  }
  func.func @transform_15(%arg0: i32) -> (i32, i32) {
    %c0_i32 = arith.constant 0 : i32
    %c0_i32_0 = arith.constant 0 : i32
    %c0_i32_1 = arith.constant 0 : i32
    return %c0_i32, %c0_i32_0 : i32, i32
  }
  func.func @transform_16(%arg0: i32) -> (i32, i32) {
    %c0_i32 = arith.constant 0 : i32
    %c0_i32_0 = arith.constant 0 : i32
    %c0_i32_1 = arith.constant 0 : i32
    return %c0_i32, %c0_i32_0 : i32, i32
  }
  func.func @transform_17(%arg0: i32) -> (i32, i32) {
    %c0_i32 = arith.constant 0 : i32
    %c0_i32_0 = arith.constant 0 : i32
    return %arg0, %c0_i32 : i32, i32
  }
  func.func @transform_18(%arg0: i32) -> (i32, i32) {
    %c0_i32 = arith.constant 0 : i32
    %c0_i32_0 = arith.constant 0 : i32
    return %arg0, %c0_i32 : i32, i32
  }
}

</mosaic_0001>

<bundles_post_ra>
// kernel: tile.14
= control target key start
LH: loop header
LB: loop body
LE: loop exit
PB: predicated region body
PF: predicated region fallthrough
CT: control target
= control target key end

     0   :  { %vm4_vm0 = vcmask 1047556   ;;  %s99_s14 = smov 42   ;;  %s100_s19 = smov 30   ;;  %vm6_vm1 = vcmask 48128   ;;  %vm16_vm2 = vcmask 392528   ;;  %vm26_vm3 = vcmask 343328   ;;  %s196_s0 = inlined_call_operand.vmem [shape: f32[8,6,8], index: 0, kind: input, shape index: {}]   ;;  %s197_s1 = inlined_call_operand.vmem [shape: f32[48,8], index: 1, kind: output, shape index: {}]  }
   0x1   :  { %v78_v0 = vld [vmem:[%s196_s0 + $0x7] ss:$8 sm:$0xf]   ;;  %v82_v3 = vld [vmem:[%s196_s0 + $0x5] ss:$8 sm:$0xf]  }
   0x2   :  { %v79_v1 = vld [vmem:[%s196_s0 + $0x7] ss:$8 sm:$0xf0]   ;;  %v83_v4 = vld [vmem:[%s196_s0 + $0x5] ss:$8 sm:$0xf0]  }
   0x3   :  { %v13_v2 = vsel %vm4_vm0, %v79_v1, %v78_v0  ;;  %v33_v5 = vsel %vm4_vm0, %v83_v4, %v82_v3  ;;  %v80_v6 = vld [vmem:[%s196_s0 + $0x6] ss:$8 sm:$0xf]   ;;  %v84_v9 = vld [vmem:[%s196_s0 + $0x4] ss:$8 sm:$0xf]  }
   0x4   :  { %14 = vrot.lane.b32.xlu0 %v13_v2, %s99_s14  ;;  %v81_v7 = vld [vmem:[%s196_s0 + $0x6] ss:$8 sm:$0xf0]   ;;  %34 = vrot.lane.b32.xlu1 %v33_v5, %s100_s19  ;;  %v85_v10 = vld [vmem:[%s196_s0 + $0x4] ss:$8 sm:$0xf0]  }
   0x5   :  { %v23_v8 = vsel %vm4_vm0, %v81_v7, %v80_v6  ;;  %v86_v11 = vld [vmem:[%s196_s0 + $0x3] ss:$8 sm:$0xf]   ;;  %v43_v12 = vsel %vm4_vm0, %v85_v10, %v84_v9  ;;  %s101_s28 = smov 36   ;;  %s102_s4 = smov 24   ;;  %vm36_vm4 = vcmask 294128  }
   0x6   :  { %v87_v13 = vld [vmem:[%s196_s0 + $0x3] ss:$8 sm:$0xf0]   ;;  %v88_v14 = vld [vmem:[%s196_s0 + $0x2] ss:$8 sm:$0xf]  }
   0x7   :  { %v89_v15 = vld [vmem:[%s196_s0 + $0x2] ss:$8 sm:$0xf0]   ;;  %v53_v16 = vsel %vm4_vm0, %v87_v13, %v86_v11  ;;  %v90_v17 = vld [vmem:[%s196_s0 + $0x1] ss:$8 sm:$0xf]  }
   0x8   :  { %24 = vrot.lane.b32.xlu0 %v23_v8, %s101_s28  ;;  %44 = vrot.lane.b32.xlu1 %v43_v12, %s102_s4  ;;  %v63_v18 = vsel %vm4_vm0, %v89_v15, %v88_v14  ;;  %v91_v19 = vld [vmem:[%s196_s0 + $0x1] ss:$8 sm:$0xf0]   ;;  %v2_v20 = vld [vmem:[%s196_s0] ss:$8 sm:$0xf]  }
   0x9   :  { %v3_v21 = vld [vmem:[%s196_s0] ss:$8 sm:$0xf0]   ;;  %s103_s0 = smov 18   ;;  %s104_s13 = smov 12   ;;  %v73_v23 = vsel %vm4_vm0, %v91_v19, %v90_v17  ;;  %vm46_vm5 = vcmask 244928  }
   0xa   :  { %v5_v22 = vsel %vm4_vm0, %v3_v21, %v2_v20  ;;  %s105_s16 = smov 6   ;;  %vm56_vm6 = vcmask 195728   ;;  %vm66_vm7 = vcmask 146528   ;;  %vm76_vm8 = vcmask 97328  }
   0xb   :  { %7 = vst.msk [vmem:[%s197_s1] sm:$0xff] %vm6_vm1, %v5_v22  }
   0xc   :  { %54 = vrot.lane.b32.xlu0 %v53_v16, %s103_s0  ;;  %64 = vrot.lane.b32.xlu1 %v63_v18, %s104_s13 }
  0x10   :  { %74 = vrot.lane.b32.xlu0 %v73_v23, %s105_s16 }
  0x76   :  { %v15_v24 = vpop.permute.xlu0 %14   ;;  %v35_v25 = vpop.permute.xlu1 %34  }
  0x77   :  { %17 = vst.msk [vmem:[%s197_s1] sm:$0xff] %vm16_vm2, %v15_v24  }
  0x7a   :  { %v25_v26 = vpop.permute.xlu0 %24   ;;  %v45_v27 = vpop.permute.xlu1 %44  }
  0x7b   :  { %27 = vst.msk [vmem:[%s197_s1] sm:$0xff] %vm26_vm3, %v25_v26  }
  0x7c   :  { %37 = vst.msk [vmem:[%s197_s1] sm:$0xff] %vm36_vm4, %v35_v25  }
  0x7d   :  { %47 = vst.msk [vmem:[%s197_s1] sm:$0xff] %vm46_vm5, %v45_v27  }
  0x7e   :  { %v55_v28 = vpop.permute.xlu0 %54   ;;  %v65_v29 = vpop.permute.xlu1 %64  }
  0x7f   :  { %57 = vst.msk [vmem:[%s197_s1] sm:$0xff] %vm56_vm6, %v55_v28  }
  0x80   :  { %67 = vst.msk [vmem:[%s197_s1] sm:$0xff] %vm66_vm7, %v65_v29  }
  0x82   :  { %v75_v30 = vpop.permute.xlu0 %74  }
  0x83   :  { %77 = vst.msk [vmem:[%s197_s1] sm:$0xff] %vm76_vm8, %v75_v30  }

// kernel: _lambda_.1
= control target key start
LH: loop header
LB: loop body
LE: loop exit
PB: predicated region body
PF: predicated region fallthrough
CT: control target
= control target key end

     0   :  { %vm11619_vm0 = vmmov 0   ;;  %vm7187_vm1 = vcmask 523264   ;;  %vm7368_vm2 = vcmask 15360   ;;  %vm7669_vm12 = vcmask 392192   ;;  %s14903_s3 = inlined_call_operand.vmem [shape: bf16[4,768,512], index: 3, kind: input, shape index: {}]   ;;  %s14904_s1 = inlined_call_operand.vmem [shape: bf16[48,768], index: 1, kind: input, shape index: {}]   ;;  %s14905_s0 = inlined_call_operand.vmem [shape: bf16[48,768], index: 0, kind: input, shape index: {}]   ;;  %s14906_s5 = inlined_call_operand.vmem [shape: bf16[512,64], index: 5, kind: input, shape index: {}]   ;;  %s14907_s7 = inlined_call_operand.vmem [shape: bf16[64,64], index: 7, kind: input, shape index: {}]   ;;  %s14908_s4 = inlined_call_operand.vmem [shape: f32[1,512], index: 4, kind: input, shape index: {}]   ;;  %s14909_s9 = inlined_call_operand.vmem [shape: bf16[64,2], index: 9, kind: input, shape index: {}]   ;;  %s14910_s6 = inlined_call_operand.vmem [shape: f32[1,64], index: 6, kind: input, shape index: {}]   ;;  %s14911_s8 = inlined_call_operand.vmem [shape: f32[1,64], index: 8, kind: input, shape index: {}]   ;;  %s14912_s10 = inlined_call_operand.vmem [shape: f32[1,2], index: 10, kind: input, shape index: {}]   ;;  %s14913_s17 = inlined_call_operand.vmem [shape: f32[48,2], index: 17, kind: output, shape index: {0}]   ;;  %s14914_s11 = inlined_call_operand.vmem [shape: bf16[768,8], index: 11, kind: input, shape index: {}]   ;;  %s14915_s2 = inlined_call_operand.vmem [shape: bf16[8,768], index: 2, kind: input, shape index: {}]   ;;  %s14916_s13 = inlined_call_operand.vmem [shape: f32[48,8], index: 13, kind: input, shape index: {}]   ;;  %s14917_s12 = inlined_call_operand.vmem [shape: f32[48,8], index: 12, kind: input, shape index: {}]   ;;  %s14918_s15 = inlined_call_operand.vmem [shape: f32[8,3], index: 15, kind: input, shape index: {}]   ;;  %s14919_s14 = inlined_call_operand.vmem [shape: f32[1,8], index: 14, kind: input, shape index: {}]   ;;  %s14920_s16 = inlined_call_operand.vmem [shape: f32[1,3], index: 16, kind: input, shape index: {}]   ;;  %s14921_s18 = inlined_call_operand.vmem [shape: f32[8,3], index: 18, kind: output, shape index: {1}]  }
   0x1   :  { %14925 = sst [smem:[#allocation2_spill]] %s14903_s3  ;;  %vm8158_vm13 = vcmask 64512   ;;  %vm8232_vm14 = vcmask 23552  }
   0x2   :  { %14926 = sst [smem:[#allocation3_spill]] %s14904_s1  ;;  %s14928_s29 = sld [smem:[#allocation2_spill]] }
   0x3   :  { %14927 = sst [smem:[#allocation4_spill]] %s14905_s0  ;;  %s14929_s23 = sld [smem:[#allocation3_spill]] }
   0x4   :  { %s14930_s26 = sld [smem:[#allocation4_spill]]  ;;  %s11620_s1 = smov 127  }
   0x8   :  { %v10244_v0 = vld [vmem:[%s14928_s29 + $0x604] ss:$16 sps:$4 sm:$0xff]   ;;  %v10246_v1 = vld [vmem:[%s14928_s29 + $0x60c] ss:$16 sps:$4 sm:$0xff]   ;;  %v10248_v2 = vld [vmem:[%s14928_s29 + $0x600] ss:$16 sps:$4 sm:$0xff]  }
   0x9   :  { %1530 = vmatprep.subr.bf16.mxu0 %v10244_v0  ;;  %v10249_v3 = vld [vmem:[%s14928_s29 + $0x608] ss:$16 sps:$4 sm:$0xff]   ;;  %1719 = vmatprep.subr.bf16.mxu1 %v10246_v1  ;;  %v10250_v4 = vld [vmem:[%s14928_s29 + $0x624] ss:$16 sps:$4 sm:$0xff]   ;;  %v10252_v5 = vld [vmem:[%s14928_s29 + $0x62c] ss:$16 sps:$4 sm:$0xff]  }
   0xa   :  { %1531 = vmatpush1.bf16.msra.mxu0 %v10248_v2  ;;  %1720 = vmatpush1.bf16.msra.mxu1 %v10249_v3  ;;  %v10254_v6 = vld [vmem:[%s14928_s29 + $0x620] ss:$16 sps:$4 sm:$0xff]   ;;  %v10255_v7 = vld [vmem:[%s14928_s29 + $0x628] ss:$16 sps:$4 sm:$0xff]   ;;  %v10256_v8 = vld [vmem:[%s14928_s29 + $0x644] ss:$16 sps:$4 sm:$0xff]  }
   0xb   :  { %1532 = vmatprep.subr.bf16.mxu0 %v10250_v4  ;;  %1721 = vmatprep.subr.bf16.mxu1 %v10252_v5  ;;  %v10258_v9 = vld [vmem:[%s14928_s29 + $0x64c] ss:$16 sps:$4 sm:$0xff]   ;;  %v10260_v10 = vld [vmem:[%s14928_s29 + $0x640] ss:$16 sps:$4 sm:$0xff]   ;;  %v10261_v11 = vld [vmem:[%s14928_s29 + $0x648] ss:$16 sps:$4 sm:$0xff]  }
   0xc   :  { %v10262_v12 = vld [vmem:[%s14928_s29 + $0x664] ss:$16 sps:$4 sm:$0xff]   ;;  %v10264_v13 = vld [vmem:[%s14928_s29 + $0x66c] ss:$16 sps:$4 sm:$0xff]   ;;  %v10266_v14 = vld [vmem:[%s14928_s29 + $0x660] ss:$16 sps:$4 sm:$0xff]  }
   0xd   :  { %v10267_v15 = vld [vmem:[%s14928_s29 + $0x668] ss:$16 sps:$4 sm:$0xff]   ;;  %v10268_v16 = vld [vmem:[%s14928_s29 + $0x684] ss:$16 sps:$4 sm:$0xff]   ;;  %v10270_v17 = vld [vmem:[%s14928_s29 + $0x68c] ss:$16 sps:$4 sm:$0xff]  }
   0xe   :  { %1533 = vmatpush1.bf16.msra.mxu0 %v10254_v6  ;;  %1722 = vmatpush1.bf16.msra.mxu1 %v10255_v7  ;;  %v10272_v18 = vld [vmem:[%s14928_s29 + $0x680] ss:$16 sps:$4 sm:$0xff]   ;;  %v10273_v19 = vld [vmem:[%s14928_s29 + $0x688] ss:$16 sps:$4 sm:$0xff]   ;;  %v10274_v20 = vld [vmem:[%s14928_s29 + $0x6a4] ss:$16 sps:$4 sm:$0xff]  }
   0xf   :  { %1534 = vmatprep.subr.bf16.mxu0 %v10256_v8  ;;  %1723 = vmatprep.subr.bf16.mxu1 %v10258_v9  ;;  %v10276_v21 = vld [vmem:[%s14928_s29 + $0x6ac] ss:$16 sps:$4 sm:$0xff]   ;;  %v10278_v22 = vld [vmem:[%s14928_s29 + $0x6a0] ss:$16 sps:$4 sm:$0xff]   ;;  %v10279_v23 = vld [vmem:[%s14928_s29 + $0x6a8] ss:$16 sps:$4 sm:$0xff]  }
  0x10   :  { %v10280_v24 = vld [vmem:[%s14928_s29 + $0x6c4] ss:$16 sps:$4 sm:$0xff]   ;;  %v10282_v25 = vld [vmem:[%s14928_s29 + $0x6cc] ss:$16 sps:$4 sm:$0xff]   ;;  %v10284_v26 = vld [vmem:[%s14928_s29 + $0x6c0] ss:$16 sps:$4 sm:$0xff]  }
  0x11   :  { %v10285_v27 = vld [vmem:[%s14928_s29 + $0x6c8] ss:$16 sps:$4 sm:$0xff]   ;;  %v10286_v28 = vld [vmem:[%s14928_s29 + $0x6e4] ss:$16 sps:$4 sm:$0xff]   ;;  %v10288_v29 = vld [vmem:[%s14928_s29 + $0x6ec] ss:$16 sps:$4 sm:$0xff]  }
  0x12   :  { %1535 = vmatpush1.bf16.msra.mxu0 %v10260_v10  ;;  %1724 = vmatpush1.bf16.msra.mxu1 %v10261_v11  ;;  %v10290_v30 = vld [vmem:[%s14928_s29 + $0x6e0] ss:$16 sps:$4 sm:$0xff]   ;;  %v10291_v31 = vld [vmem:[%s14928_s29 + $0x6e8] ss:$16 sps:$4 sm:$0xff]   ;;  %v10292_v32 = vld [vmem:[%s14928_s29 + $0x704] ss:$16 sps:$4 sm:$0xff]  }
  0x13   :  { %1536 = vmatprep.subr.bf16.mxu0 %v10262_v12  ;;  %1725 = vmatprep.subr.bf16.mxu1 %v10264_v13  ;;  %v10294_v33 = vld [vmem:[%s14928_s29 + $0x70c] ss:$16 sps:$4 sm:$0xff]   ;;  %v10296_v34 = vld [vmem:[%s14928_s29 + $0x700] ss:$16 sps:$4 sm:$0xff]   ;;  %v10297_v35 = vld [vmem:[%s14928_s29 + $0x708] ss:$16 sps:$4 sm:$0xff]  }
  0x14   :  { %v10298_v36 = vld [vmem:[%s14928_s29 + $0x724] ss:$16 sps:$4 sm:$0xff]   ;;  %v10300_v37 = vld [vmem:[%s14928_s29 + $0x72c] ss:$16 sps:$4 sm:$0xff]   ;;  %v10302_v38 = vld [vmem:[%s14928_s29 + $0x720] ss:$16 sps:$4 sm:$0xff]  }
  0x15   :  { %v10303_v39 = vld [vmem:[%s14928_s29 + $0x728] ss:$16 sps:$4 sm:$0xff]   ;;  %v10304_v40 = vld [vmem:[%s14928_s29 + $0x744] ss:$16 sps:$4 sm:$0xff]   ;;  %v10306_v41 = vld [vmem:[%s14928_s29 + $0x74c] ss:$16 sps:$4 sm:$0xff]  }
  0x16   :  { %1537 = vmatpush1.bf16.msra.mxu0 %v10266_v14  ;;  %1726 = vmatpush1.bf16.msra.mxu1 %v10267_v15  ;;  %v10308_v42 = vld [vmem:[%s14928_s29 + $0x740] ss:$16 sps:$4 sm:$0xff]   ;;  %v10309_v43 = vld [vmem:[%s14928_s29 + $0x748] ss:$16 sps:$4 sm:$0xff]   ;;  %v10310_v44 = vld [vmem:[%s14928_s29 + $0x764] ss:$16 sps:$4 sm:$0xff]  }
  0x17   :  { %1538 = vmatprep.subr.bf16.mxu0 %v10268_v16  ;;  %1727 = vmatprep.subr.bf16.mxu1 %v10270_v17  ;;  %v10312_v45 = vld [vmem:[%s14928_s29 + $0x76c] ss:$16 sps:$4 sm:$0xff]   ;;  %v77_v46 = vld [vmem:[%s14929_s23] sm:$0xff]  ;;  %v10315_v49 = vld [vmem:[%s14928_s29 + $0x768] ss:$16 sps:$4 sm:$0xff]  }
  0x18   :  { %v80_v47 = vld [vmem:[%s14929_s23 + $0x18] sm:$0xff]  ;;  %v10314_v48 = vld [vmem:[%s14928_s29 + $0x760] ss:$16 sps:$4 sm:$0xff]   ;;  %v10316_v51 = vld [vmem:[%s14928_s29 + $0x784] ss:$16 sps:$4 sm:$0xff]  }
  0x19   :  { %v8435_v50 = vcombine.high %v77_v46, %v80_v47  ;;  %v10318_v52 = vld [vmem:[%s14928_s29 + $0x78c] ss:$16 sps:$4 sm:$0xff]   ;;  %v10320_v53 = vld [vmem:[%s14928_s29 + $0x780] ss:$16 sps:$4 sm:$0xff]   ;;  %v10321_v54 = vld [vmem:[%s14928_s29 + $0x788] ss:$16 sps:$4 sm:$0xff]   ;;  %v8434_v5 = vcombine.low %v77_v46, %v80_v47 }
  0x1a   :  { %1539 = vmatpush1.bf16.msra.mxu0 %v10272_v18  ;;  %1728 = vmatpush1.bf16.msra.mxu1 %v10273_v19  ;;  %v10322_v55 = vld [vmem:[%s14928_s29 + $0x7a4] ss:$16 sps:$4 sm:$0xff]   ;;  %v10324_v56 = vld [vmem:[%s14928_s29 + $0x7ac] ss:$16 sps:$4 sm:$0xff]   ;;  %v10326_v57 = vld [vmem:[%s14928_s29 + $0x7a0] ss:$16 sps:$4 sm:$0xff]  }
  0x1b   :  { %1540 = vmatprep.subr.bf16.mxu0 %v10274_v20  ;;  %1729 = vmatprep.subr.bf16.mxu1 %v10276_v21  ;;  %v10327_v58 = vld [vmem:[%s14928_s29 + $0x7a8] ss:$16 sps:$4 sm:$0xff]   ;;  %v10328_v59 = vld [vmem:[%s14928_s29 + $0x7c4] ss:$16 sps:$4 sm:$0xff]   ;;  %v10330_v60 = vld [vmem:[%s14928_s29 + $0x7cc] ss:$16 sps:$4 sm:$0xff]  }
  0x1c   :  { %1562 = vmatprep.mubr.bf16.mxu0 %v8435_v50  ;;  %1751 = vmatprep.mubr.bf16.mxu1 %v8435_v50  ;;  %v10332_v61 = vld [vmem:[%s14928_s29 + $0x7c0] ss:$16 sps:$4 sm:$0xff]   ;;  %v10333_v62 = vld [vmem:[%s14928_s29 + $0x7c8] ss:$16 sps:$4 sm:$0xff]   ;;  %v10334_v63 = vld [vmem:[%s14928_s29 + $0x7e4] ss:$16 sps:$4 sm:$0xff]  }
  0x1d   :  { %v10336_v0 = vld [vmem:[%s14928_s29 + $0x7ec] ss:$16 sps:$4 sm:$0xff]   ;;  %v10338_v1 = vld [vmem:[%s14928_s29 + $0x7e0] ss:$16 sps:$4 sm:$0xff]   ;;  %v10339_v2 = vld [vmem:[%s14928_s29 + $0x7e8] ss:$16 sps:$4 sm:$0xff]  }
  0x1e   :  { %1541 = vmatpush1.bf16.msra.mxu0 %v10278_v22  ;;  %1730 = vmatpush1.bf16.msra.mxu1 %v10279_v23  ;;  %v10343_v3 = vld [vmem:[%s14928_s29 + $0x804] ss:$16 sps:$4 sm:$0xff]   ;;  %v10346_v4 = vld [vmem:[%s14928_s29 + $0x80c] ss:$16 sps:$4 sm:$0xff]   ;;  %v10341_v6 = vld [vmem:[%s14928_s29 + $0x800] ss:$16 sps:$4 sm:$0xff]  }
  0x1f   :  { %1542 = vmatprep.subr.bf16.mxu0 %v10280_v24  ;;  %1731 = vmatprep.subr.bf16.mxu1 %v10282_v25  ;;  %v10344_v7 = vld [vmem:[%s14928_s29 + $0x808] ss:$16 sps:$4 sm:$0xff]   ;;  %v10350_v8 = vld [vmem:[%s14928_s29 + $0x824] ss:$16 sps:$4 sm:$0xff]   ;;  %v10353_v9 = vld [vmem:[%s14928_s29 + $0x82c] ss:$16 sps:$4 sm:$0xff]  }
  0x20   :  { %v10348_v10 = vld [vmem:[%s14928_s29 + $0x820] ss:$16 sps:$4 sm:$0xff]   ;;  %v10351_v11 = vld [vmem:[%s14928_s29 + $0x828] ss:$16 sps:$4 sm:$0xff]   ;;  %v10356_v12 = vld [vmem:[%s14928_s29 + $0x844] ss:$16 sps:$4 sm:$0xff]  }
  0x21   :  { %v10359_v13 = vld [vmem:[%s14928_s29 + $0x84c] ss:$16 sps:$4 sm:$0xff]   ;;  %v10354_v14 = vld [vmem:[%s14928_s29 + $0x840] ss:$16 sps:$4 sm:$0xff]   ;;  %v10357_v15 = vld [vmem:[%s14928_s29 + $0x848] ss:$16 sps:$4 sm:$0xff]  }
  0x22   :  { %1543 = vmatpush1.bf16.msra.mxu0 %v10284_v26  ;;  %1732 = vmatpush1.bf16.msra.mxu1 %v10285_v27  ;;  %v10362_v16 = vld [vmem:[%s14928_s29 + $0x864] ss:$16 sps:$4 sm:$0xff]   ;;  %v10365_v17 = vld [vmem:[%s14928_s29 + $0x86c] ss:$16 sps:$4 sm:$0xff]   ;;  %v10360_v18 = vld [vmem:[%s14928_s29 + $0x860] ss:$16 sps:$4 sm:$0xff]  }
  0x23   :  { %1544 = vmatprep.subr.bf16.mxu0 %v10286_v28  ;;  %1733 = vmatprep.subr.bf16.mxu1 %v10288_v29  ;;  %v10363_v19 = vld [vmem:[%s14928_s29 + $0x868] ss:$16 sps:$4 sm:$0xff]   ;;  %v83_v20 = vld [vmem:[%s14929_s23 + $0x30] sm:$0xff]  ;;  %v10371_v25 = vld [vmem:[%s14928_s29 + $0x88c] ss:$16 sps:$4 sm:$0xff]  }
  0x24   :  { %v86_v21 = vld [vmem:[%s14929_s23 + $0x48] sm:$0xff]  ;;  %v10368_v22 = vld [vmem:[%s14928_s29 + $0x884] ss:$16 sps:$4 sm:$0xff]   ;;  %v10366_v26 = vld [vmem:[%s14928_s29 + $0x880] ss:$16 sps:$4 sm:$0xff]  }
  0x25   :  { %v8441_v23 = vcombine.high %v83_v20, %v86_v21  ;;  %v8440_v24 = vcombine.low %v83_v20, %v86_v21  ;;  %v10369_v27 = vld [vmem:[%s14928_s29 + $0x888] ss:$16 sps:$4 sm:$0xff]   ;;  %v10374_v28 = vld [vmem:[%s14928_s29 + $0x8a4] ss:$16 sps:$4 sm:$0xff]   ;;  %v10377_v29 = vld [vmem:[%s14928_s29 + $0x8ac] ss:$16 sps:$4 sm:$0xff]  }
  0x26   :  { %1545 = vmatpush1.bf16.msra.mxu0 %v10290_v30  ;;  %1734 = vmatpush1.bf16.msra.mxu1 %v10291_v31  ;;  %v89_v30 = vld [vmem:[%s14929_s23 + $0x60] sm:$0xff]  ;;  %v92_v31 = vld [vmem:[%s14929_s23 + $0x78] sm:$0xff]  ;;  %v87_v21 = vld [vmem:[%s14929_s23 + $0x50] sm:$0xff] }
  0x27   :  { %1546 = vmatprep.subr.bf16.mxu0 %v10292_v32  ;;  %1735 = vmatprep.subr.bf16.mxu1 %v10294_v33  ;;  %v8447_v32 = vcombine.high %v89_v30, %v92_v31  ;;  %v8446_v33 = vcombine.low %v89_v30, %v92_v31  ;;  %v10387_v46 = vld [vmem:[%s14928_s29 + $0x8e8] ss:$16 sps:$4 sm:$0xff]   ;;  %v10392_v47 = vld [vmem:[%s14928_s29 + $0x904] ss:$16 sps:$4 sm:$0xff]  }
  0x28   :  { %v10393_v50 = vld [vmem:[%s14928_s29 + $0x908] ss:$16 sps:$4 sm:$0xff]   ;;  %v93_v31 = vld [vmem:[%s14929_s23 + $0x80] sm:$0xff] }
  0x29   :  { %v84_v20 = vld [vmem:[%s14929_s23 + $0x38] sm:$0xff] }
  0x2a   :  { %1547 = vmatpush1.bf16.msra.mxu0 %v10296_v34  ;;  %1736 = vmatpush1.bf16.msra.mxu1 %v10297_v35  ;;  %v10372_v34 = vld [vmem:[%s14928_s29 + $0x8a0] ss:$16 sps:$4 sm:$0xff]   ;;  %v10375_v35 = vld [vmem:[%s14928_s29 + $0x8a8] ss:$16 sps:$4 sm:$0xff]   ;;  %v8442_v30 = vcombine.low %v84_v20, %v87_v21 }
  0x2b   :  { %1548 = vmatprep.subr.bf16.mxu0 %v10298_v36  ;;  %1737 = vmatprep.subr.bf16.mxu1 %v10300_v37  ;;  %v10380_v36 = vld [vmem:[%s14928_s29 + $0x8c4] ss:$16 sps:$4 sm:$0xff]   ;;  %v10383_v37 = vld [vmem:[%s14928_s29 + $0x8cc] ss:$16 sps:$4 sm:$0xff]  }
  0x2e   :  { %1549 = vmatpush1.bf16.msra.mxu0 %v10302_v38  ;;  %1738 = vmatpush1.bf16.msra.mxu1 %v10303_v39  ;;  %v10378_v38 = vld [vmem:[%s14928_s29 + $0x8c0] ss:$16 sps:$4 sm:$0xff]   ;;  %v10381_v39 = vld [vmem:[%s14928_s29 + $0x8c8] ss:$16 sps:$4 sm:$0xff]  }
  0x2f   :  { %1550 = vmatprep.subr.bf16.mxu0 %v10304_v40  ;;  %1739 = vmatprep.subr.bf16.mxu1 %v10306_v41  ;;  %v12014_v40 = vld [vmem:[%s14929_s23 + $0x8] sm:$0xff]  ;;  %v12019_v41 = vld [vmem:[%s14929_s23 + $0x20] sm:$0xff] }
  0x32   :  { %1551 = vmatpush1.bf16.msra.mxu0 %v10308_v42  ;;  %1740 = vmatpush1.bf16.msra.mxu1 %v10309_v43  ;;  %v10386_v42 = vld [vmem:[%s14928_s29 + $0x8e4] ss:$16 sps:$4 sm:$0xff]   ;;  %v8437_v43 = vcombine.high %v12014_v40, %v12019_v41 }
  0x33   :  { %1552 = vmatprep.subr.bf16.mxu0 %v10310_v44  ;;  %1741 = vmatprep.subr.bf16.mxu1 %v10312_v45  ;;  %v10389_v44 = vld [vmem:[%s14928_s29 + $0x8ec] ss:$16 sps:$4 sm:$0xff]   ;;  %v10384_v45 = vld [vmem:[%s14928_s29 + $0x8e0] ss:$16 sps:$4 sm:$0xff]  }
  0x36   :  { %1553 = vmatpush1.bf16.msra.mxu0 %v10314_v48  ;;  %1742 = vmatpush1.bf16.msra.mxu1 %v10315_v49  ;;  %v10395_v48 = vld [vmem:[%s14928_s29 + $0x90c] ss:$16 sps:$4 sm:$0xff]   ;;  %v10390_v49 = vld [vmem:[%s14928_s29 + $0x900] ss:$16 sps:$4 sm:$0xff]  }
  0x37   :  { %1554 = vmatprep.subr.bf16.mxu0 %v10316_v51  ;;  %1743 = vmatprep.subr.bf16.mxu1 %v10318_v52  ;;  %v10398_v51 = vld [vmem:[%s14928_s29 + $0x924] ss:$16 sps:$4 sm:$0xff]   ;;  %v10401_v52 = vld [vmem:[%s14928_s29 + $0x92c] ss:$16 sps:$4 sm:$0xff]  }
  0x3a   :  { %1555 = vmatpush1.bf16.msra.mxu0 %v10320_v53  ;;  %1744 = vmatpush1.bf16.msra.mxu1 %v10321_v54  ;;  %v10396_v53 = vld [vmem:[%s14928_s29 + $0x920] ss:$16 sps:$4 sm:$0xff]   ;;  %v10399_v54 = vld [vmem:[%s14928_s29 + $0x928] ss:$16 sps:$4 sm:$0xff]  }
  0x3b   :  { %1556 = vmatprep.subr.bf16.mxu0 %v10322_v55  ;;  %1745 = vmatprep.subr.bf16.mxu1 %v10324_v56  ;;  %v10404_v55 = vld [vmem:[%s14928_s29 + $0x944] ss:$16 sps:$4 sm:$0xff]   ;;  %v10407_v56 = vld [vmem:[%s14928_s29 + $0x94c] ss:$16 sps:$4 sm:$0xff]  }
  0x3e   :  { %1557 = vmatpush1.bf16.msra.mxu0 %v10326_v57  ;;  %1746 = vmatpush1.bf16.msra.mxu1 %v10327_v58  ;;  %v10402_v57 = vld [vmem:[%s14928_s29 + $0x940] ss:$16 sps:$4 sm:$0xff]   ;;  %v10405_v58 = vld [vmem:[%s14928_s29 + $0x948] ss:$16 sps:$4 sm:$0xff]  }
  0x3f   :  { %1558 = vmatprep.subr.bf16.mxu0 %v10328_v59  ;;  %1747 = vmatprep.subr.bf16.mxu1 %v10330_v60  ;;  %v10410_v59 = vld [vmem:[%s14928_s29 + $0x964] ss:$16 sps:$4 sm:$0xff]   ;;  %v10413_v60 = vld [vmem:[%s14928_s29 + $0x96c] ss:$16 sps:$4 sm:$0xff]  }
  0x42   :  { %1559 = vmatpush1.bf16.msra.mxu0 %v10332_v61  ;;  %1748 = vmatpush1.bf16.msra.mxu1 %v10333_v62  ;;  %v10408_v61 = vld [vmem:[%s14928_s29 + $0x960] ss:$16 sps:$4 sm:$0xff]   ;;  %v10411_v62 = vld [vmem:[%s14928_s29 + $0x968] ss:$16 sps:$4 sm:$0xff]  }
  0x43   :  { %1560 = vmatprep.subr.bf16.mxu0 %v10334_v63  ;;  %1749 = vmatprep.subr.bf16.mxu1 %v10336_v0  ;;  %v10417_v63 = vld [vmem:[%s14928_s29 + $0x984] ss:$16 sps:$4 sm:$0xff]   ;;  %v10420_v0 = vld [vmem:[%s14928_s29 + $0x98c] ss:$16 sps:$4 sm:$0xff]  }
  0x46   :  { %1561 = vmatpush1.bf16.msra.mxu0 %v10338_v1  ;;  %1750 = vmatpush1.bf16.msra.mxu1 %v10339_v2  ;;  %v10415_v1 = vld [vmem:[%s14928_s29 + $0x980] ss:$16 sps:$4 sm:$0xff]   ;;  %v10418_v2 = vld [vmem:[%s14928_s29 + $0x988] ss:$16 sps:$4 sm:$0xff]  }
  0x47   :  { %1593 = vmatprep.subr.bf16.mxu0 %v10343_v3  ;;  %1782 = vmatprep.subr.bf16.mxu1 %v10346_v4  ;;  %v10424_v3 = vld [vmem:[%s14928_s29 + $0x9a4] ss:$16 sps:$4 sm:$0xff]   ;;  %v10427_v4 = vld [vmem:[%s14928_s29 + $0x9ac] ss:$16 sps:$4 sm:$0xff]  }
  0x49   :  { %1563 = vmatmul.mubr.bf16.vlgmr.msra.gmra.mrb[0].mxu0 %v8434_v5  ;;  %1752 = vmatmul.mubr.bf16.vlgmr.msra.gmra.mrb[0].mxu1 %v8434_v5  ;;  %v10422_v5 = vld [vmem:[%s14928_s29 + $0x9a0] ss:$16 sps:$4 sm:$0xff]  }
  0x4a   :  { %1594 = vmatpush1.bf16.msra.mxu0 %v10341_v6  ;;  %1783 = vmatpush1.bf16.msra.mxu1 %v10344_v7  ;;  %v10425_v6 = vld [vmem:[%s14928_s29 + $0x9a8] ss:$16 sps:$4 sm:$0xff]   ;;  %v10431_v7 = vld [vmem:[%s14928_s29 + $0x9c4] ss:$16 sps:$4 sm:$0xff]  }
  0x4b   :  { %1595 = vmatprep.subr.bf16.mxu0 %v10350_v8  ;;  %1784 = vmatprep.subr.bf16.mxu1 %v10353_v9  ;;  %v10434_v8 = vld [vmem:[%s14928_s29 + $0x9cc] ss:$16 sps:$4 sm:$0xff]   ;;  %v10429_v9 = vld [vmem:[%s14928_s29 + $0x9c0] ss:$16 sps:$4 sm:$0xff]  }
  0x4c   :  { %1572 = vmatprep.mubr.bf16.mxu0 %v8441_v23  ;;  %1761 = vmatprep.mubr.bf16.mxu1 %v8441_v23  ;;  %v10455_v23 = vld [vmem:[%s14928_s29 + $0xa2c] ss:$16 sps:$4 sm:$0xff]  }
  0x4e   :  { %1596 = vmatpush1.bf16.msra.mxu0 %v10348_v10  ;;  %1785 = vmatpush1.bf16.msra.mxu1 %v10351_v11  ;;  %v10432_v10 = vld [vmem:[%s14928_s29 + $0x9c8] ss:$16 sps:$4 sm:$0xff]   ;;  %v10438_v11 = vld [vmem:[%s14928_s29 + $0x9e4] ss:$16 sps:$4 sm:$0xff]  }
  0x4f   :  { %1597 = vmatprep.subr.bf16.mxu0 %v10356_v12  ;;  %1786 = vmatprep.subr.bf16.mxu1 %v10359_v13  ;;  %v10441_v12 = vld [vmem:[%s14928_s29 + $0x9ec] ss:$16 sps:$4 sm:$0xff]   ;;  %v10436_v13 = vld [vmem:[%s14928_s29 + $0x9e0] ss:$16 sps:$4 sm:$0xff]  }
  0x51   :  { %1573 = vmatmul.mubr.bf16.gmra.mrb[4].mxu0 %v8440_v24  ;;  %1762 = vmatmul.mubr.bf16.gmra.mrb[4].mxu1 %v8440_v24  ;;  %v8443_v24 = vcombine.high %v84_v20, %v87_v21  ;;  %v10536_v20 = vld [vmem:[%s14928_s29 + $0xbcc] ss:$16 sps:$4 sm:$0xff]   ;;  %v10531_v21 = vld [vmem:[%s14928_s29 + $0xbc0] ss:$16 sps:$4 sm:$0xff]  }
  0x52   :  { %1598 = vmatpush1.bf16.msra.mxu0 %v10354_v14  ;;  %1787 = vmatpush1.bf16.msra.mxu1 %v10357_v15  ;;  %v10439_v14 = vld [vmem:[%s14928_s29 + $0x9e8] ss:$16 sps:$4 sm:$0xff]   ;;  %v10445_v15 = vld [vmem:[%s14928_s29 + $0xa04] ss:$16 sps:$4 sm:$0xff]  }
  0x53   :  { %1599 = vmatprep.subr.bf16.mxu0 %v10362_v16  ;;  %1788 = vmatprep.subr.bf16.mxu1 %v10365_v17  ;;  %v10448_v16 = vld [vmem:[%s14928_s29 + $0xa0c] ss:$16 sps:$4 sm:$0xff]   ;;  %v10443_v17 = vld [vmem:[%s14928_s29 + $0xa00] ss:$16 sps:$4 sm:$0xff]  }
  0x54   :  { %1582 = vmatprep.mubr.bf16.mxu0 %v8447_v32  ;;  %1771 = vmatprep.mubr.bf16.mxu1 %v8447_v32  ;;  %v10456_v32 = vld [vmem:[%s14928_s29 + $0xa40] ss:$16 sps:$4 sm:$0xff]  }
  0x56   :  { %1600 = vmatpush1.bf16.msra.mxu0 %v10360_v18  ;;  %1789 = vmatpush1.bf16.msra.mxu1 %v10363_v19  ;;  %v10446_v18 = vld [vmem:[%s14928_s29 + $0xa08] ss:$16 sps:$4 sm:$0xff]   ;;  %v8436_v19 = vcombine.low %v12014_v40, %v12019_v41  ;;  %v10473_v40 = vld [vmem:[%s14928_s29 + $0xa8c] ss:$16 sps:$4 sm:$0xff]   ;;  %v12202_v41 = vld [vmem:[%s14929_s23 + $0x10] sm:$0xff] }
  0x57   :  { %1601 = vmatprep.subr.bf16.mxu0 %v10368_v22  ;;  %1790 = vmatprep.subr.bf16.mxu1 %v10371_v25  ;;  %v10452_v22 = vld [vmem:[%s14928_s29 + $0xa24] ss:$16 sps:$4 sm:$0xff]   ;;  %v10450_v25 = vld [vmem:[%s14928_s29 + $0xa20] ss:$16 sps:$4 sm:$0xff]  }
  0x59   :  { %1583 = vmatmul.mubr.bf16.gmra.mrb[8].mxu0 %v8446_v33  ;;  %1772 = vmatmul.mubr.bf16.gmra.mrb[8].mxu1 %v8446_v33  ;;  %v10459_v33 = vld [vmem:[%s14928_s29 + $0xa48] ss:$16 sps:$4 sm:$0xff]  }
  0x5a   :  { %1602 = vmatpush1.bf16.msra.mxu0 %v10366_v26  ;;  %1791 = vmatpush1.bf16.msra.mxu1 %v10369_v27  ;;  %v10453_v26 = vld [vmem:[%s14928_s29 + $0xa28] ss:$16 sps:$4 sm:$0xff]   ;;  %v10458_v27 = vld [vmem:[%s14928_s29 + $0xa44] ss:$16 sps:$4 sm:$0xff]  }
  0x5b   :  { %1603 = vmatprep.subr.bf16.mxu0 %v10374_v28  ;;  %1792 = vmatprep.subr.bf16.mxu1 %v10377_v29  ;;  %v10461_v28 = vld [vmem:[%s14928_s29 + $0xa4c] ss:$16 sps:$4 sm:$0xff]  }
  0x5c   :  { %1625 = vmatprep.mubr.bf16.mxu0 %v8437_v43  ;;  %1814 = vmatprep.mubr.bf16.mxu1 %v8437_v43  ;;  %v90_v29 = vld [vmem:[%s14929_s23 + $0x68] sm:$0xff] }
  0x5d   :  { %v12207_v43 = vld [vmem:[%s14929_s23 + $0x28] sm:$0xff] }
  0x5e   :  { %1604 = vmatpush1.bf16.msra.mxu0 %v10372_v34  ;;  %1793 = vmatpush1.bf16.msra.mxu1 %v10375_v35  ;;  %v10464_v34 = vld [vmem:[%s14928_s29 + $0xa64] ss:$16 sps:$4 sm:$0xff]   ;;  %v10467_v35 = vld [vmem:[%s14928_s29 + $0xa6c] ss:$16 sps:$4 sm:$0xff]  }
  0x5f   :  { %1605 = vmatprep.subr.bf16.mxu0 %v10380_v36  ;;  %1794 = vmatprep.subr.bf16.mxu1 %v10383_v37  ;;  %v8449_v36 = vcombine.high %v90_v29, %v93_v31  ;;  %v10462_v37 = vld [vmem:[%s14928_s29 + $0xa60] ss:$16 sps:$4 sm:$0xff]  }
  0x62   :  { %1606 = vmatpush1.bf16.msra.mxu0 %v10378_v38  ;;  %1795 = vmatpush1.bf16.msra.mxu1 %v10381_v39  ;;  %v10465_v38 = vld [vmem:[%s14928_s29 + $0xa68] ss:$16 sps:$4 sm:$0xff]   ;;  %v10470_v39 = vld [vmem:[%s14928_s29 + $0xa84] ss:$16 sps:$4 sm:$0xff]  }
  0x63   :  { %1607 = vmatprep.subr.bf16.mxu0 %v10386_v42  ;;  %1796 = vmatprep.subr.bf16.mxu1 %v10389_v44  ;;  %v8448_v42 = vcombine.low %v90_v29, %v93_v31  ;;  %v10468_v44 = vld [vmem:[%s14928_s29 + $0xa80] ss:$16 sps:$4 sm:$0xff]   ;;  %v8438_v31 = vcombine.low %v12202_v41, %v12207_v43 }
  0x64   :  { %v10545_v29 = vld [vmem:[%s14928_s29] ss:$16 sps:$4 sm:$0xff]  }
  0x66   :  { %1608 = vmatpush1.bf16.msra.mxu0 %v10384_v45  ;;  %1797 = vmatpush1.bf16.msra.mxu1 %v10387_v46  ;;  %v10471_v45 = vld [vmem:[%s14928_s29 + $0xa88] ss:$16 sps:$4 sm:$0xff]   ;;  %v10476_v46 = vld [vmem:[%s14928_s29 + $0xaa4] ss:$16 sps:$4 sm:$0xff]  }
  0x67   :  { %1609 = vmatprep.subr.bf16.mxu0 %v10392_v47  ;;  %1798 = vmatprep.subr.bf16.mxu1 %v10395_v48  ;;  %v10479_v47 = vld [vmem:[%s14928_s29 + $0xaac] ss:$16 sps:$4 sm:$0xff]   ;;  %v8439_v48 = vcombine.high %v12202_v41, %v12207_v43  ;;  %v10558_v41 = vld [vmem:[%s14928_s29 + $0x40] ss:$16 sps:$4 sm:$0xff]  }
  0x6a   :  { %1610 = vmatpush1.bf16.msra.mxu0 %v10390_v49  ;;  %1799 = vmatpush1.bf16.msra.mxu1 %v10393_v50  ;;  %v10474_v49 = vld [vmem:[%s14928_s29 + $0xaa0] ss:$16 sps:$4 sm:$0xff]   ;;  %v10477_v50 = vld [vmem:[%s14928_s29 + $0xaa8] ss:$16 sps:$4 sm:$0xff]  }
  0x6b   :  { %1611 = vmatprep.subr.bf16.mxu0 %v10398_v51  ;;  %1800 = vmatprep.subr.bf16.mxu1 %v10401_v52  ;;  %v10482_v51 = vld [vmem:[%s14928_s29 + $0xac4] ss:$16 sps:$4 sm:$0xff]   ;;  %v10485_v52 = vld [vmem:[%s14928_s29 + $0xacc] ss:$16 sps:$4 sm:$0xff]  }
  0x6e   :  { %1612 = vmatpush1.bf16.msra.mxu0 %v10396_v53  ;;  %1801 = vmatpush1.bf16.msra.mxu1 %v10399_v54  ;;  %v10480_v53 = vld [vmem:[%s14928_s29 + $0xac0] ss:$16 sps:$4 sm:$0xff]   ;;  %v10483_v54 = vld [vmem:[%s14928_s29 + $0xac8] ss:$16 sps:$4 sm:$0xff]  }
  0x6f   :  { %1613 = vmatprep.subr.bf16.mxu0 %v10404_v55  ;;  %1802 = vmatprep.subr.bf16.mxu1 %v10407_v56  ;;  %v10488_v55 = vld [vmem:[%s14928_s29 + $0xae4] ss:$16 sps:$4 sm:$0xff]   ;;  %v10491_v56 = vld [vmem:[%s14928_s29 + $0xaec] ss:$16 sps:$4 sm:$0xff]  }
  0x72   :  { %1614 = vmatpush1.bf16.msra.mxu0 %v10402_v57  ;;  %1803 = vmatpush1.bf16.msra.mxu1 %v10405_v58  ;;  %v10486_v57 = vld [vmem:[%s14928_s29 + $0xae0] ss:$16 sps:$4 sm:$0xff]   ;;  %v10489_v58 = vld [vmem:[%s14928_s29 + $0xae8] ss:$16 sps:$4 sm:$0xff]  }
  0x73   :  { %1615 = vmatprep.subr.bf16.mxu0 %v10410_v59  ;;  %1804 = vmatprep.subr.bf16.mxu1 %v10413_v60  ;;  %v10494_v59 = vld [vmem:[%s14928_s29 + $0xb04] ss:$16 sps:$4 sm:$0xff]   ;;  %v10497_v60 = vld [vmem:[%s14928_s29 + $0xb0c] ss:$16 sps:$4 sm:$0xff]  }
  0x76   :  { %1616 = vmatpush1.bf16.msra.mxu0 %v10408_v61  ;;  %1805 = vmatpush1.bf16.msra.mxu1 %v10411_v62  ;;  %v10492_v61 = vld [vmem:[%s14928_s29 + $0xb00] ss:$16 sps:$4 sm:$0xff]   ;;  %v10495_v62 = vld [vmem:[%s14928_s29 + $0xb08] ss:$16 sps:$4 sm:$0xff]  }
  0x77   :  { %1617 = vmatprep.subr.bf16.mxu0 %v10417_v63  ;;  %1806 = vmatprep.subr.bf16.mxu1 %v10420_v0  ;;  %v10500_v63 = vld [vmem:[%s14928_s29 + $0xb24] ss:$16 sps:$4 sm:$0xff]   ;;  %v10503_v0 = vld [vmem:[%s14928_s29 + $0xb2c] ss:$16 sps:$4 sm:$0xff]  }
  0x7a   :  { %1618 = vmatpush1.bf16.msra.mxu0 %v10415_v1  ;;  %1807 = vmatpush1.bf16.msra.mxu1 %v10418_v2  ;;  %v10498_v1 = vld [vmem:[%s14928_s29 + $0xb20] ss:$16 sps:$4 sm:$0xff]   ;;  %v10501_v2 = vld [vmem:[%s14928_s29 + $0xb28] ss:$16 sps:$4 sm:$0xff]  }
  0x7b   :  { %1619 = vmatprep.subr.bf16.mxu0 %v10424_v3  ;;  %1808 = vmatprep.subr.bf16.mxu1 %v10427_v4  ;;  %v10506_v3 = vld [vmem:[%s14928_s29 + $0xb44] ss:$16 sps:$4 sm:$0xff]   ;;  %v10509_v4 = vld [vmem:[%s14928_s29 + $0xb4c] ss:$16 sps:$4 sm:$0xff]  }
  0x7e   :  { %1620 = vmatpush1.bf16.msra.mxu0 %v10422_v5  ;;  %1809 = vmatpush1.bf16.msra.mxu1 %v10425_v6  ;;  %v10504_v5 = vld [vmem:[%s14928_s29 + $0xb40] ss:$16 sps:$4 sm:$0xff]   ;;  %v10507_v6 = vld [vmem:[%s14928_s29 + $0xb48] ss:$16 sps:$4 sm:$0xff]  }
  0x7f   :  { %1621 = vmatprep.subr.bf16.mxu0 %v10431_v7  ;;  %1810 = vmatprep.subr.bf16.mxu1 %v10434_v8  ;;  %v10512_v7 = vld [vmem:[%s14928_s29 + $0xb64] ss:$16 sps:$4 sm:$0xff]   ;;  %v10515_v8 = vld [vmem:[%s14928_s29 + $0xb6c] ss:$16 sps:$4 sm:$0xff]  }
  0x82   :  { %1622 = vmatpush1.bf16.msra.mxu0 %v10429_v9  ;;  %1811 = vmatpush1.bf16.msra.mxu1 %v10432_v10  ;;  %v10510_v9 = vld [vmem:[%s14928_s29 + $0xb60] ss:$16 sps:$4 sm:$0xff]   ;;  %v10513_v10 = vld [vmem:[%s14928_s29 + $0xb68] ss:$16 sps:$4 sm:$0xff]  }
  0x83   :  { %1623 = vmatprep.subr.bf16.mxu0 %v10438_v11  ;;  %1812 = vmatprep.subr.bf16.mxu1 %v10441_v12  ;;  %v10519_v11 = vld [vmem:[%s14928_s29 + $0xb84] ss:$16 sps:$4 sm:$0xff]   ;;  %v10522_v12 = vld [vmem:[%s14928_s29 + $0xb8c] ss:$16 sps:$4 sm:$0xff]  }
  0x86   :  { %1624 = vmatpush1.bf16.msra.mxu0 %v10436_v13  ;;  %1813 = vmatpush1.bf16.msra.mxu1 %v10439_v14  ;;  %v10517_v13 = vld [vmem:[%s14928_s29 + $0xb80] ss:$16 sps:$4 sm:$0xff]   ;;  %v10520_v14 = vld [vmem:[%s14928_s29 + $0xb88] ss:$16 sps:$4 sm:$0xff]  }
  0x87   :  { %1656 = vmatprep.subr.bf16.mxu0 %v10445_v15  ;;  %1845 = vmatprep.subr.bf16.mxu1 %v10448_v16  ;;  %v10526_v15 = vld [vmem:[%s14928_s29 + $0xba4] ss:$16 sps:$4 sm:$0xff]   ;;  %v10529_v16 = vld [vmem:[%s14928_s29 + $0xbac] ss:$16 sps:$4 sm:$0xff]  }
  0x89   :  { %1626 = vmatmul.mubr.bf16.vlgmr.msra.gmra.mrb[0].mxu0 %v8436_v19  ;;  %1815 = vmatmul.mubr.bf16.vlgmr.msra.gmra.mrb[0].mxu1 %v8436_v19  ;;  %v10533_v19 = vld [vmem:[%s14928_s29 + $0xbc4] ss:$16 sps:$4 sm:$0xff]  }
  0x8a   :  { %1657 = vmatpush1.bf16.msra.mxu0 %v10443_v17  ;;  %1846 = vmatpush1.bf16.msra.mxu1 %v10446_v18  ;;  %v10524_v17 = vld [vmem:[%s14928_s29 + $0xba0] ss:$16 sps:$4 sm:$0xff]   ;;  %v10527_v18 = vld [vmem:[%s14928_s29 + $0xba8] ss:$16 sps:$4 sm:$0xff]  }
  0x8b   :  { %1658 = vmatprep.subr.bf16.mxu0 %v10452_v22  ;;  %1847 = vmatprep.subr.bf16.mxu1 %v10455_v23  ;;  %v10534_v22 = vld [vmem:[%s14928_s29 + $0xbc8] ss:$16 sps:$4 sm:$0xff]   ;;  %v10540_v23 = vld [vmem:[%s14928_s29 + $0xbe4] ss:$16 sps:$4 sm:$0xff]  }
  0x8c   :  { %1635 = vmatprep.mubr.bf16.mxu0 %v8443_v24  ;;  %1824 = vmatprep.mubr.bf16.mxu1 %v8443_v24  ;;  %v10543_v24 = vld [vmem:[%s14928_s29 + $0xbec] ss:$16 sps:$4 sm:$0xff]  }
  0x8e   :  { %1659 = vmatpush1.bf16.msra.mxu0 %v10450_v25  ;;  %1848 = vmatpush1.bf16.msra.mxu1 %v10453_v26  ;;  %v10538_v25 = vld [vmem:[%s14928_s29 + $0xbe0] ss:$16 sps:$4 sm:$0xff]   ;;  %v10541_v26 = vld [vmem:[%s14928_s29 + $0xbe8] ss:$16 sps:$4 sm:$0xff]  }
  0x8f   :  { %1660 = vmatprep.subr.bf16.mxu0 %v10458_v27  ;;  %1849 = vmatprep.subr.bf16.mxu1 %v10461_v28  ;;  %v10547_v27 = vld [vmem:[%s14928_s29 + $0x4] ss:$16 sps:$4 sm:$0xff]   ;;  %v10550_v28 = vld [vmem:[%s14928_s29 + $0xc] ss:$16 sps:$4 sm:$0xff]  }
  0x91   :  { %1636 = vmatmul.mubr.bf16.gmra.mrb[4].mxu0 %v8442_v30  ;;  %1825 = vmatmul.mubr.bf16.gmra.mrb[4].mxu1 %v8442_v30  ;;  %v10548_v30 = vld [vmem:[%s14928_s29 + $0x8] ss:$16 sps:$4 sm:$0xff]  }
  0x92   :  { %1661 = vmatpush1.bf16.msra.mxu0 %v10456_v32  ;;  %1850 = vmatpush1.bf16.msra.mxu1 %v10459_v33  ;;  %v85_v32 = vld [vmem:[%s14929_s23 + $0x40] sm:$0xff]  ;;  %v88_v33 = vld [vmem:[%s14929_s23 + $0x58] sm:$0xff] }
  0x93   :  { %1662 = vmatprep.subr.bf16.mxu0 %v10464_v34  ;;  %1851 = vmatprep.subr.bf16.mxu1 %v10467_v35  ;;  %v10554_v34 = vld [vmem:[%s14928_s29 + $0x24] ss:$16 sps:$4 sm:$0xff]   ;;  %v10557_v35 = vld [vmem:[%s14928_s29 + $0x2c] ss:$16 sps:$4 sm:$0xff]   ;;  %v8444_v43 = vcombine.low %v85_v32, %v88_v33 }
  0x94   :  { %1645 = vmatprep.mubr.bf16.mxu0 %v8449_v36  ;;  %1834 = vmatprep.mubr.bf16.mxu1 %v8449_v36  ;;  %v8445_v36 = vcombine.high %v85_v32, %v88_v33  ;;  %v10638_v32 = vld [vmem:[%s14928_s29 + $0x1cc] ss:$16 sps:$4 sm:$0xff]   ;;  %v10633_v33 = vld [vmem:[%s14928_s29 + $0x1c0] ss:$16 sps:$4 sm:$0xff]  }
  0x96   :  { %1663 = vmatpush1.bf16.msra.mxu0 %v10462_v37  ;;  %1852 = vmatpush1.bf16.msra.mxu1 %v10465_v38  ;;  %v10552_v37 = vld [vmem:[%s14928_s29 + $0x20] ss:$16 sps:$4 sm:$0xff]   ;;  %v10555_v38 = vld [vmem:[%s14928_s29 + $0x28] ss:$16 sps:$4 sm:$0xff]  }
  0x97   :  { %1664 = vmatprep.subr.bf16.mxu0 %v10470_v39  ;;  %1853 = vmatprep.subr.bf16.mxu1 %v10473_v40  ;;  %v10560_v39 = vld [vmem:[%s14928_s29 + $0x44] ss:$16 sps:$4 sm:$0xff]   ;;  %v10563_v40 = vld [vmem:[%s14928_s29 + $0x4c] ss:$16 sps:$4 sm:$0xff]  }
  0x99   :  { %1646 = vmatmul.mubr.bf16.gmra.mrb[8].mxu0 %v8448_v42  ;;  %1835 = vmatmul.mubr.bf16.gmra.mrb[8].mxu1 %v8448_v42  ;;  %v10561_v42 = vld [vmem:[%s14928_s29 + $0x48] ss:$16 sps:$4 sm:$0xff]  }
  0x9a   :  { %1665 = vmatpush1.bf16.msra.mxu0 %v10468_v44  ;;  %1854 = vmatpush1.bf16.msra.mxu1 %v10471_v45  ;;  %v91_v44 = vld [vmem:[%s14929_s23 + $0x70] sm:$0xff]  ;;  %v94_v45 = vld [vmem:[%s14929_s23 + $0x88] sm:$0xff] }
  0x9b   :  { %1666 = vmatprep.subr.bf16.mxu0 %v10476_v46  ;;  %1855 = vmatprep.subr.bf16.mxu1 %v10479_v47  ;;  %v10566_v46 = vld [vmem:[%s14928_s29 + $0x64] ss:$16 sps:$4 sm:$0xff]   ;;  %v10569_v47 = vld [vmem:[%s14928_s29 + $0x6c] ss:$16 sps:$4 sm:$0xff]  }
  0x9c   :  { %1688 = vmatprep.mubr.bf16.mxu0 %v8439_v48  ;;  %1877 = vmatprep.mubr.bf16.mxu1 %v8439_v48  ;;  %v8451_v48 = vcombine.high %v91_v44, %v94_v45 }
  0x9e   :  { %1667 = vmatpush1.bf16.msra.mxu0 %v10474_v49  ;;  %1856 = vmatpush1.bf16.msra.mxu1 %v10477_v50  ;;  %v10564_v49 = vld [vmem:[%s14928_s29 + $0x60] ss:$16 sps:$4 sm:$0xff]   ;;  %v10567_v50 = vld [vmem:[%s14928_s29 + $0x68] ss:$16 sps:$4 sm:$0xff]  }
  0x9f   :  { %1668 = vmatprep.subr.bf16.mxu0 %v10482_v51  ;;  %1857 = vmatprep.subr.bf16.mxu1 %v10485_v52  ;;  %v10572_v51 = vld [vmem:[%s14928_s29 + $0x84] ss:$16 sps:$4 sm:$0xff]   ;;  %v10575_v52 = vld [vmem:[%s14928_s29 + $0x8c] ss:$16 sps:$4 sm:$0xff]  }
  0xa2   :  { %1669 = vmatpush1.bf16.msra.mxu0 %v10480_v53  ;;  %1858 = vmatpush1.bf16.msra.mxu1 %v10483_v54  ;;  %v10570_v53 = vld [vmem:[%s14928_s29 + $0x80] ss:$16 sps:$4 sm:$0xff]   ;;  %v8450_v54 = vcombine.low %v91_v44, %v94_v45  ;;  %v68_v45 = vld [vmem:[%s14930_s26 + $0x48] sm:$0xff] }
  0xa3   :  { %1670 = vmatprep.subr.bf16.mxu0 %v10488_v55  ;;  %1859 = vmatprep.subr.bf16.mxu1 %v10491_v56  ;;  %v12423_v55 = vld [vmem:[%s14930_s26] sm:$0xff]  ;;  %v12428_v56 = vld [vmem:[%s14930_s26 + $0x18] sm:$0xff]  ;;  %v65_v44 = vld [vmem:[%s14930_s26 + $0x30] sm:$0xff] }
  0xa6   :  { %1671 = vmatpush1.bf16.msra.mxu0 %v10486_v57  ;;  %1860 = vmatpush1.bf16.msra.mxu1 %v10489_v58  ;;  %v10573_v57 = vld [vmem:[%s14928_s29 + $0x88] ss:$16 sps:$4 sm:$0xff]   ;;  %v10578_v58 = vld [vmem:[%s14928_s29 + $0xa4] ss:$16 sps:$4 sm:$0xff]  }
  0xa7   :  { %1672 = vmatprep.subr.bf16.mxu0 %v10494_v59  ;;  %1861 = vmatprep.subr.bf16.mxu1 %v10497_v60  ;;  %v10581_v59 = vld [vmem:[%s14928_s29 + $0xac] ss:$16 sps:$4 sm:$0xff]   ;;  %v8645_v60 = vcombine.high %v12423_v55, %v12428_v56 }
  0xaa   :  { %1673 = vmatpush1.bf16.msra.mxu0 %v10492_v61  ;;  %1862 = vmatpush1.bf16.msra.mxu1 %v10495_v62  ;;  %v10576_v61 = vld [vmem:[%s14928_s29 + $0xa0] ss:$16 sps:$4 sm:$0xff]   ;;  %v10579_v62 = vld [vmem:[%s14928_s29 + $0xa8] ss:$16 sps:$4 sm:$0xff]  }
  0xab   :  { %1674 = vmatprep.subr.bf16.mxu0 %v10500_v63  ;;  %1863 = vmatprep.subr.bf16.mxu1 %v10503_v0  ;;  %v10584_v63 = vld [vmem:[%s14928_s29 + $0xc4] ss:$16 sps:$4 sm:$0xff]   ;;  %v10587_v0 = vld [vmem:[%s14928_s29 + $0xcc] ss:$16 sps:$4 sm:$0xff]  }
  0xae   :  { %1675 = vmatpush1.bf16.msra.mxu0 %v10498_v1  ;;  %1864 = vmatpush1.bf16.msra.mxu1 %v10501_v2  ;;  %v10582_v1 = vld [vmem:[%s14928_s29 + $0xc0] ss:$16 sps:$4 sm:$0xff]   ;;  %v10585_v2 = vld [vmem:[%s14928_s29 + $0xc8] ss:$16 sps:$4 sm:$0xff]  }
  0xaf   :  { %1676 = vmatprep.subr.bf16.mxu0 %v10506_v3  ;;  %1865 = vmatprep.subr.bf16.mxu1 %v10509_v4  ;;  %v10590_v3 = vld [vmem:[%s14928_s29 + $0xe4] ss:$16 sps:$4 sm:$0xff]   ;;  %v10593_v4 = vld [vmem:[%s14928_s29 + $0xec] ss:$16 sps:$4 sm:$0xff]  }
  0xb2   :  { %1677 = vmatpush1.bf16.msra.mxu0 %v10504_v5  ;;  %1866 = vmatpush1.bf16.msra.mxu1 %v10507_v6  ;;  %v10588_v5 = vld [vmem:[%s14928_s29 + $0xe0] ss:$16 sps:$4 sm:$0xff]   ;;  %v10591_v6 = vld [vmem:[%s14928_s29 + $0xe8] ss:$16 sps:$4 sm:$0xff]  }
  0xb3   :  { %1678 = vmatprep.subr.bf16.mxu0 %v10512_v7  ;;  %1867 = vmatprep.subr.bf16.mxu1 %v10515_v8  ;;  %v10596_v7 = vld [vmem:[%s14928_s29 + $0x104] ss:$16 sps:$4 sm:$0xff]   ;;  %v10599_v8 = vld [vmem:[%s14928_s29 + $0x10c] ss:$16 sps:$4 sm:$0xff]  }
  0xb6   :  { %1679 = vmatpush1.bf16.msra.mxu0 %v10510_v9  ;;  %1868 = vmatpush1.bf16.msra.mxu1 %v10513_v10  ;;  %v10594_v9 = vld [vmem:[%s14928_s29 + $0x100] ss:$16 sps:$4 sm:$0xff]   ;;  %v10597_v10 = vld [vmem:[%s14928_s29 + $0x108] ss:$16 sps:$4 sm:$0xff]  }
  0xb7   :  { %1680 = vmatprep.subr.bf16.mxu0 %v10519_v11  ;;  %1869 = vmatprep.subr.bf16.mxu1 %v10522_v12  ;;  %v10602_v11 = vld [vmem:[%s14928_s29 + $0x124] ss:$16 sps:$4 sm:$0xff]   ;;  %v10605_v12 = vld [vmem:[%s14928_s29 + $0x12c] ss:$16 sps:$4 sm:$0xff]  }
  0xba   :  { %1681 = vmatpush1.bf16.msra.mxu0 %v10517_v13  ;;  %1870 = vmatpush1.bf16.msra.mxu1 %v10520_v14  ;;  %v10600_v13 = vld [vmem:[%s14928_s29 + $0x120] ss:$16 sps:$4 sm:$0xff]   ;;  %v10603_v14 = vld [vmem:[%s14928_s29 + $0x128] ss:$16 sps:$4 sm:$0xff]  }
  0xbb   :  { %1682 = vmatprep.subr.bf16.mxu0 %v10526_v15  ;;  %1871 = vmatprep.subr.bf16.mxu1 %v10529_v16  ;;  %v10608_v15 = vld [vmem:[%s14928_s29 + $0x144] ss:$16 sps:$4 sm:$0xff]   ;;  %v10611_v16 = vld [vmem:[%s14928_s29 + $0x14c] ss:$16 sps:$4 sm:$0xff]  }
  0xbe   :  { %1683 = vmatpush1.bf16.msra.mxu0 %v10524_v17  ;;  %1872 = vmatpush1.bf16.msra.mxu1 %v10527_v18  ;;  %v10606_v17 = vld [vmem:[%s14928_s29 + $0x140] ss:$16 sps:$4 sm:$0xff]   ;;  %v10609_v18 = vld [vmem:[%s14928_s29 + $0x148] ss:$16 sps:$4 sm:$0xff]  }
  0xbf   :  { %1684 = vmatprep.subr.bf16.mxu0 %v10533_v19  ;;  %1873 = vmatprep.subr.bf16.mxu1 %v10536_v20  ;;  %v10614_v19 = vld [vmem:[%s14928_s29 + $0x164] ss:$16 sps:$4 sm:$0xff]   ;;  %v10617_v20 = vld [vmem:[%s14928_s29 + $0x16c] ss:$16 sps:$4 sm:$0xff]  }
  0xc2   :  { %1685 = vmatpush1.bf16.msra.mxu0 %v10531_v21  ;;  %1874 = vmatpush1.bf16.msra.mxu1 %v10534_v22  ;;  %v10612_v21 = vld [vmem:[%s14928_s29 + $0x160] ss:$16 sps:$4 sm:$0xff]   ;;  %v10615_v22 = vld [vmem:[%s14928_s29 + $0x168] ss:$16 sps:$4 sm:$0xff]  }
  0xc3   :  { %1686 = vmatprep.subr.bf16.mxu0 %v10540_v23  ;;  %1875 = vmatprep.subr.bf16.mxu1 %v10543_v24  ;;  %v10621_v23 = vld [vmem:[%s14928_s29 + $0x184] ss:$16 sps:$4 sm:$0xff]   ;;  %v10624_v24 = vld [vmem:[%s14928_s29 + $0x18c] ss:$16 sps:$4 sm:$0xff]  }
  0xc6   :  { %1687 = vmatpush1.bf16.msra.mxu0 %v10538_v25  ;;  %1876 = vmatpush1.bf16.msra.mxu1 %v10541_v26  ;;  %v10619_v25 = vld [vmem:[%s14928_s29 + $0x180] ss:$16 sps:$4 sm:$0xff]   ;;  %v10622_v26 = vld [vmem:[%s14928_s29 + $0x188] ss:$16 sps:$4 sm:$0xff]  }
  0xc7   :  { %2958 = vmatprep.subr.bf16.mxu0 %v10547_v27  ;;  %3147 = vmatprep.subr.bf16.mxu1 %v10550_v28  ;;  %v10628_v27 = vld [vmem:[%s14928_s29 + $0x1a4] ss:$16 sps:$4 sm:$0xff]   ;;  %v10631_v28 = vld [vmem:[%s14928_s29 + $0x1ac] ss:$16 sps:$4 sm:$0xff]  }
  0xc9   :  { %1689 = vmatmul.mubr.bf16.vlgmr.msra.gmra.mrb[0].mxu0 %v8438_v31  ;;  %1878 = vmatmul.mubr.bf16.vlgmr.msra.gmra.mrb[0].mxu1 %v8438_v31  ;;  %v10635_v31 = vld [vmem:[%s14928_s29 + $0x1c4] ss:$16 sps:$4 sm:$0xff]  }
  0xca   :  { %2959 = vmatpush1.bf16.msra.mxu0 %v10545_v29  ;;  %3148 = vmatpush1.bf16.msra.mxu1 %v10548_v30  ;;  %v10626_v29 = vld [vmem:[%s14928_s29 + $0x1a0] ss:$16 sps:$4 sm:$0xff]   ;;  %v10629_v30 = vld [vmem:[%s14928_s29 + $0x1a8] ss:$16 sps:$4 sm:$0xff]  }
  0xcb   :  { %2960 = vmatprep.subr.bf16.mxu0 %v10554_v34  ;;  %3149 = vmatprep.subr.bf16.mxu1 %v10557_v35  ;;  %v10636_v34 = vld [vmem:[%s14928_s29 + $0x1c8] ss:$16 sps:$4 sm:$0xff]   ;;  %v10642_v35 = vld [vmem:[%s14928_s29 + $0x1e4] ss:$16 sps:$4 sm:$0xff]  }
  0xcc   :  { %1698 = vmatprep.mubr.bf16.mxu0 %v8445_v36  ;;  %1887 = vmatprep.mubr.bf16.mxu1 %v8445_v36  ;;  %v10645_v36 = vld [vmem:[%s14928_s29 + $0x1ec] ss:$16 sps:$4 sm:$0xff]  }
  0xce   :  { %2961 = vmatpush1.bf16.msra.mxu0 %v10552_v37  ;;  %3150 = vmatpush1.bf16.msra.mxu1 %v10555_v38  ;;  %v10640_v37 = vld [vmem:[%s14928_s29 + $0x1e0] ss:$16 sps:$4 sm:$0xff]   ;;  %v10643_v38 = vld [vmem:[%s14928_s29 + $0x1e8] ss:$16 sps:$4 sm:$0xff]  }
  0xcf   :  { %2962 = vmatprep.subr.bf16.mxu0 %v10560_v39  ;;  %3151 = vmatprep.subr.bf16.mxu1 %v10563_v40  ;;  %v10649_v39 = vld [vmem:[%s14928_s29 + $0x204] ss:$16 sps:$4 sm:$0xff]   ;;  %v10652_v40 = vld [vmem:[%s14928_s29 + $0x20c] ss:$16 sps:$4 sm:$0xff]  }
  0xd1   :  { %1699 = vmatmul.mubr.bf16.gmra.mrb[4].mxu0 %v8444_v43  ;;  %1888 = vmatmul.mubr.bf16.gmra.mrb[4].mxu1 %v8444_v43  ;;  %v8644_v43 = vcombine.low %v12423_v55, %v12428_v56  ;;  %v74_v55 = vld [vmem:[%s14930_s26 + $0x78] sm:$0xff]  ;;  %v10660_v56 = vld [vmem:[%s14928_s29 + $0x240] ss:$16 sps:$4 sm:$0xff]  }
  0xd2   :  { %2963 = vmatpush1.bf16.msra.mxu0 %v10558_v41  ;;  %3152 = vmatpush1.bf16.msra.mxu1 %v10561_v42  ;;  %v10647_v41 = vld [vmem:[%s14928_s29 + $0x200] ss:$16 sps:$4 sm:$0xff]   ;;  %v10650_v42 = vld [vmem:[%s14928_s29 + $0x208] ss:$16 sps:$4 sm:$0xff]  }
  0xd3   :  { %2964 = vmatprep.subr.bf16.mxu0 %v10566_v46  ;;  %3153 = vmatprep.subr.bf16.mxu1 %v10569_v47  ;;  %v10656_v46 = vld [vmem:[%s14928_s29 + $0x224] ss:$16 sps:$4 sm:$0xff]   ;;  %v10659_v47 = vld [vmem:[%s14928_s29 + $0x22c] ss:$16 sps:$4 sm:$0xff]  }
  0xd4   :  { %1708 = vmatprep.mubr.bf16.mxu0 %v8451_v48  ;;  %1897 = vmatprep.mubr.bf16.mxu1 %v8451_v48  ;;  %v8651_v48 = vcombine.high %v65_v44, %v68_v45 }
  0xd6   :  { %2965 = vmatpush1.bf16.msra.mxu0 %v10564_v49  ;;  %3154 = vmatpush1.bf16.msra.mxu1 %v10567_v50  ;;  %v10654_v49 = vld [vmem:[%s14928_s29 + $0x220] ss:$16 sps:$4 sm:$0xff]   ;;  %v10657_v50 = vld [vmem:[%s14928_s29 + $0x228] ss:$16 sps:$4 sm:$0xff]  }
  0xd7   :  { %2966 = vmatprep.subr.bf16.mxu0 %v10572_v51  ;;  %3155 = vmatprep.subr.bf16.mxu1 %v10575_v52  ;;  %v10662_v51 = vld [vmem:[%s14928_s29 + $0x244] ss:$16 sps:$4 sm:$0xff]   ;;  %v10665_v52 = vld [vmem:[%s14928_s29 + $0x24c] ss:$16 sps:$4 sm:$0xff]  }
  0xd9   :  { %1709 = vmatmul.mubr.bf16.gmra.mrb[8].mxu0 %v8450_v54  ;;  %1898 = vmatmul.mubr.bf16.gmra.mrb[8].mxu1 %v8450_v54  ;;  %v8650_v54 = vcombine.low %v65_v44, %v68_v45  ;;  %v10740_v44 = vld [vmem:[%s14928_s29 + $0x3cc] ss:$16 sps:$4 sm:$0xff]   ;;  %v10735_v45 = vld [vmem:[%s14928_s29 + $0x3c0] ss:$16 sps:$4 sm:$0xff]  }
  0xda   :  { %2967 = vmatpush1.bf16.msra.mxu0 %v10570_v53  ;;  %3156 = vmatpush1.bf16.msra.mxu1 %v10573_v57  ;;  %v71_v53 = vld [vmem:[%s14930_s26 + $0x60] sm:$0xff]  ;;  %v10663_v57 = vld [vmem:[%s14928_s29 + $0x248] ss:$16 sps:$4 sm:$0xff]  }
  0xdb   :  { %2968 = vmatprep.subr.bf16.mxu0 %v10578_v58  ;;  %3157 = vmatprep.subr.bf16.mxu1 %v10581_v59  ;;  %v10668_v58 = vld [vmem:[%s14928_s29 + $0x264] ss:$16 sps:$4 sm:$0xff]   ;;  %v10671_v59 = vld [vmem:[%s14928_s29 + $0x26c] ss:$16 sps:$4 sm:$0xff]  }
  0xdc   :  { %2990 = vmatprep.mubr.bf16.mxu0 %v8645_v60  ;;  %3179 = vmatprep.mubr.bf16.mxu1 %v8645_v60  ;;  %v8657_v60 = vcombine.high %v71_v53, %v74_v55 }
  0xde   :  { %2969 = vmatpush1.bf16.msra.mxu0 %v10576_v61  ;;  %3158 = vmatpush1.bf16.msra.mxu1 %v10579_v62  ;;  %v10666_v61 = vld [vmem:[%s14928_s29 + $0x260] ss:$16 sps:$4 sm:$0xff]   ;;  %v10669_v62 = vld [vmem:[%s14928_s29 + $0x268] ss:$16 sps:$4 sm:$0xff]  }
  0xdf   :  { %2970 = vmatprep.subr.bf16.mxu0 %v10584_v63  ;;  %3159 = vmatprep.subr.bf16.mxu1 %v10587_v0  ;;  %v10674_v63 = vld [vmem:[%s14928_s29 + $0x284] ss:$16 sps:$4 sm:$0xff]   ;;  %v10677_v0 = vld [vmem:[%s14928_s29 + $0x28c] ss:$16 sps:$4 sm:$0xff]  }
  0xe2   :  { %2971 = vmatpush1.bf16.msra.mxu0 %v10582_v1  ;;  %3160 = vmatpush1.bf16.msra.mxu1 %v10585_v2  ;;  %v10672_v1 = vld [vmem:[%s14928_s29 + $0x280] ss:$16 sps:$4 sm:$0xff]   ;;  %v10675_v2 = vld [vmem:[%s14928_s29 + $0x288] ss:$16 sps:$4 sm:$0xff]  }
  0xe3   :  { %2972 = vmatprep.subr.bf16.mxu0 %v10590_v3  ;;  %3161 = vmatprep.subr.bf16.mxu1 %v10593_v4  ;;  %v8656_v3 = vcombine.low %v71_v53, %v74_v55  ;;  %v12644_v4 = vld [vmem:[%s14930_s26 + $0x8] sm:$0xff]  ;;  %v66_v53 = vld [vmem:[%s14930_s26 + $0x38] sm:$0xff]  ;;  %v69_v55 = vld [vmem:[%s14930_s26 + $0x50] sm:$0xff] }
  0xe6   :  { %2973 = vmatpush1.bf16.msra.mxu0 %v10588_v5  ;;  %3162 = vmatpush1.bf16.msra.mxu1 %v10591_v6  ;;  %v12649_v5 = vld [vmem:[%s14930_s26 + $0x20] sm:$0xff] }
  0xe7   :  { %2974 = vmatprep.subr.bf16.mxu0 %v10596_v7  ;;  %3163 = vmatprep.subr.bf16.mxu1 %v10599_v8  ;;  %v10680_v6 = vld [vmem:[%s14928_s29 + $0x2a4] ss:$16 sps:$4 sm:$0xff]   ;;  %v10683_v7 = vld [vmem:[%s14928_s29 + $0x2ac] ss:$16 sps:$4 sm:$0xff]   ;;  %v8647_v8 = vcombine.high %v12644_v4, %v12649_v5 }
  0xea   :  { %2975 = vmatpush1.bf16.msra.mxu0 %v10594_v9  ;;  %3164 = vmatpush1.bf16.msra.mxu1 %v10597_v10  ;;  %v10678_v9 = vld [vmem:[%s14928_s29 + $0x2a0] ss:$16 sps:$4 sm:$0xff]   ;;  %v10681_v10 = vld [vmem:[%s14928_s29 + $0x2a8] ss:$16 sps:$4 sm:$0xff]  }
  0xeb   :  { %2976 = vmatprep.subr.bf16.mxu0 %v10602_v11  ;;  %3165 = vmatprep.subr.bf16.mxu1 %v10605_v12  ;;  %v10686_v11 = vld [vmem:[%s14928_s29 + $0x2c4] ss:$16 sps:$4 sm:$0xff]   ;;  %v10689_v12 = vld [vmem:[%s14928_s29 + $0x2cc] ss:$16 sps:$4 sm:$0xff]  }
  0xee   :  { %2977 = vmatpush1.bf16.msra.mxu0 %v10600_v13  ;;  %3166 = vmatpush1.bf16.msra.mxu1 %v10603_v14  ;;  %v10684_v13 = vld [vmem:[%s14928_s29 + $0x2c0] ss:$16 sps:$4 sm:$0xff]   ;;  %v10687_v14 = vld [vmem:[%s14928_s29 + $0x2c8] ss:$16 sps:$4 sm:$0xff]  }
  0xef   :  { %2978 = vmatprep.subr.bf16.mxu0 %v10608_v15  ;;  %3167 = vmatprep.subr.bf16.mxu1 %v10611_v16  ;;  %v10692_v15 = vld [vmem:[%s14928_s29 + $0x2e4] ss:$16 sps:$4 sm:$0xff]   ;;  %v10695_v16 = vld [vmem:[%s14928_s29 + $0x2ec] ss:$16 sps:$4 sm:$0xff]  }
  0xf2   :  { %2979 = vmatpush1.bf16.msra.mxu0 %v10606_v17  ;;  %3168 = vmatpush1.bf16.msra.mxu1 %v10609_v18  ;;  %v10690_v17 = vld [vmem:[%s14928_s29 + $0x2e0] ss:$16 sps:$4 sm:$0xff]   ;;  %v10693_v18 = vld [vmem:[%s14928_s29 + $0x2e8] ss:$16 sps:$4 sm:$0xff]  }
  0xf3   :  { %2980 = vmatprep.subr.bf16.mxu0 %v10614_v19  ;;  %3169 = vmatprep.subr.bf16.mxu1 %v10617_v20  ;;  %v10698_v19 = vld [vmem:[%s14928_s29 + $0x304] ss:$16 sps:$4 sm:$0xff]   ;;  %v10701_v20 = vld [vmem:[%s14928_s29 + $0x30c] ss:$16 sps:$4 sm:$0xff]  }
  0xf6   :  { %2981 = vmatpush1.bf16.msra.mxu0 %v10612_v21  ;;  %3170 = vmatpush1.bf16.msra.mxu1 %v10615_v22  ;;  %v10696_v21 = vld [vmem:[%s14928_s29 + $0x300] ss:$16 sps:$4 sm:$0xff]   ;;  %v10699_v22 = vld [vmem:[%s14928_s29 + $0x308] ss:$16 sps:$4 sm:$0xff]  }
  0xf7   :  { %2982 = vmatprep.subr.bf16.mxu0 %v10621_v23  ;;  %3171 = vmatprep.subr.bf16.mxu1 %v10624_v24  ;;  %v10704_v23 = vld [vmem:[%s14928_s29 + $0x324] ss:$16 sps:$4 sm:$0xff]   ;;  %v10707_v24 = vld [vmem:[%s14928_s29 + $0x32c] ss:$16 sps:$4 sm:$0xff]  }
  0xfa   :  { %2983 = vmatpush1.bf16.msra.mxu0 %v10619_v25  ;;  %3172 = vmatpush1.bf16.msra.mxu1 %v10622_v26  ;;  %v10702_v25 = vld [vmem:[%s14928_s29 + $0x320] ss:$16 sps:$4 sm:$0xff]   ;;  %v10705_v26 = vld [vmem:[%s14928_s29 + $0x328] ss:$16 sps:$4 sm:$0xff]  }
  0xfb   :  { %2984 = vmatprep.subr.bf16.mxu0 %v10628_v27  ;;  %3173 = vmatprep.subr.bf16.mxu1 %v10631_v28  ;;  %v10710_v27 = vld [vmem:[%s14928_s29 + $0x344] ss:$16 sps:$4 sm:$0xff]   ;;  %v10713_v28 = vld [vmem:[%s14928_s29 + $0x34c] ss:$16 sps:$4 sm:$0xff]  }
  0xfe   :  { %2985 = vmatpush1.bf16.msra.mxu0 %v10626_v29  ;;  %3174 = vmatpush1.bf16.msra.mxu1 %v10629_v30  ;;  %v10708_v29 = vld [vmem:[%s14928_s29 + $0x340] ss:$16 sps:$4 sm:$0xff]   ;;  %v10711_v30 = vld [vmem:[%s14928_s29 + $0x348] ss:$16 sps:$4 sm:$0xff]  }
  0xff   :  { %2986 = vmatprep.subr.bf16.mxu0 %v10635_v31  ;;  %3175 = vmatprep.subr.bf16.mxu1 %v10638_v32  ;;  %v10716_v31 = vld [vmem:[%s14928_s29 + $0x364] ss:$16 sps:$4 sm:$0xff]   ;;  %v10719_v32 = vld [vmem:[%s14928_s29 + $0x36c] ss:$16 sps:$4 sm:$0xff]  }
 0x102   :  { %2987 = vmatpush1.bf16.msra.mxu0 %v10633_v33  ;;  %3176 = vmatpush1.bf16.msra.mxu1 %v10636_v34  ;;  %v10714_v33 = vld [vmem:[%s14928_s29 + $0x360] ss:$16 sps:$4 sm:$0xff]   ;;  %v10717_v34 = vld [vmem:[%s14928_s29 + $0x368] ss:$16 sps:$4 sm:$0xff]  }
 0x103   :  { %2988 = vmatprep.subr.bf16.mxu0 %v10642_v35  ;;  %3177 = vmatprep.subr.bf16.mxu1 %v10645_v36  ;;  %v10723_v35 = vld [vmem:[%s14928_s29 + $0x384] ss:$16 sps:$4 sm:$0xff]   ;;  %v10726_v36 = vld [vmem:[%s14928_s29 + $0x38c] ss:$16 sps:$4 sm:$0xff]  }
 0x106   :  { %2989 = vmatpush1.bf16.msra.mxu0 %v10640_v37  ;;  %3178 = vmatpush1.bf16.msra.mxu1 %v10643_v38  ;;  %v10721_v37 = vld [vmem:[%s14928_s29 + $0x380] ss:$16 sps:$4 sm:$0xff]   ;;  %v10724_v38 = vld [vmem:[%s14928_s29 + $0x388] ss:$16 sps:$4 sm:$0xff]  }
 0x107   :  { %3021 = vmatprep.subr.bf16.mxu0 %v10649_v39  ;;  %3210 = vmatprep.subr.bf16.mxu1 %v10652_v40  ;;  %v10730_v39 = vld [vmem:[%s14928_s29 + $0x3a4] ss:$16 sps:$4 sm:$0xff]   ;;  %v10733_v40 = vld [vmem:[%s14928_s29 + $0x3ac] ss:$16 sps:$4 sm:$0xff]  }
 0x109   :  { %2991 = vmatmul.mubr.bf16.vlgmr.msra.gmra.mrb[0].mxu0 %v8644_v43  ;;  %3180 = vmatmul.mubr.bf16.vlgmr.msra.gmra.mrb[0].mxu1 %v8644_v43  ;;  %v10737_v43 = vld [vmem:[%s14928_s29 + $0x3c4] ss:$16 sps:$4 sm:$0xff]  }
 0x10a   :  { %3022 = vmatpush1.bf16.msra.mxu0 %v10647_v41  ;;  %3211 = vmatpush1.bf16.msra.mxu1 %v10650_v42  ;;  %v10728_v41 = vld [vmem:[%s14928_s29 + $0x3a0] ss:$16 sps:$4 sm:$0xff]   ;;  %v10731_v42 = vld [vmem:[%s14928_s29 + $0x3a8] ss:$16 sps:$4 sm:$0xff]  }
 0x10b   :  { %3023 = vmatprep.subr.bf16.mxu0 %v10656_v46  ;;  %3212 = vmatprep.subr.bf16.mxu1 %v10659_v47  ;;  %v10738_v46 = vld [vmem:[%s14928_s29 + $0x3c8] ss:$16 sps:$4 sm:$0xff]   ;;  %v10744_v47 = vld [vmem:[%s14928_s29 + $0x3e4] ss:$16 sps:$4 sm:$0xff]  }
 0x10c   :  { %3000 = vmatprep.mubr.bf16.mxu0 %v8651_v48  ;;  %3189 = vmatprep.mubr.bf16.mxu1 %v8651_v48  ;;  %v10747_v48 = vld [vmem:[%s14928_s29 + $0x3ec] ss:$16 sps:$4 sm:$0xff]  }
 0x10e   :  { %3024 = vmatpush1.bf16.msra.mxu0 %v10654_v49  ;;  %3213 = vmatpush1.bf16.msra.mxu1 %v10657_v50  ;;  %v10742_v49 = vld [vmem:[%s14928_s29 + $0x3e0] ss:$16 sps:$4 sm:$0xff]   ;;  %v10745_v50 = vld [vmem:[%s14928_s29 + $0x3e8] ss:$16 sps:$4 sm:$0xff]  }
 0x10f   :  { %3025 = vmatprep.subr.bf16.mxu0 %v10662_v51  ;;  %3214 = vmatprep.subr.bf16.mxu1 %v10665_v52  ;;  %v10751_v51 = vld [vmem:[%s14928_s29 + $0x404] ss:$16 sps:$4 sm:$0xff]   ;;  %v10754_v52 = vld [vmem:[%s14928_s29 + $0x40c] ss:$16 sps:$4 sm:$0xff]  }
 0x111   :  { %3001 = vmatmul.mubr.bf16.gmra.mrb[4].mxu0 %v8650_v54  ;;  %3190 = vmatmul.mubr.bf16.gmra.mrb[4].mxu1 %v8650_v54  ;;  %v8646_v54 = vcombine.low %v12644_v4, %v12649_v5  ;;  %v10762_v4 = vld [vmem:[%s14928_s29 + $0x440] ss:$16 sps:$4 sm:$0xff]   ;;  %v10765_v5 = vld [vmem:[%s14928_s29 + $0x448] ss:$16 sps:$4 sm:$0xff]  }
 0x112   :  { %3026 = vmatpush1.bf16.msra.mxu0 %v10660_v56  ;;  %3215 = vmatpush1.bf16.msra.mxu1 %v10663_v57  ;;  %v10749_v56 = vld [vmem:[%s14928_s29 + $0x400] ss:$16 sps:$4 sm:$0xff]   ;;  %v10752_v57 = vld [vmem:[%s14928_s29 + $0x408] ss:$16 sps:$4 sm:$0xff]  }
 0x113   :  { %3027 = vmatprep.subr.bf16.mxu0 %v10668_v58  ;;  %3216 = vmatprep.subr.bf16.mxu1 %v10671_v59  ;;  %v10758_v58 = vld [vmem:[%s14928_s29 + $0x424] ss:$16 sps:$4 sm:$0xff]   ;;  %v10761_v59 = vld [vmem:[%s14928_s29 + $0x42c] ss:$16 sps:$4 sm:$0xff]  }
 0x114   :  { %3010 = vmatprep.mubr.bf16.mxu0 %v8657_v60  ;;  %3199 = vmatprep.mubr.bf16.mxu1 %v8657_v60  ;;  %v10756_v60 = vld [vmem:[%s14928_s29 + $0x420] ss:$16 sps:$4 sm:$0xff]  }
 0x116   :  { %3028 = vmatpush1.bf16.msra.mxu0 %v10666_v61  ;;  %3217 = vmatpush1.bf16.msra.mxu1 %v10669_v62  ;;  %v10759_v61 = vld [vmem:[%s14928_s29 + $0x428] ss:$16 sps:$4 sm:$0xff]   ;;  %v8653_v62 = vcombine.high %v66_v53, %v69_v55 }
 0x117   :  { %3029 = vmatprep.subr.bf16.mxu0 %v10674_v63  ;;  %3218 = vmatprep.subr.bf16.mxu1 %v10677_v0  ;;  %v10764_v63 = vld [vmem:[%s14928_s29 + $0x444] ss:$16 sps:$4 sm:$0xff]   ;;  %v10767_v0 = vld [vmem:[%s14928_s29 + $0x44c] ss:$16 sps:$4 sm:$0xff]  }
 0x119   :  { %3011 = vmatmul.mubr.bf16.gmra.mrb[8].mxu0 %v8656_v3  ;;  %3200 = vmatmul.mubr.bf16.gmra.mrb[8].mxu1 %v8656_v3  ;;  %v8652_v3 = vcombine.low %v66_v53, %v69_v55  ;;  %v10830_v53 = vld [vmem:[%s14928_s29 + $0x5a0] ss:$16 sps:$4 sm:$0xff]   ;;  %v10839_v55 = vld [vmem:[%s14928_s29 + $0x5c4] ss:$16 sps:$4 sm:$0xff]  }
 0x11a   :  { %3030 = vmatpush1.bf16.msra.mxu0 %v10672_v1  ;;  %3219 = vmatpush1.bf16.msra.mxu1 %v10675_v2  ;;  %v72_v1 = vld [vmem:[%s14930_s26 + $0x68] sm:$0xff]  ;;  %v75_v2 = vld [vmem:[%s14930_s26 + $0x80] sm:$0xff] }
 0x11b   :  { %3031 = vmatprep.subr.bf16.mxu0 %v10680_v6  ;;  %3220 = vmatprep.subr.bf16.mxu1 %v10683_v7  ;;  %v10770_v6 = vld [vmem:[%s14928_s29 + $0x464] ss:$16 sps:$4 sm:$0xff]   ;;  %v10773_v7 = vld [vmem:[%s14928_s29 + $0x46c] ss:$16 sps:$4 sm:$0xff]  }
 0x11c   :  { %3053 = vmatprep.mubr.bf16.mxu0 %v8647_v8  ;;  %3242 = vmatprep.mubr.bf16.mxu1 %v8647_v8  ;;  %v10768_v8 = vld [vmem:[%s14928_s29 + $0x460] ss:$16 sps:$4 sm:$0xff]  }
 0x11e   :  { %3032 = vmatpush1.bf16.msra.mxu0 %v10678_v9  ;;  %3221 = vmatpush1.bf16.msra.mxu1 %v10681_v10  ;;  %v10771_v9 = vld [vmem:[%s14928_s29 + $0x468] ss:$16 sps:$4 sm:$0xff]   ;;  %v8659_v10 = vcombine.high %v72_v1, %v75_v2 }
 0x11f   :  { %3033 = vmatprep.subr.bf16.mxu0 %v10686_v11  ;;  %3222 = vmatprep.subr.bf16.mxu1 %v10689_v12  ;;  %v10776_v11 = vld [vmem:[%s14928_s29 + $0x484] ss:$16 sps:$4 sm:$0xff]   ;;  %v10779_v12 = vld [vmem:[%s14928_s29 + $0x48c] ss:$16 sps:$4 sm:$0xff]  }
 0x122   :  { %3034 = vmatpush1.bf16.msra.mxu0 %v10684_v13  ;;  %3223 = vmatpush1.bf16.msra.mxu1 %v10687_v14  ;;  %v12856_v13 = vld [vmem:[%s14930_s26 + $0x10] sm:$0xff]  ;;  %v12861_v14 = vld [vmem:[%s14930_s26 + $0x28] sm:$0xff] }
 0x123   :  { %3035 = vmatprep.subr.bf16.mxu0 %v10692_v15  ;;  %3224 = vmatprep.subr.bf16.mxu1 %v10695_v16  ;;  %v8658_v15 = vcombine.low %v72_v1, %v75_v2  ;;  %v10774_v16 = vld [vmem:[%s14928_s29 + $0x480] ss:$16 sps:$4 sm:$0xff]   ;;  %v8648_v2 = vcombine.low %v12856_v13, %v12861_v14 }
 0x124   :  { %v67_v1 = vld [vmem:[%s14930_s26 + $0x40] sm:$0xff] }
 0x126   :  { %3036 = vmatpush1.bf16.msra.mxu0 %v10690_v17  ;;  %3225 = vmatpush1.bf16.msra.mxu1 %v10693_v18  ;;  %v10777_v17 = vld [vmem:[%s14928_s29 + $0x488] ss:$16 sps:$4 sm:$0xff]   ;;  %v10782_v18 = vld [vmem:[%s14928_s29 + $0x4a4] ss:$16 sps:$4 sm:$0xff]  }
 0x127   :  { %3037 = vmatprep.subr.bf16.mxu0 %v10698_v19  ;;  %3226 = vmatprep.subr.bf16.mxu1 %v10701_v20  ;;  %v10785_v19 = vld [vmem:[%s14928_s29 + $0x4ac] ss:$16 sps:$4 sm:$0xff]   ;;  %v8649_v20 = vcombine.high %v12856_v13, %v12861_v14  ;;  %v73_v13 = vld [vmem:[%s14930_s26 + $0x70] sm:$0xff] }
 0x128   :  { %v76_v14 = vld [vmem:[%s14930_s26 + $0x88] sm:$0xff] }
 0x12a   :  { %3038 = vmatpush1.bf16.msra.mxu0 %v10696_v21  ;;  %3227 = vmatpush1.bf16.msra.mxu1 %v10699_v22  ;;  %v10780_v21 = vld [vmem:[%s14928_s29 + $0x4a0] ss:$16 sps:$4 sm:$0xff]   ;;  %v10783_v22 = vld [vmem:[%s14928_s29 + $0x4a8] ss:$16 sps:$4 sm:$0xff]  }
 0x12b   :  { %3039 = vmatprep.subr.bf16.mxu0 %v10704_v23  ;;  %3228 = vmatprep.subr.bf16.mxu1 %v10707_v24  ;;  %v10788_v23 = vld [vmem:[%s14928_s29 + $0x4c4] ss:$16 sps:$4 sm:$0xff]   ;;  %v10791_v24 = vld [vmem:[%s14928_s29 + $0x4cc] ss:$16 sps:$4 sm:$0xff]  }
 0x12e   :  { %3040 = vmatpush1.bf16.msra.mxu0 %v10702_v25  ;;  %3229 = vmatpush1.bf16.msra.mxu1 %v10705_v26  ;;  %v10786_v25 = vld [vmem:[%s14928_s29 + $0x4c0] ss:$16 sps:$4 sm:$0xff]   ;;  %v10789_v26 = vld [vmem:[%s14928_s29 + $0x4c8] ss:$16 sps:$4 sm:$0xff]  }
 0x12f   :  { %3041 = vmatprep.subr.bf16.mxu0 %v10710_v27  ;;  %3230 = vmatprep.subr.bf16.mxu1 %v10713_v28  ;;  %v10794_v27 = vld [vmem:[%s14928_s29 + $0x4e4] ss:$16 sps:$4 sm:$0xff]   ;;  %v10797_v28 = vld [vmem:[%s14928_s29 + $0x4ec] ss:$16 sps:$4 sm:$0xff]  }
 0x132   :  { %3042 = vmatpush1.bf16.msra.mxu0 %v10708_v29  ;;  %3231 = vmatpush1.bf16.msra.mxu1 %v10711_v30  ;;  %v10792_v29 = vld [vmem:[%s14928_s29 + $0x4e0] ss:$16 sps:$4 sm:$0xff]   ;;  %v10795_v30 = vld [vmem:[%s14928_s29 + $0x4e8] ss:$16 sps:$4 sm:$0xff]  }
 0x133   :  { %3043 = vmatprep.subr.bf16.mxu0 %v10716_v31  ;;  %3232 = vmatprep.subr.bf16.mxu1 %v10719_v32  ;;  %v10800_v31 = vld [vmem:[%s14928_s29 + $0x504] ss:$16 sps:$4 sm:$0xff]   ;;  %v10803_v32 = vld [vmem:[%s14928_s29 + $0x50c] ss:$16 sps:$4 sm:$0xff]  }
 0x136   :  { %3044 = vmatpush1.bf16.msra.mxu0 %v10714_v33  ;;  %3233 = vmatpush1.bf16.msra.mxu1 %v10717_v34  ;;  %v10798_v33 = vld [vmem:[%s14928_s29 + $0x500] ss:$16 sps:$4 sm:$0xff]   ;;  %v10801_v34 = vld [vmem:[%s14928_s29 + $0x508] ss:$16 sps:$4 sm:$0xff]  }
 0x137   :  { %3045 = vmatprep.subr.bf16.mxu0 %v10723_v35  ;;  %3234 = vmatprep.subr.bf16.mxu1 %v10726_v36  ;;  %v10806_v35 = vld [vmem:[%s14928_s29 + $0x524] ss:$16 sps:$4 sm:$0xff]   ;;  %v10809_v36 = vld [vmem:[%s14928_s29 + $0x52c] ss:$16 sps:$4 sm:$0xff]  }
 0x13a   :  { %3046 = vmatpush1.bf16.msra.mxu0 %v10721_v37  ;;  %3235 = vmatpush1.bf16.msra.mxu1 %v10724_v38  ;;  %v10804_v37 = vld [vmem:[%s14928_s29 + $0x520] ss:$16 sps:$4 sm:$0xff]   ;;  %v10807_v38 = vld [vmem:[%s14928_s29 + $0x528] ss:$16 sps:$4 sm:$0xff]  }
 0x13b   :  { %3047 = vmatprep.subr.bf16.mxu0 %v10730_v39  ;;  %3236 = vmatprep.subr.bf16.mxu1 %v10733_v40  ;;  %v10812_v39 = vld [vmem:[%s14928_s29 + $0x544] ss:$16 sps:$4 sm:$0xff]   ;;  %v10815_v40 = vld [vmem:[%s14928_s29 + $0x54c] ss:$16 sps:$4 sm:$0xff]  }
 0x13e   :  { %3048 = vmatpush1.bf16.msra.mxu0 %v10728_v41  ;;  %3237 = vmatpush1.bf16.msra.mxu1 %v10731_v42  ;;  %v10810_v41 = vld [vmem:[%s14928_s29 + $0x540] ss:$16 sps:$4 sm:$0xff]   ;;  %v10813_v42 = vld [vmem:[%s14928_s29 + $0x548] ss:$16 sps:$4 sm:$0xff]  }
 0x13f   :  { %3049 = vmatprep.subr.bf16.mxu0 %v10737_v43  ;;  %3238 = vmatprep.subr.bf16.mxu1 %v10740_v44  ;;  %v10818_v43 = vld [vmem:[%s14928_s29 + $0x564] ss:$16 sps:$4 sm:$0xff]   ;;  %v10821_v44 = vld [vmem:[%s14928_s29 + $0x56c] ss:$16 sps:$4 sm:$0xff]  }
 0x142   :  { %3050 = vmatpush1.bf16.msra.mxu0 %v10735_v45  ;;  %3239 = vmatpush1.bf16.msra.mxu1 %v10738_v46  ;;  %v10816_v45 = vld [vmem:[%s14928_s29 + $0x560] ss:$16 sps:$4 sm:$0xff]   ;;  %v10819_v46 = vld [vmem:[%s14928_s29 + $0x568] ss:$16 sps:$4 sm:$0xff]  }
 0x143   :  { %3051 = vmatprep.subr.bf16.mxu0 %v10744_v47  ;;  %3240 = vmatprep.subr.bf16.mxu1 %v10747_v48  ;;  %v10825_v47 = vld [vmem:[%s14928_s29 + $0x584] ss:$16 sps:$4 sm:$0xff]   ;;  %v10828_v48 = vld [vmem:[%s14928_s29 + $0x58c] ss:$16 sps:$4 sm:$0xff]  }
 0x146   :  { %3052 = vmatpush1.bf16.msra.mxu0 %v10742_v49  ;;  %3241 = vmatpush1.bf16.msra.mxu1 %v10745_v50  ;;  %v10823_v49 = vld [vmem:[%s14928_s29 + $0x580] ss:$16 sps:$4 sm:$0xff]   ;;  %v10826_v50 = vld [vmem:[%s14928_s29 + $0x588] ss:$16 sps:$4 sm:$0xff]  }
 0x147   :  { %3084 = vmatprep.subr.bf16.mxu0 %v10751_v51  ;;  %3273 = vmatprep.subr.bf16.mxu1 %v10754_v52  ;;  %v10832_v51 = vld [vmem:[%s14928_s29 + $0x5a4] ss:$16 sps:$4 sm:$0xff]   ;;  %v10835_v52 = vld [vmem:[%s14928_s29 + $0x5ac] ss:$16 sps:$4 sm:$0xff]  }
 0x149   :  { %3054 = vmatmul.mubr.bf16.vlgmr.msra.gmra.mrb[0].mxu0 %v8646_v54  ;;  %3243 = vmatmul.mubr.bf16.vlgmr.msra.gmra.mrb[0].mxu1 %v8646_v54  ;;  %v10833_v54 = vld [vmem:[%s14928_s29 + $0x5a8] ss:$16 sps:$4 sm:$0xff]  }
 0x14a   :  { %3085 = vmatpush1.bf16.msra.mxu0 %v10749_v56  ;;  %3274 = vmatpush1.bf16.msra.mxu1 %v10752_v57  ;;  %v10842_v56 = vld [vmem:[%s14928_s29 + $0x5cc] ss:$16 sps:$4 sm:$0xff]   ;;  %v10837_v57 = vld [vmem:[%s14928_s29 + $0x5c0] ss:$16 sps:$4 sm:$0xff]  }
 0x14b   :  { %3086 = vmatprep.subr.bf16.mxu0 %v10758_v58  ;;  %3275 = vmatprep.subr.bf16.mxu1 %v10761_v59  ;;  %v10840_v58 = vld [vmem:[%s14928_s29 + $0x5c8] ss:$16 sps:$4 sm:$0xff]   ;;  %v10846_v59 = vld [vmem:[%s14928_s29 + $0x5e4] ss:$16 sps:$4 sm:$0xff]  }
 0x14c   :  { %3063 = vmatprep.mubr.bf16.mxu0 %v8653_v62  ;;  %3252 = vmatprep.mubr.bf16.mxu1 %v8653_v62  ;;  %v10847_v62 = vld [vmem:[%s14928_s29 + $0x5e8] ss:$16 sps:$4 sm:$0xff]  }
 0x14e   :  { %3087 = vmatpush1.bf16.msra.mxu0 %v10756_v60  ;;  %3276 = vmatpush1.bf16.msra.mxu1 %v10759_v61  ;;  %v10849_v60 = vld [vmem:[%s14928_s29 + $0x5ec] ss:$16 sps:$4 sm:$0xff]   ;;  %v10844_v61 = vld [vmem:[%s14928_s29 + $0x5e0] ss:$16 sps:$4 sm:$0xff]  }
 0x14f   :  { %3088 = vmatprep.subr.bf16.mxu0 %v10764_v63  ;;  %3277 = vmatprep.subr.bf16.mxu1 %v10767_v0  ;;  %v10853_v63 = vld [vmem:[%s14928_s29 + $0xc04] ss:$16 sps:$4 sm:$0xff]   ;;  %v10856_v0 = vld [vmem:[%s14928_s29 + $0xc0c] ss:$16 sps:$4 sm:$0xff]  }
 0x151   :  { %3064 = vmatmul.mubr.bf16.gmra.mrb[4].mxu0 %v8652_v3  ;;  %3253 = vmatmul.mubr.bf16.gmra.mrb[4].mxu1 %v8652_v3  ;;  %v70_v3 = vld [vmem:[%s14930_s26 + $0x58] sm:$0xff] }
 0x152   :  { %3089 = vmatpush1.bf16.msra.mxu0 %v10762_v4  ;;  %3278 = vmatpush1.bf16.msra.mxu1 %v10765_v5  ;;  %v10851_v4 = vld [vmem:[%s14928_s29 + $0xc00] ss:$16 sps:$4 sm:$0xff]   ;;  %v10854_v5 = vld [vmem:[%s14928_s29 + $0xc08] ss:$16 sps:$4 sm:$0xff]  }
 0x153   :  { %3090 = vmatprep.subr.bf16.mxu0 %v10770_v6  ;;  %3279 = vmatprep.subr.bf16.mxu1 %v10773_v7  ;;  %v10860_v6 = vld [vmem:[%s14928_s29 + $0xc24] ss:$16 sps:$4 sm:$0xff]   ;;  %v10863_v7 = vld [vmem:[%s14928_s29 + $0xc2c] ss:$16 sps:$4 sm:$0xff]  }
 0x154   :  { %3073 = vmatprep.mubr.bf16.mxu0 %v8659_v10  ;;  %3262 = vmatprep.mubr.bf16.mxu1 %v8659_v10  ;;  %v8655_v10 = vcombine.high %v67_v1, %v70_v3 }
 0x156   :  { %3091 = vmatpush1.bf16.msra.mxu0 %v10768_v8  ;;  %3280 = vmatpush1.bf16.msra.mxu1 %v10771_v9  ;;  %v10858_v8 = vld [vmem:[%s14928_s29 + $0xc20] ss:$16 sps:$4 sm:$0xff]   ;;  %v10861_v9 = vld [vmem:[%s14928_s29 + $0xc28] ss:$16 sps:$4 sm:$0xff]  }
 0x157   :  { %3092 = vmatprep.subr.bf16.mxu0 %v10776_v11  ;;  %3281 = vmatprep.subr.bf16.mxu1 %v10779_v12  ;;  %v10866_v11 = vld [vmem:[%s14928_s29 + $0xc44] ss:$16 sps:$4 sm:$0xff]   ;;  %v10869_v12 = vld [vmem:[%s14928_s29 + $0xc4c] ss:$16 sps:$4 sm:$0xff]  }
 0x159   :  { %3074 = vmatmul.mubr.bf16.gmra.mrb[8].mxu0 %v8658_v15  ;;  %3263 = vmatmul.mubr.bf16.gmra.mrb[8].mxu1 %v8658_v15  ;;  %v8654_v15 = vcombine.low %v67_v1, %v70_v3  ;;  %v10927_v1 = vld [vmem:[%s14928_s29 + $0xd84] ss:$16 sps:$4 sm:$0xff]   ;;  %v10925_v3 = vld [vmem:[%s14928_s29 + $0xd80] ss:$16 sps:$4 sm:$0xff]  }
 0x15a   :  { %3093 = vmatpush1.bf16.msra.mxu0 %v10774_v16  ;;  %3282 = vmatpush1.bf16.msra.mxu1 %v10777_v17  ;;  %v10864_v16 = vld [vmem:[%s14928_s29 + $0xc40] ss:$16 sps:$4 sm:$0xff]   ;;  %v10867_v17 = vld [vmem:[%s14928_s29 + $0xc48] ss:$16 sps:$4 sm:$0xff]  }
 0x15b   :  { %3094 = vmatprep.subr.bf16.mxu0 %v10782_v18  ;;  %3283 = vmatprep.subr.bf16.mxu1 %v10785_v19  ;;  %v10872_v18 = vld [vmem:[%s14928_s29 + $0xc64] ss:$16 sps:$4 sm:$0xff]   ;;  %v10875_v19 = vld [vmem:[%s14928_s29 + $0xc6c] ss:$16 sps:$4 sm:$0xff]  }
 0x15c   :  { %3116 = vmatprep.mubr.bf16.mxu0 %v8649_v20  ;;  %3305 = vmatprep.mubr.bf16.mxu1 %v8649_v20  ;;  %v11550_v20 = vld [vmem:[%s14929_s23] sm:$0xff] }
 0x15e   :  { %3095 = vmatpush1.bf16.msra.mxu0 %v10780_v21  ;;  %3284 = vmatpush1.bf16.msra.mxu1 %v10783_v22  ;;  %v11551_v21 = vld [vmem:[%s14930_s26] sm:$0xff] }
 0x15f   :  { %3096 = vmatprep.subr.bf16.mxu0 %v10788_v23  ;;  %3285 = vmatprep.subr.bf16.mxu1 %v10791_v24  ;;  %v3336_v22 = vsub.bf16 %v11551_v21, %v11550_v20  ;;  %v10870_v23 = vld [vmem:[%s14928_s29 + $0xc60] ss:$16 sps:$4 sm:$0xff]   ;;  %v8661_v24 = vcombine.high %v73_v13, %v76_v14  ;;  %v11557_v20 = vld [vmem:[%s14930_s26 + $0x48] sm:$0xff] }
 0x162   :  { %3097 = vmatpush1.bf16.msra.mxu0 %v10786_v25  ;;  %3286 = vmatpush1.bf16.msra.mxu1 %v10789_v26  ;;  %v11552_v25 = vld [vmem:[%s14929_s23 + $0x18] sm:$0xff] }
 0x163   :  { %3098 = vmatprep.subr.bf16.mxu0 %v10794_v27  ;;  %3287 = vmatprep.subr.bf16.mxu1 %v10797_v28  ;;  %v11553_v26 = vld [vmem:[%s14930_s26 + $0x18] sm:$0xff] }
 0x164   :  { %v3339_v27 = vsub.bf16 %v11553_v26, %v11552_v25  ;;  %v10873_v28 = vld [vmem:[%s14928_s29 + $0xc68] ss:$16 sps:$4 sm:$0xff]  }
 0x166   :  { %3099 = vmatpush1.bf16.msra.mxu0 %v10792_v29  ;;  %3288 = vmatpush1.bf16.msra.mxu1 %v10795_v30  ;;  %v10878_v29 = vld [vmem:[%s14928_s29 + $0xc84] ss:$16 sps:$4 sm:$0xff]   ;;  %v10881_v30 = vld [vmem:[%s14928_s29 + $0xc8c] ss:$16 sps:$4 sm:$0xff]  }
 0x167   :  { %3100 = vmatprep.subr.bf16.mxu0 %v10800_v31  ;;  %3289 = vmatprep.subr.bf16.mxu1 %v10803_v32  ;;  %v13083_v31 = vand.u32 2147450879, %v3336_v22  ;;  %v13085_v32 = vand.u32 2147450879, %v3339_v27  ;;  %v10949_v22 = vld [vmem:[%s14928_s29 + $0xde8] ss:$16 sps:$4 sm:$0xff]  }
 0x169   :  { %v9046_v27 = vcombine.low %v13083_v31, %v13085_v32 }
 0x16a   :  { %3101 = vmatpush1.bf16.msra.mxu0 %v10798_v33  ;;  %3290 = vmatpush1.bf16.msra.mxu1 %v10801_v34  ;;  %v8660_v33 = vcombine.low %v73_v13, %v76_v14  ;;  %v10876_v34 = vld [vmem:[%s14928_s29 + $0xc80] ss:$16 sps:$4 sm:$0xff]   ;;  %v10948_v13 = vld [vmem:[%s14928_s29 + $0xde4] ss:$16 sps:$4 sm:$0xff]   ;;  %v10951_v14 = vld [vmem:[%s14928_s29 + $0xdec] ss:$16 sps:$4 sm:$0xff]  }
 0x16b   :  { %3102 = vmatprep.subr.bf16.mxu0 %v10806_v35  ;;  %3291 = vmatprep.subr.bf16.mxu1 %v10809_v36  ;;  %v10879_v35 = vld [vmem:[%s14928_s29 + $0xc88] ss:$16 sps:$4 sm:$0xff]   ;;  %v10884_v36 = vld [vmem:[%s14928_s29 + $0xca4] ss:$16 sps:$4 sm:$0xff]  }
 0x16e   :  { %3103 = vmatpush1.bf16.msra.mxu0 %v10804_v37  ;;  %3292 = vmatpush1.bf16.msra.mxu1 %v10807_v38  ;;  %v10887_v37 = vld [vmem:[%s14928_s29 + $0xcac] ss:$16 sps:$4 sm:$0xff]   ;;  %v9047_v38 = vcombine.high %v13083_v31, %v13085_v32  ;;  %v11558_v32 = vld [vmem:[%s14929_s23 + $0x60] sm:$0xff] }
 0x16f   :  { %3104 = vmatprep.subr.bf16.mxu0 %v10812_v39  ;;  %3293 = vmatprep.subr.bf16.mxu1 %v10815_v40  ;;  %v10882_v39 = vld [vmem:[%s14928_s29 + $0xca0] ss:$16 sps:$4 sm:$0xff]   ;;  %v10885_v40 = vld [vmem:[%s14928_s29 + $0xca8] ss:$16 sps:$4 sm:$0xff]   ;;  %v10963_v31 = vld [vmem:[%s14928_s29 + $0xe2c] ss:$16 sps:$4 sm:$0xff]  }
 0x172   :  { %3105 = vmatpush1.bf16.msra.mxu0 %v10810_v41  ;;  %3294 = vmatpush1.bf16.msra.mxu1 %v10813_v42  ;;  %v10890_v41 = vld [vmem:[%s14928_s29 + $0xcc4] ss:$16 sps:$4 sm:$0xff]   ;;  %v10893_v42 = vld [vmem:[%s14928_s29 + $0xccc] ss:$16 sps:$4 sm:$0xff]  }
 0x173   :  { %3106 = vmatprep.subr.bf16.mxu0 %v10818_v43  ;;  %3295 = vmatprep.subr.bf16.mxu1 %v10821_v44  ;;  %v10888_v43 = vld [vmem:[%s14928_s29 + $0xcc0] ss:$16 sps:$4 sm:$0xff]   ;;  %v10891_v44 = vld [vmem:[%s14928_s29 + $0xcc8] ss:$16 sps:$4 sm:$0xff]  }
 0x176   :  { %3107 = vmatpush1.bf16.msra.mxu0 %v10816_v45  ;;  %3296 = vmatpush1.bf16.msra.mxu1 %v10819_v46  ;;  %v10896_v45 = vld [vmem:[%s14928_s29 + $0xce4] ss:$16 sps:$4 sm:$0xff]   ;;  %v10899_v46 = vld [vmem:[%s14928_s29 + $0xcec] ss:$16 sps:$4 sm:$0xff]  }
 0x177   :  { %3108 = vmatprep.subr.bf16.mxu0 %v10825_v47  ;;  %3297 = vmatprep.subr.bf16.mxu1 %v10828_v48  ;;  %v10894_v47 = vld [vmem:[%s14928_s29 + $0xce0] ss:$16 sps:$4 sm:$0xff]   ;;  %v10897_v48 = vld [vmem:[%s14928_s29 + $0xce8] ss:$16 sps:$4 sm:$0xff]  }
 0x17a   :  { %3109 = vmatpush1.bf16.msra.mxu0 %v10823_v49  ;;  %3298 = vmatpush1.bf16.msra.mxu1 %v10826_v50  ;;  %v10902_v49 = vld [vmem:[%s14928_s29 + $0xd04] ss:$16 sps:$4 sm:$0xff]   ;;  %v10905_v50 = vld [vmem:[%s14928_s29 + $0xd0c] ss:$16 sps:$4 sm:$0xff]  }
 0x17b   :  { %3110 = vmatprep.subr.bf16.mxu0 %v10832_v51  ;;  %3299 = vmatprep.subr.bf16.mxu1 %v10835_v52  ;;  %v10900_v51 = vld [vmem:[%s14928_s29 + $0xd00] ss:$16 sps:$4 sm:$0xff]   ;;  %v10903_v52 = vld [vmem:[%s14928_s29 + $0xd08] ss:$16 sps:$4 sm:$0xff]  }
 0x17e   :  { %3111 = vmatpush1.bf16.msra.mxu0 %v10830_v53  ;;  %3300 = vmatpush1.bf16.msra.mxu1 %v10833_v54  ;;  %v10908_v53 = vld [vmem:[%s14928_s29 + $0xd24] ss:$16 sps:$4 sm:$0xff]   ;;  %v10911_v54 = vld [vmem:[%s14928_s29 + $0xd2c] ss:$16 sps:$4 sm:$0xff]  }
 0x17f   :  { %3112 = vmatprep.subr.bf16.mxu0 %v10839_v55  ;;  %3301 = vmatprep.subr.bf16.mxu1 %v10842_v56  ;;  %v10906_v55 = vld [vmem:[%s14928_s29 + $0xd20] ss:$16 sps:$4 sm:$0xff]   ;;  %v10909_v56 = vld [vmem:[%s14928_s29 + $0xd28] ss:$16 sps:$4 sm:$0xff]  }
 0x182   :  { %3113 = vmatpush1.bf16.msra.mxu0 %v10837_v57  ;;  %3302 = vmatpush1.bf16.msra.mxu1 %v10840_v58  ;;  %v10914_v57 = vld [vmem:[%s14928_s29 + $0xd44] ss:$16 sps:$4 sm:$0xff]   ;;  %v10917_v58 = vld [vmem:[%s14928_s29 + $0xd4c] ss:$16 sps:$4 sm:$0xff]  }
 0x183   :  { %3114 = vmatprep.subr.bf16.mxu0 %v10846_v59  ;;  %3303 = vmatprep.subr.bf16.mxu1 %v10849_v60  ;;  %v10912_v59 = vld [vmem:[%s14928_s29 + $0xd40] ss:$16 sps:$4 sm:$0xff]   ;;  %v10915_v60 = vld [vmem:[%s14928_s29 + $0xd48] ss:$16 sps:$4 sm:$0xff]  }
 0x186   :  { %3115 = vmatpush1.bf16.msra.mxu0 %v10844_v61  ;;  %3304 = vmatpush1.bf16.msra.mxu1 %v10847_v62  ;;  %v10920_v61 = vld [vmem:[%s14928_s29 + $0xd64] ss:$16 sps:$4 sm:$0xff]   ;;  %v10923_v62 = vld [vmem:[%s14928_s29 + $0xd6c] ss:$16 sps:$4 sm:$0xff]  }
 0x187   :  { %4615 = vmatprep.subr.bf16.mxu0 %v10853_v63  ;;  %4804 = vmatprep.subr.bf16.mxu1 %v10856_v0  ;;  %v10918_v63 = vld [vmem:[%s14928_s29 + $0xd60] ss:$16 sps:$4 sm:$0xff]   ;;  %v10921_v0 = vld [vmem:[%s14928_s29 + $0xd68] ss:$16 sps:$4 sm:$0xff]  }
 0x189   :  { %3117 = vmatmul.mubr.bf16.vlgmr.msra.gmra.mrb[0].mxu0 %v8648_v2  ;;  %3306 = vmatmul.mubr.bf16.vlgmr.msra.gmra.mrb[0].mxu1 %v8648_v2  ;;  %v10930_v2 = vld [vmem:[%s14928_s29 + $0xd8c] ss:$16 sps:$4 sm:$0xff]  }
 0x18a   :  { %4616 = vmatpush1.bf16.msra.mxu0 %v10851_v4  ;;  %4805 = vmatpush1.bf16.msra.mxu1 %v10854_v5  ;;  %v10928_v4 = vld [vmem:[%s14928_s29 + $0xd88] ss:$16 sps:$4 sm:$0xff]   ;;  %v10934_v5 = vld [vmem:[%s14928_s29 + $0xda4] ss:$16 sps:$4 sm:$0xff]  }
 0x18b   :  { %4617 = vmatprep.subr.bf16.mxu0 %v10860_v6  ;;  %4806 = vmatprep.subr.bf16.mxu1 %v10863_v7  ;;  %v10937_v6 = vld [vmem:[%s14928_s29 + $0xdac] ss:$16 sps:$4 sm:$0xff]   ;;  %v10932_v7 = vld [vmem:[%s14928_s29 + $0xda0] ss:$16 sps:$4 sm:$0xff]  }
 0x18c   :  { %3126 = vmatprep.mubr.bf16.mxu0 %v8655_v10  ;;  %3315 = vmatprep.mubr.bf16.mxu1 %v8655_v10  ;;  %v10944_v10 = vld [vmem:[%s14928_s29 + $0xdcc] ss:$16 sps:$4 sm:$0xff]  }
 0x18e   :  { %4618 = vmatpush1.bf16.msra.mxu0 %v10858_v8  ;;  %4807 = vmatpush1.bf16.msra.mxu1 %v10861_v9  ;;  %v10935_v8 = vld [vmem:[%s14928_s29 + $0xda8] ss:$16 sps:$4 sm:$0xff]   ;;  %v10941_v9 = vld [vmem:[%s14928_s29 + $0xdc4] ss:$16 sps:$4 sm:$0xff]  }
 0x18f   :  { %4619 = vmatprep.subr.bf16.mxu0 %v10866_v11  ;;  %4808 = vmatprep.subr.bf16.mxu1 %v10869_v12  ;;  %v10939_v11 = vld [vmem:[%s14928_s29 + $0xdc0] ss:$16 sps:$4 sm:$0xff]   ;;  %v10942_v12 = vld [vmem:[%s14928_s29 + $0xdc8] ss:$16 sps:$4 sm:$0xff]  }
 0x191   :  { %3127 = vmatmul.mubr.bf16.gmra.mrb[4].mxu0 %v8654_v15  ;;  %3316 = vmatmul.mubr.bf16.gmra.mrb[4].mxu1 %v8654_v15  ;;  %v11554_v15 = vld [vmem:[%s14929_s23 + $0x30] sm:$0xff] }
 0x192   :  { %4620 = vmatpush1.bf16.msra.mxu0 %v10864_v16  ;;  %4809 = vmatpush1.bf16.msra.mxu1 %v10867_v17  ;;  %v11555_v16 = vld [vmem:[%s14930_s26 + $0x30] sm:$0xff] }
 0x193   :  { %4621 = vmatprep.subr.bf16.mxu0 %v10872_v18  ;;  %4810 = vmatprep.subr.bf16.mxu1 %v10875_v19  ;;  %v3342_v17 = vsub.bf16 %v11555_v16, %v11554_v15  ;;  %v10946_v18 = vld [vmem:[%s14928_s29 + $0xde0] ss:$16 sps:$4 sm:$0xff]   ;;  %v11556_v19 = vld [vmem:[%s14929_s23 + $0x48] sm:$0xff]  ;;  %v11002_v15 = vld [vmem:[%s14928_s29 + $0xf04] ss:$16 sps:$4 sm:$0xff]  }
 0x194   :  { %3136 = vmatprep.mubr.bf16.mxu0 %v8661_v24  ;;  %3325 = vmatprep.mubr.bf16.mxu1 %v8661_v24  ;;  %v3345_v21 = vsub.bf16 %v11557_v20, %v11556_v19  ;;  %v10957_v24 = vld [vmem:[%s14928_s29 + $0xe0c] ss:$16 sps:$4 sm:$0xff]   ;;  %v11008_v19 = vld [vmem:[%s14928_s29 + $0xf24] ss:$16 sps:$4 sm:$0xff]  }
 0x195   :  { %v3360_v25 = vand.u32 2147450879, %v3342_v17  ;;  %v11005_v16 = vld [vmem:[%s14928_s29 + $0xf0c] ss:$16 sps:$4 sm:$0xff]   ;;  %v11000_v17 = vld [vmem:[%s14928_s29 + $0xf00] ss:$16 sps:$4 sm:$0xff]  }
 0x196   :  { %4622 = vmatpush1.bf16.msra.mxu0 %v10870_v23  ;;  %4811 = vmatpush1.bf16.msra.mxu1 %v10873_v28  ;;  %v10954_v23 = vld [vmem:[%s14928_s29 + $0xe04] ss:$16 sps:$4 sm:$0xff]   ;;  %v3363_v26 = vand.u32 2147450879, %v3345_v21  ;;  %v10952_v28 = vld [vmem:[%s14928_s29 + $0xe00] ss:$16 sps:$4 sm:$0xff]  }
 0x197   :  { %4623 = vmatprep.subr.bf16.mxu0 %v10878_v29  ;;  %4812 = vmatprep.subr.bf16.mxu1 %v10881_v30  ;;  %v10955_v29 = vld [vmem:[%s14928_s29 + $0xe08] ss:$16 sps:$4 sm:$0xff]   ;;  %v10960_v30 = vld [vmem:[%s14928_s29 + $0xe24] ss:$16 sps:$4 sm:$0xff]   ;;  %v11011_v20 = vld [vmem:[%s14928_s29 + $0xf2c] ss:$16 sps:$4 sm:$0xff]  }
 0x198   :  { %v11006_v21 = vld [vmem:[%s14928_s29 + $0xf20] ss:$16 sps:$4 sm:$0xff]  }
 0x199   :  { %3137 = vmatmul.mubr.bf16.gmra.mrb[8].mxu0 %v8660_v33  ;;  %3326 = vmatmul.mubr.bf16.gmra.mrb[8].mxu1 %v8660_v33  ;;  %v11559_v33 = vld [vmem:[%s14930_s26 + $0x60] sm:$0xff] }
 0x19a   :  { %4624 = vmatpush1.bf16.msra.mxu0 %v10876_v34  ;;  %4813 = vmatpush1.bf16.msra.mxu1 %v10879_v35  ;;  %v3348_v34 = vsub.bf16 %v11559_v33, %v11558_v32  ;;  %v10958_v35 = vld [vmem:[%s14928_s29 + $0xe20] ss:$16 sps:$4 sm:$0xff]   ;;  %v11029_v32 = vld [vmem:[%s14928_s29 + $0xf8c] ss:$16 sps:$4 sm:$0xff]  }
 0x19b   :  { %4625 = vmatprep.subr.bf16.mxu0 %v10884_v36  ;;  %4814 = vmatprep.subr.bf16.mxu1 %v10887_v37  ;;  %v9053_v36 = vcombine.high %v3360_v25, %v3363_v26  ;;  %v11560_v37 = vld [vmem:[%s14929_s23 + $0x78] sm:$0xff]  ;;  %v11024_v33 = vld [vmem:[%s14928_s29 + $0xf80] ss:$16 sps:$4 sm:$0xff]  }
 0x19c   :  { %4647 = vmatprep.mubr.bf16.mxu0 %v9047_v38  ;;  %4836 = vmatprep.mubr.bf16.mxu1 %v9047_v38  ;;  %v11561_v38 = vld [vmem:[%s14930_s26 + $0x78] sm:$0xff] }
 0x19e   :  { %4626 = vmatpush1.bf16.msra.mxu0 %v10882_v39  ;;  %4815 = vmatpush1.bf16.msra.mxu1 %v10885_v40  ;;  %v3351_v39 = vsub.bf16 %v11561_v38, %v11560_v37  ;;  %v10961_v40 = vld [vmem:[%s14928_s29 + $0xe28] ss:$16 sps:$4 sm:$0xff]   ;;  %v11030_v37 = vld [vmem:[%s14928_s29 + $0xfa0] ss:$16 sps:$4 sm:$0xff]  }
 0x19f   :  { %4627 = vmatprep.subr.bf16.mxu0 %v10890_v41  ;;  %4816 = vmatprep.subr.bf16.mxu1 %v10893_v42  ;;  %v10966_v41 = vld [vmem:[%s14928_s29 + $0xe44] ss:$16 sps:$4 sm:$0xff]   ;;  %v10969_v42 = vld [vmem:[%s14928_s29 + $0xe4c] ss:$16 sps:$4 sm:$0xff]   ;;  %v11033_v38 = vld [vmem:[%s14928_s29 + $0xfa8] ss:$16 sps:$4 sm:$0xff]  }
 0x1a2   :  { %4628 = vmatpush1.bf16.msra.mxu0 %v10888_v43  ;;  %4817 = vmatpush1.bf16.msra.mxu1 %v10891_v44  ;;  %v3366_v43 = vand.u32 2147450879, %v3348_v34  ;;  %v3369_v44 = vand.u32 2147450879, %v3351_v39  ;;  %v11027_v34 = vld [vmem:[%s14928_s29 + $0xf88] ss:$16 sps:$4 sm:$0xff]  }
 0x1a3   :  { %4629 = vmatprep.subr.bf16.mxu0 %v10896_v45  ;;  %4818 = vmatprep.subr.bf16.mxu1 %v10899_v46  ;;  %v9052_v45 = vcombine.low %v3360_v25, %v3363_v26  ;;  %v10964_v46 = vld [vmem:[%s14928_s29 + $0xe40] ss:$16 sps:$4 sm:$0xff]   ;;  %v11015_v26 = vld [vmem:[%s14928_s29 + $0xf48] ss:$16 sps:$4 sm:$0xff]   ;;  %v11038_v39 = vld [vmem:[%s14928_s29 + $0xfc4] ss:$16 sps:$4 sm:$0xff]  }
 0x1a4   :  { %v11012_v25 = vld [vmem:[%s14928_s29 + $0xf40] ss:$16 sps:$4 sm:$0xff]  }
 0x1a6   :  { %4630 = vmatpush1.bf16.msra.mxu0 %v10894_v47  ;;  %4819 = vmatpush1.bf16.msra.mxu1 %v10897_v48  ;;  %v10967_v47 = vld [vmem:[%s14928_s29 + $0xe48] ss:$16 sps:$4 sm:$0xff]   ;;  %v10972_v48 = vld [vmem:[%s14928_s29 + $0xe64] ss:$16 sps:$4 sm:$0xff]  }
 0x1a7   :  { %4631 = vmatprep.subr.bf16.mxu0 %v10902_v49  ;;  %4820 = vmatprep.subr.bf16.mxu1 %v10905_v50  ;;  %v10975_v49 = vld [vmem:[%s14928_s29 + $0xe6c] ss:$16 sps:$4 sm:$0xff]  }
 0x1a8   :  { %v13298_v50 = vld [vmem:[%s14929_s23 + $0x8] sm:$0xff] }
 0x1aa   :  { %4632 = vmatpush1.bf16.msra.mxu0 %v10900_v51  ;;  %4821 = vmatpush1.bf16.msra.mxu1 %v10903_v52  ;;  %v13303_v51 = vld [vmem:[%s14930_s26 + $0x8] sm:$0xff] }
 0x1ab   :  { %4633 = vmatprep.subr.bf16.mxu0 %v10908_v53  ;;  %4822 = vmatprep.subr.bf16.mxu1 %v10911_v54  ;;  %v3337_v52 = vsub.bf16 %v13303_v51, %v13298_v50  ;;  %v10970_v53 = vld [vmem:[%s14928_s29 + $0xe60] ss:$16 sps:$4 sm:$0xff]   ;;  %v9059_v54 = vcombine.high %v3366_v43, %v3369_v44 }
 0x1ae   :  { %4634 = vmatpush1.bf16.msra.mxu0 %v10906_v55  ;;  %4823 = vmatpush1.bf16.msra.mxu1 %v10909_v56  ;;  %v13313_v55 = vld [vmem:[%s14929_s23 + $0x20] sm:$0xff] }
 0x1af   :  { %4635 = vmatprep.subr.bf16.mxu0 %v10914_v57  ;;  %4824 = vmatprep.subr.bf16.mxu1 %v10917_v58  ;;  %v13318_v56 = vld [vmem:[%s14930_s26 + $0x20] sm:$0xff]  ;;  %v10973_v58 = vld [vmem:[%s14928_s29 + $0xe68] ss:$16 sps:$4 sm:$0xff]  }
 0x1b0   :  { %v3340_v57 = vsub.bf16 %v13318_v56, %v13313_v55 }
 0x1b2   :  { %4636 = vmatpush1.bf16.msra.mxu0 %v10912_v59  ;;  %4825 = vmatpush1.bf16.msra.mxu1 %v10915_v60  ;;  %v10978_v59 = vld [vmem:[%s14928_s29 + $0xe84] ss:$16 sps:$4 sm:$0xff]   ;;  %v10981_v60 = vld [vmem:[%s14928_s29 + $0xe8c] ss:$16 sps:$4 sm:$0xff]  }
 0x1b3   :  { %4637 = vmatprep.subr.bf16.mxu0 %v10920_v61  ;;  %4826 = vmatprep.subr.bf16.mxu1 %v10923_v62  ;;  %v13331_v61 = vand.u32 2147450879, %v3337_v52  ;;  %v13333_v62 = vand.u32 2147450879, %v3340_v57  ;;  %v11050_v57 = vld [vmem:[%s14928_s29 + $0x1004] ss:$16 sps:$4 sm:$0xff]  }
 0x1b6   :  { %4638 = vmatpush1.bf16.msra.mxu0 %v10918_v63  ;;  %4827 = vmatpush1.bf16.msra.mxu1 %v10921_v0  ;;  %v9058_v63 = vcombine.low %v3366_v43, %v3369_v44  ;;  %v10976_v0 = vld [vmem:[%s14928_s29 + $0xe80] ss:$16 sps:$4 sm:$0xff]   ;;  %v11044_v43 = vld [vmem:[%s14928_s29 + $0xfe4] ss:$16 sps:$4 sm:$0xff]   ;;  %v11047_v44 = vld [vmem:[%s14928_s29 + $0xfec] ss:$16 sps:$4 sm:$0xff]  }
 0x1b7   :  { %4639 = vmatprep.subr.bf16.mxu0 %v10927_v1  ;;  %4828 = vmatprep.subr.bf16.mxu1 %v10930_v2  ;;  %v10979_v1 = vld [vmem:[%s14928_s29 + $0xe88] ss:$16 sps:$4 sm:$0xff]   ;;  %v10984_v2 = vld [vmem:[%s14928_s29 + $0xea4] ss:$16 sps:$4 sm:$0xff]  }
 0x1ba   :  { %4640 = vmatpush1.bf16.msra.mxu0 %v10925_v3  ;;  %4829 = vmatpush1.bf16.msra.mxu1 %v10928_v4  ;;  %v10987_v3 = vld [vmem:[%s14928_s29 + $0xeac] ss:$16 sps:$4 sm:$0xff]   ;;  %v9049_v4 = vcombine.high %v13331_v61, %v13333_v62 }
 0x1bb   :  { %4641 = vmatprep.subr.bf16.mxu0 %v10934_v5  ;;  %4830 = vmatprep.subr.bf16.mxu1 %v10937_v6  ;;  %v10982_v5 = vld [vmem:[%s14928_s29 + $0xea0] ss:$16 sps:$4 sm:$0xff]   ;;  %v10985_v6 = vld [vmem:[%s14928_s29 + $0xea8] ss:$16 sps:$4 sm:$0xff]  }
 0x1be   :  { %4642 = vmatpush1.bf16.msra.mxu0 %v10932_v7  ;;  %4831 = vmatpush1.bf16.msra.mxu1 %v10935_v8  ;;  %v10990_v7 = vld [vmem:[%s14928_s29 + $0xec4] ss:$16 sps:$4 sm:$0xff]   ;;  %v10993_v8 = vld [vmem:[%s14928_s29 + $0xecc] ss:$16 sps:$4 sm:$0xff]  }
 0x1bf   :  { %4643 = vmatprep.subr.bf16.mxu0 %v10941_v9  ;;  %4832 = vmatprep.subr.bf16.mxu1 %v10944_v10  ;;  %v10988_v9 = vld [vmem:[%s14928_s29 + $0xec0] ss:$16 sps:$4 sm:$0xff]   ;;  %v10991_v10 = vld [vmem:[%s14928_s29 + $0xec8] ss:$16 sps:$4 sm:$0xff]  }
 0x1c2   :  { %4644 = vmatpush1.bf16.msra.mxu0 %v10939_v11  ;;  %4833 = vmatpush1.bf16.msra.mxu1 %v10942_v12  ;;  %v10996_v11 = vld [vmem:[%s14928_s29 + $0xee4] ss:$16 sps:$4 sm:$0xff]   ;;  %v10999_v12 = vld [vmem:[%s14928_s29 + $0xeec] ss:$16 sps:$4 sm:$0xff]  }
 0x1c3   :  { %4645 = vmatprep.subr.bf16.mxu0 %v10948_v13  ;;  %4834 = vmatprep.subr.bf16.mxu1 %v10951_v14  ;;  %v10994_v13 = vld [vmem:[%s14928_s29 + $0xee0] ss:$16 sps:$4 sm:$0xff]   ;;  %v10997_v14 = vld [vmem:[%s14928_s29 + $0xee8] ss:$16 sps:$4 sm:$0xff]  }
 0x1c6   :  { %4646 = vmatpush1.bf16.msra.mxu0 %v10946_v18  ;;  %4835 = vmatpush1.bf16.msra.mxu1 %v10949_v22  ;;  %v11003_v18 = vld [vmem:[%s14928_s29 + $0xf08] ss:$16 sps:$4 sm:$0xff]  }
 0x1c7   :  { %4678 = vmatprep.subr.bf16.mxu0 %v10954_v23  ;;  %4867 = vmatprep.subr.bf16.mxu1 %v10957_v24  ;;  %v11009_v22 = vld [vmem:[%s14928_s29 + $0xf28] ss:$16 sps:$4 sm:$0xff]   ;;  %v11014_v23 = vld [vmem:[%s14928_s29 + $0xf44] ss:$16 sps:$4 sm:$0xff]   ;;  %v11017_v24 = vld [vmem:[%s14928_s29 + $0xf4c] ss:$16 sps:$4 sm:$0xff]  }
 0x1c9   :  { %4648 = vmatmul.mubr.bf16.vlgmr.msra.gmra.mrb[0].mxu0 %v9046_v27  ;;  %4837 = vmatmul.mubr.bf16.vlgmr.msra.gmra.mrb[0].mxu1 %v9046_v27  ;;  %v11020_v27 = vld [vmem:[%s14928_s29 + $0xf64] ss:$16 sps:$4 sm:$0xff]  }
 0x1ca   :  { %4679 = vmatpush1.bf16.msra.mxu0 %v10952_v28  ;;  %4868 = vmatpush1.bf16.msra.mxu1 %v10955_v29  ;;  %v11023_v28 = vld [vmem:[%s14928_s29 + $0xf6c] ss:$16 sps:$4 sm:$0xff]   ;;  %v11018_v29 = vld [vmem:[%s14928_s29 + $0xf60] ss:$16 sps:$4 sm:$0xff]  }
 0x1cb   :  { %4680 = vmatprep.subr.bf16.mxu0 %v10960_v30  ;;  %4869 = vmatprep.subr.bf16.mxu1 %v10963_v31  ;;  %v11021_v30 = vld [vmem:[%s14928_s29 + $0xf68] ss:$16 sps:$4 sm:$0xff]   ;;  %v11026_v31 = vld [vmem:[%s14928_s29 + $0xf84] ss:$16 sps:$4 sm:$0xff]  }
 0x1cc   :  { %4657 = vmatprep.mubr.bf16.mxu0 %v9053_v36  ;;  %4846 = vmatprep.mubr.bf16.mxu1 %v9053_v36  ;;  %v11035_v36 = vld [vmem:[%s14928_s29 + $0xfac] ss:$16 sps:$4 sm:$0xff]  }
 0x1ce   :  { %4681 = vmatpush1.bf16.msra.mxu0 %v10958_v35  ;;  %4870 = vmatpush1.bf16.msra.mxu1 %v10961_v40  ;;  %v11032_v35 = vld [vmem:[%s14928_s29 + $0xfa4] ss:$16 sps:$4 sm:$0xff]   ;;  %v11041_v40 = vld [vmem:[%s14928_s29 + $0xfcc] ss:$16 sps:$4 sm:$0xff]  }
 0x1cf   :  { %4682 = vmatprep.subr.bf16.mxu0 %v10966_v41  ;;  %4871 = vmatprep.subr.bf16.mxu1 %v10969_v42  ;;  %v11036_v41 = vld [vmem:[%s14928_s29 + $0xfc0] ss:$16 sps:$4 sm:$0xff]   ;;  %v11039_v42 = vld [vmem:[%s14928_s29 + $0xfc8] ss:$16 sps:$4 sm:$0xff]  }
 0x1d1   :  { %4658 = vmatmul.mubr.bf16.gmra.mrb[4].mxu0 %v9052_v45  ;;  %4847 = vmatmul.mubr.bf16.gmra.mrb[4].mxu1 %v9052_v45  ;;  %v11566_v45 = vld [vmem:[%s14929_s23 + $0x38] sm:$0xff] }
 0x1d2   :  { %4683 = vmatpush1.bf16.msra.mxu0 %v10964_v46  ;;  %4872 = vmatpush1.bf16.msra.mxu1 %v10967_v47  ;;  %v11567_v46 = vld [vmem:[%s14930_s26 + $0x38] sm:$0xff] }
 0x1d3   :  { %4684 = vmatprep.subr.bf16.mxu0 %v10972_v48  ;;  %4873 = vmatprep.subr.bf16.mxu1 %v10975_v49  ;;  %v3343_v47 = vsub.bf16 %v11567_v46, %v11566_v45  ;;  %v11568_v48 = vld [vmem:[%s14929_s23 + $0x50] sm:$0xff]  ;;  %v11095_v46 = vld [vmem:[%s14928_s29 + $0x10ec] ss:$16 sps:$4 sm:$0xff]  }
 0x1d4   :  { %4667 = vmatprep.mubr.bf16.mxu0 %v9059_v54  ;;  %4856 = vmatprep.mubr.bf16.mxu1 %v9059_v54  ;;  %v11569_v49 = vld [vmem:[%s14930_s26 + $0x50] sm:$0xff]  ;;  %v11045_v54 = vld [vmem:[%s14928_s29 + $0xfe8] ss:$16 sps:$4 sm:$0xff]  }
 0x1d5   :  { %v3346_v52 = vsub.bf16 %v11569_v49, %v11568_v48  ;;  %v11092_v45 = vld [vmem:[%s14928_s29 + $0x10e4] ss:$16 sps:$4 sm:$0xff]   ;;  %v11093_v48 = vld [vmem:[%s14928_s29 + $0x10e8] ss:$16 sps:$4 sm:$0xff]  }
 0x1d6   :  { %4685 = vmatpush1.bf16.msra.mxu0 %v10970_v53  ;;  %4874 = vmatpush1.bf16.msra.mxu1 %v10973_v58  ;;  %v11042_v53 = vld [vmem:[%s14928_s29 + $0xfe0] ss:$16 sps:$4 sm:$0xff]   ;;  %v11053_v58 = vld [vmem:[%s14928_s29 + $0x100c] ss:$16 sps:$4 sm:$0xff]   ;;  %v11098_v49 = vld [vmem:[%s14928_s29 + $0x1104] ss:$16 sps:$4 sm:$0xff]  }
 0x1d7   :  { %4686 = vmatprep.subr.bf16.mxu0 %v10978_v59  ;;  %4875 = vmatprep.subr.bf16.mxu1 %v10981_v60  ;;  %v3361_v59 = vand.u32 2147450879, %v3343_v47  ;;  %v3364_v60 = vand.u32 2147450879, %v3346_v52  ;;  %v11090_v47 = vld [vmem:[%s14928_s29 + $0x10e0] ss:$16 sps:$4 sm:$0xff]  }
 0x1d8   :  { %v11101_v52 = vld [vmem:[%s14928_s29 + $0x110c] ss:$16 sps:$4 sm:$0xff]  }
 0x1d9   :  { %4668 = vmatmul.mubr.bf16.gmra.mrb[8].mxu0 %v9058_v63  ;;  %4857 = vmatmul.mubr.bf16.gmra.mrb[8].mxu1 %v9058_v63  ;;  %v9048_v63 = vcombine.low %v13331_v61, %v13333_v62  ;;  %v11059_v61 = vld [vmem:[%s14928_s29 + $0x102c] ss:$16 sps:$4 sm:$0xff]   ;;  %v9055_v62 = vcombine.high %v3361_v59, %v3364_v60 }
 0x1da   :  { %4687 = vmatpush1.bf16.msra.mxu0 %v10976_v0  ;;  %4876 = vmatpush1.bf16.msra.mxu1 %v10979_v1  ;;  %v11048_v0 = vld [vmem:[%s14928_s29 + $0x1000] ss:$16 sps:$4 sm:$0xff]   ;;  %v11051_v1 = vld [vmem:[%s14928_s29 + $0x1008] ss:$16 sps:$4 sm:$0xff]  }
 0x1db   :  { %4688 = vmatprep.subr.bf16.mxu0 %v10984_v2  ;;  %4877 = vmatprep.subr.bf16.mxu1 %v10987_v3  ;;  %v11056_v2 = vld [vmem:[%s14928_s29 + $0x1024] ss:$16 sps:$4 sm:$0xff]   ;;  %v11570_v3 = vld [vmem:[%s14929_s23 + $0x68] sm:$0xff] }
 0x1dc   :  { %4710 = vmatprep.mubr.bf16.mxu0 %v9049_v4  ;;  %4899 = vmatprep.mubr.bf16.mxu1 %v9049_v4  ;;  %v11571_v4 = vld [vmem:[%s14930_s26 + $0x68] sm:$0xff] }
 0x1de   :  { %4689 = vmatpush1.bf16.msra.mxu0 %v10982_v5  ;;  %4878 = vmatpush1.bf16.msra.mxu1 %v10985_v6  ;;  %v3349_v5 = vsub.bf16 %v11571_v4, %v11570_v3  ;;  %v11572_v6 = vld [vmem:[%s14929_s23 + $0x80] sm:$0xff]  ;;  %v11117_v4 = vld [vmem:[%s14928_s29 + $0x1168] ss:$16 sps:$4 sm:$0xff]  }
 0x1df   :  { %4690 = vmatprep.subr.bf16.mxu0 %v10990_v7  ;;  %4879 = vmatprep.subr.bf16.mxu1 %v10993_v8  ;;  %v11573_v7 = vld [vmem:[%s14930_s26 + $0x80] sm:$0xff] }
 0x1e0   :  { %v3352_v8 = vsub.bf16 %v11573_v7, %v11572_v6  ;;  %v11114_v3 = vld [vmem:[%s14928_s29 + $0x1160] ss:$16 sps:$4 sm:$0xff]   ;;  %v11125_v6 = vld [vmem:[%s14928_s29 + $0x118c] ss:$16 sps:$4 sm:$0xff]  }
 0x1e1   :  { %v11120_v7 = vld [vmem:[%s14928_s29 + $0x1180] ss:$16 sps:$4 sm:$0xff]  }
 0x1e2   :  { %4691 = vmatpush1.bf16.msra.mxu0 %v10988_v9  ;;  %4880 = vmatpush1.bf16.msra.mxu1 %v10991_v10  ;;  %v11054_v9 = vld [vmem:[%s14928_s29 + $0x1020] ss:$16 sps:$4 sm:$0xff]   ;;  %v11057_v10 = vld [vmem:[%s14928_s29 + $0x1028] ss:$16 sps:$4 sm:$0xff]  }
 0x1e3   :  { %4692 = vmatprep.subr.bf16.mxu0 %v10996_v11  ;;  %4881 = vmatprep.subr.bf16.mxu1 %v10999_v12  ;;  %v11062_v11 = vld [vmem:[%s14928_s29 + $0x1044] ss:$16 sps:$4 sm:$0xff]   ;;  %v11065_v12 = vld [vmem:[%s14928_s29 + $0x104c] ss:$16 sps:$4 sm:$0xff]  }
 0x1e6   :  { %4693 = vmatpush1.bf16.msra.mxu0 %v10994_v13  ;;  %4882 = vmatpush1.bf16.msra.mxu1 %v10997_v14  ;;  %v3367_v13 = vand.u32 2147450879, %v3349_v5  ;;  %v3370_v14 = vand.u32 2147450879, %v3352_v8  ;;  %v11122_v5 = vld [vmem:[%s14928_s29 + $0x1184] ss:$16 sps:$4 sm:$0xff]  }
 0x1e7   :  { %4694 = vmatprep.subr.bf16.mxu0 %v11002_v15  ;;  %4883 = vmatprep.subr.bf16.mxu1 %v11005_v16  ;;  %v9054_v15 = vcombine.low %v3361_v59, %v3364_v60  ;;  %v11060_v16 = vld [vmem:[%s14928_s29 + $0x1040] ss:$16 sps:$4 sm:$0xff]   ;;  %v11105_v60 = vld [vmem:[%s14928_s29 + $0x1128] ss:$16 sps:$4 sm:$0xff]  }
 0x1e8   :  { %v11102_v59 = vld [vmem:[%s14928_s29 + $0x1120] ss:$16 sps:$4 sm:$0xff]   ;;  %v11123_v8 = vld [vmem:[%s14928_s29 + $0x1188] ss:$16 sps:$4 sm:$0xff]  }
 0x1ea   :  { %4695 = vmatpush1.bf16.msra.mxu0 %v11000_v17  ;;  %4884 = vmatpush1.bf16.msra.mxu1 %v11003_v18  ;;  %v11063_v17 = vld [vmem:[%s14928_s29 + $0x1048] ss:$16 sps:$4 sm:$0xff]   ;;  %v11068_v18 = vld [vmem:[%s14928_s29 + $0x1064] ss:$16 sps:$4 sm:$0xff]  }
 0x1eb   :  { %4696 = vmatprep.subr.bf16.mxu0 %v11008_v19  ;;  %4885 = vmatprep.subr.bf16.mxu1 %v11011_v20  ;;  %v11071_v19 = vld [vmem:[%s14928_s29 + $0x106c] ss:$16 sps:$4 sm:$0xff]   ;;  %v9061_v20 = vcombine.high %v3367_v13, %v3370_v14 }
 0x1ee   :  { %4697 = vmatpush1.bf16.msra.mxu0 %v11006_v21  ;;  %4886 = vmatpush1.bf16.msra.mxu1 %v11009_v22  ;;  %v11574_v21 = vld [vmem:[%s14929_s23 + $0x10] sm:$0xff] }
 0x1ef   :  { %4698 = vmatprep.subr.bf16.mxu0 %v11014_v23  ;;  %4887 = vmatprep.subr.bf16.mxu1 %v11017_v24  ;;  %v11575_v22 = vld [vmem:[%s14930_s26 + $0x10] sm:$0xff]  ;;  %v11576_v24 = vld [vmem:[%s14929_s23 + $0x28] sm:$0xff] }
 0x1f0   :  { %v3338_v23 = vsub.bf16 %v11575_v22, %v11574_v21  ;;  %v11580_v22 = vld [vmem:[%s14929_s23 + $0x58] sm:$0xff] }
 0x1f2   :  { %4699 = vmatpush1.bf16.msra.mxu0 %v11012_v25  ;;  %4888 = vmatpush1.bf16.msra.mxu1 %v11015_v26  ;;  %v11577_v25 = vld [vmem:[%s14930_s26 + $0x28] sm:$0xff] }
 0x1f3   :  { %4700 = vmatprep.subr.bf16.mxu0 %v11020_v27  ;;  %4889 = vmatprep.subr.bf16.mxu1 %v11023_v28  ;;  %v3341_v26 = vsub.bf16 %v11577_v25, %v11576_v24  ;;  %v11066_v27 = vld [vmem:[%s14928_s29 + $0x1060] ss:$16 sps:$4 sm:$0xff]   ;;  %v11069_v28 = vld [vmem:[%s14928_s29 + $0x1068] ss:$16 sps:$4 sm:$0xff]  }
 0x1f4   :  { %v11138_v25 = vld [vmem:[%s14928_s29 + $0x11e0] ss:$16 sps:$4 sm:$0xff]  }
 0x1f6   :  { %4701 = vmatpush1.bf16.msra.mxu0 %v11018_v29  ;;  %4890 = vmatpush1.bf16.msra.mxu1 %v11021_v30  ;;  %v11074_v29 = vld [vmem:[%s14928_s29 + $0x1084] ss:$16 sps:$4 sm:$0xff]   ;;  %v11077_v30 = vld [vmem:[%s14928_s29 + $0x108c] ss:$16 sps:$4 sm:$0xff]  }
 0x1f7   :  { %4702 = vmatprep.subr.bf16.mxu0 %v11026_v31  ;;  %4891 = vmatprep.subr.bf16.mxu1 %v11029_v32  ;;  %v13567_v31 = vand.u32 2147450879, %v3338_v23  ;;  %v13569_v32 = vand.u32 2147450879, %v3341_v26  ;;  %v11581_v23 = vld [vmem:[%s14930_s26 + $0x58] sm:$0xff] }
 0x1f8   :  { %v3347_v24 = vsub.bf16 %v11581_v23, %v11580_v22  ;;  %v11141_v26 = vld [vmem:[%s14928_s29 + $0x11e8] ss:$16 sps:$4 sm:$0xff]   ;;  %v11197_v22 = vld [vmem:[%s14928_s29 + $0x130c] ss:$16 sps:$4 sm:$0xff]   ;;  %v11192_v23 = vld [vmem:[%s14928_s29 + $0x1300] ss:$16 sps:$4 sm:$0xff]  }
 0x1fa   :  { %4703 = vmatpush1.bf16.msra.mxu0 %v11024_v33  ;;  %4892 = vmatpush1.bf16.msra.mxu1 %v11027_v34  ;;  %v9060_v33 = vcombine.low %v3367_v13, %v3370_v14  ;;  %v11072_v34 = vld [vmem:[%s14928_s29 + $0x1080] ss:$16 sps:$4 sm:$0xff]   ;;  %v11134_v13 = vld [vmem:[%s14928_s29 + $0x11c4] ss:$16 sps:$4 sm:$0xff]   ;;  %v11137_v14 = vld [vmem:[%s14928_s29 + $0x11cc] ss:$16 sps:$4 sm:$0xff]  }
 0x1fb   :  { %4704 = vmatprep.subr.bf16.mxu0 %v11032_v35  ;;  %4893 = vmatprep.subr.bf16.mxu1 %v11035_v36  ;;  %v11075_v35 = vld [vmem:[%s14928_s29 + $0x1088] ss:$16 sps:$4 sm:$0xff]   ;;  %v11080_v36 = vld [vmem:[%s14928_s29 + $0x10a4] ss:$16 sps:$4 sm:$0xff]  }
 0x1fe   :  { %4705 = vmatpush1.bf16.msra.mxu0 %v11030_v37  ;;  %4894 = vmatpush1.bf16.msra.mxu1 %v11033_v38  ;;  %v11083_v37 = vld [vmem:[%s14928_s29 + $0x10ac] ss:$16 sps:$4 sm:$0xff]   ;;  %v9051_v38 = vcombine.high %v13567_v31, %v13569_v32 }
 0x1ff   :  { %4706 = vmatprep.subr.bf16.mxu0 %v11038_v39  ;;  %4895 = vmatprep.subr.bf16.mxu1 %v11041_v40  ;;  %v11078_v39 = vld [vmem:[%s14928_s29 + $0x10a0] ss:$16 sps:$4 sm:$0xff]   ;;  %v11081_v40 = vld [vmem:[%s14928_s29 + $0x10a8] ss:$16 sps:$4 sm:$0xff]  }
 0x202   :  { %4707 = vmatpush1.bf16.msra.mxu0 %v11036_v41  ;;  %4896 = vmatpush1.bf16.msra.mxu1 %v11039_v42  ;;  %v11086_v41 = vld [vmem:[%s14928_s29 + $0x10c4] ss:$16 sps:$4 sm:$0xff]   ;;  %v11089_v42 = vld [vmem:[%s14928_s29 + $0x10cc] ss:$16 sps:$4 sm:$0xff]  }
 0x203   :  { %4708 = vmatprep.subr.bf16.mxu0 %v11044_v43  ;;  %4897 = vmatprep.subr.bf16.mxu1 %v11047_v44  ;;  %v11084_v43 = vld [vmem:[%s14928_s29 + $0x10c0] ss:$16 sps:$4 sm:$0xff]   ;;  %v11087_v44 = vld [vmem:[%s14928_s29 + $0x10c8] ss:$16 sps:$4 sm:$0xff]  }
 0x206   :  { %4709 = vmatpush1.bf16.msra.mxu0 %v11042_v53  ;;  %4898 = vmatpush1.bf16.msra.mxu1 %v11045_v54  ;;  %v11096_v53 = vld [vmem:[%s14928_s29 + $0x1100] ss:$16 sps:$4 sm:$0xff]   ;;  %v11099_v54 = vld [vmem:[%s14928_s29 + $0x1108] ss:$16 sps:$4 sm:$0xff]  }
 0x207   :  { %4741 = vmatprep.subr.bf16.mxu0 %v11050_v57  ;;  %4930 = vmatprep.subr.bf16.mxu1 %v11053_v58  ;;  %v11104_v57 = vld [vmem:[%s14928_s29 + $0x1124] ss:$16 sps:$4 sm:$0xff]   ;;  %v11107_v58 = vld [vmem:[%s14928_s29 + $0x112c] ss:$16 sps:$4 sm:$0xff]  }
 0x209   :  { %4711 = vmatmul.mubr.bf16.vlgmr.msra.gmra.mrb[0].mxu0 %v9048_v63  ;;  %4900 = vmatmul.mubr.bf16.vlgmr.msra.gmra.mrb[0].mxu1 %v9048_v63  ;;  %v11110_v63 = vld [vmem:[%s14928_s29 + $0x1144] ss:$16 sps:$4 sm:$0xff]  }
 0x20a   :  { %4742 = vmatpush1.bf16.msra.mxu0 %v11048_v0  ;;  %4931 = vmatpush1.bf16.msra.mxu1 %v11051_v1  ;;  %v11113_v0 = vld [vmem:[%s14928_s29 + $0x114c] ss:$16 sps:$4 sm:$0xff]   ;;  %v11108_v1 = vld [vmem:[%s14928_s29 + $0x1140] ss:$16 sps:$4 sm:$0xff]  }
 0x20b   :  { %4743 = vmatprep.subr.bf16.mxu0 %v11056_v2  ;;  %4932 = vmatprep.subr.bf16.mxu1 %v11059_v61  ;;  %v11111_v2 = vld [vmem:[%s14928_s29 + $0x1148] ss:$16 sps:$4 sm:$0xff]   ;;  %v11116_v61 = vld [vmem:[%s14928_s29 + $0x1164] ss:$16 sps:$4 sm:$0xff]  }
 0x20c   :  { %4720 = vmatprep.mubr.bf16.mxu0 %v9055_v62  ;;  %4909 = vmatprep.mubr.bf16.mxu1 %v9055_v62  ;;  %v11119_v62 = vld [vmem:[%s14928_s29 + $0x116c] ss:$16 sps:$4 sm:$0xff]  }
 0x20e   :  { %4744 = vmatpush1.bf16.msra.mxu0 %v11054_v9  ;;  %4933 = vmatpush1.bf16.msra.mxu1 %v11057_v10  ;;  %v11128_v9 = vld [vmem:[%s14928_s29 + $0x11a4] ss:$16 sps:$4 sm:$0xff]   ;;  %v11131_v10 = vld [vmem:[%s14928_s29 + $0x11ac] ss:$16 sps:$4 sm:$0xff]  }
 0x20f   :  { %4745 = vmatprep.subr.bf16.mxu0 %v11062_v11  ;;  %4934 = vmatprep.subr.bf16.mxu1 %v11065_v12  ;;  %v11126_v11 = vld [vmem:[%s14928_s29 + $0x11a0] ss:$16 sps:$4 sm:$0xff]   ;;  %v11129_v12 = vld [vmem:[%s14928_s29 + $0x11a8] ss:$16 sps:$4 sm:$0xff]  }
 0x211   :  { %4721 = vmatmul.mubr.bf16.gmra.mrb[4].mxu0 %v9054_v15  ;;  %4910 = vmatmul.mubr.bf16.gmra.mrb[4].mxu1 %v9054_v15  ;;  %v11132_v15 = vld [vmem:[%s14928_s29 + $0x11c0] ss:$16 sps:$4 sm:$0xff]  }
 0x212   :  { %4746 = vmatpush1.bf16.msra.mxu0 %v11060_v16  ;;  %4935 = vmatpush1.bf16.msra.mxu1 %v11063_v17  ;;  %v11135_v16 = vld [vmem:[%s14928_s29 + $0x11c8] ss:$16 sps:$4 sm:$0xff]   ;;  %v11140_v17 = vld [vmem:[%s14928_s29 + $0x11e4] ss:$16 sps:$4 sm:$0xff]  }
 0x213   :  { %4747 = vmatprep.subr.bf16.mxu0 %v11068_v18  ;;  %4936 = vmatprep.subr.bf16.mxu1 %v11071_v19  ;;  %v11143_v18 = vld [vmem:[%s14928_s29 + $0x11ec] ss:$16 sps:$4 sm:$0xff]   ;;  %v11578_v19 = vld [vmem:[%s14929_s23 + $0x40] sm:$0xff] }
 0x214   :  { %4730 = vmatprep.mubr.bf16.mxu0 %v9061_v20  ;;  %4919 = vmatprep.mubr.bf16.mxu1 %v9061_v20  ;;  %v11579_v20 = vld [vmem:[%s14930_s26 + $0x40] sm:$0xff] }
 0x215   :  { %v3344_v21 = vsub.bf16 %v11579_v20, %v11578_v19  ;;  %v11186_v19 = vld [vmem:[%s14928_s29 + $0x12e0] ss:$16 sps:$4 sm:$0xff]   ;;  %v11189_v20 = vld [vmem:[%s14928_s29 + $0x12e8] ss:$16 sps:$4 sm:$0xff]  }
 0x216   :  { %4748 = vmatpush1.bf16.msra.mxu0 %v11066_v27  ;;  %4937 = vmatpush1.bf16.msra.mxu1 %v11069_v28  ;;  %v11146_v27 = vld [vmem:[%s14928_s29 + $0x1204] ss:$16 sps:$4 sm:$0xff]   ;;  %v11149_v28 = vld [vmem:[%s14928_s29 + $0x120c] ss:$16 sps:$4 sm:$0xff]  }
 0x217   :  { %4749 = vmatprep.subr.bf16.mxu0 %v11074_v29  ;;  %4938 = vmatprep.subr.bf16.mxu1 %v11077_v30  ;;  %v3362_v29 = vand.u32 2147450879, %v3344_v21  ;;  %v3365_v30 = vand.u32 2147450879, %v3347_v24  ;;  %v11194_v21 = vld [vmem:[%s14928_s29 + $0x1304] ss:$16 sps:$4 sm:$0xff]  }
 0x218   :  { %v11195_v24 = vld [vmem:[%s14928_s29 + $0x1308] ss:$16 sps:$4 sm:$0xff]  }
 0x219   :  { %4731 = vmatmul.mubr.bf16.gmra.mrb[8].mxu0 %v9060_v33  ;;  %4920 = vmatmul.mubr.bf16.gmra.mrb[8].mxu1 %v9060_v33  ;;  %v9050_v33 = vcombine.low %v13567_v31, %v13569_v32  ;;  %v11155_v31 = vld [vmem:[%s14928_s29 + $0x122c] ss:$16 sps:$4 sm:$0xff]   ;;  %v9057_v32 = vcombine.high %v3362_v29, %v3365_v30 }
 0x21a   :  { %4750 = vmatpush1.bf16.msra.mxu0 %v11072_v34  ;;  %4939 = vmatpush1.bf16.msra.mxu1 %v11075_v35  ;;  %v11144_v34 = vld [vmem:[%s14928_s29 + $0x1200] ss:$16 sps:$4 sm:$0xff]   ;;  %v11147_v35 = vld [vmem:[%s14928_s29 + $0x1208] ss:$16 sps:$4 sm:$0xff]  }
 0x21b   :  { %4751 = vmatprep.subr.bf16.mxu0 %v11080_v36  ;;  %4940 = vmatprep.subr.bf16.mxu1 %v11083_v37  ;;  %v11152_v36 = vld [vmem:[%s14928_s29 + $0x1224] ss:$16 sps:$4 sm:$0xff]  }
 0x21c   :  { %4773 = vmatprep.mubr.bf16.mxu0 %v9051_v38  ;;  %4962 = vmatprep.mubr.bf16.mxu1 %v9051_v38  ;;  %v11582_v37 = vld [vmem:[%s14929_s23 + $0x70] sm:$0xff] }
 0x21d   :  { %v11583_v38 = vld [vmem:[%s14930_s26 + $0x70] sm:$0xff] }
 0x21e   :  { %4752 = vmatpush1.bf16.msra.mxu0 %v11078_v39  ;;  %4941 = vmatpush1.bf16.msra.mxu1 %v11081_v40  ;;  %v3350_v39 = vsub.bf16 %v11583_v38, %v11582_v37  ;;  %v11584_v40 = vld [vmem:[%s14929_s23 + $0x88] sm:$0xff]  ;;  %v11218_v37 = vld [vmem:[%s14928_s29 + $0x1384] ss:$16 sps:$4 sm:$0xff]  }
 0x21f   :  { %4753 = vmatprep.subr.bf16.mxu0 %v11086_v41  ;;  %4942 = vmatprep.subr.bf16.mxu1 %v11089_v42  ;;  %v11585_v41 = vld [vmem:[%s14930_s26 + $0x88] sm:$0xff] }
 0x220   :  { %v3353_v42 = vsub.bf16 %v11585_v41, %v11584_v40  ;;  %v11221_v38 = vld [vmem:[%s14928_s29 + $0x138c] ss:$16 sps:$4 sm:$0xff]   ;;  %v11219_v40 = vld [vmem:[%s14928_s29 + $0x1388] ss:$16 sps:$4 sm:$0xff]   ;;  %v11224_v41 = vld [vmem:[%s14928_s29 + $0x13a4] ss:$16 sps:$4 sm:$0xff]  }
 0x222   :  { %4754 = vmatpush1.bf16.msra.mxu0 %v11084_v43  ;;  %4943 = vmatpush1.bf16.msra.mxu1 %v11087_v44  ;;  %v11150_v43 = vld [vmem:[%s14928_s29 + $0x1220] ss:$16 sps:$4 sm:$0xff]   ;;  %v11153_v44 = vld [vmem:[%s14928_s29 + $0x1228] ss:$16 sps:$4 sm:$0xff]  }
 0x223   :  { %4755 = vmatprep.subr.bf16.mxu0 %v11092_v45  ;;  %4944 = vmatprep.subr.bf16.mxu1 %v11095_v46  ;;  %v11158_v45 = vld [vmem:[%s14928_s29 + $0x1244] ss:$16 sps:$4 sm:$0xff]   ;;  %v11161_v46 = vld [vmem:[%s14928_s29 + $0x124c] ss:$16 sps:$4 sm:$0xff]  }
 0x226   :  { %4756 = vmatpush1.bf16.msra.mxu0 %v11090_v47  ;;  %4945 = vmatpush1.bf16.msra.mxu1 %v11093_v48  ;;  %v3368_v47 = vand.u32 2147450879, %v3350_v39  ;;  %v3371_v48 = vand.u32 2147450879, %v3353_v42  ;;  %v11216_v39 = vld [vmem:[%s14928_s29 + $0x1380] ss:$16 sps:$4 sm:$0xff]  }
 0x227   :  { %4757 = vmatprep.subr.bf16.mxu0 %v11098_v49  ;;  %4946 = vmatprep.subr.bf16.mxu1 %v11101_v52  ;;  %v9056_v49 = vcombine.low %v3362_v29, %v3365_v30  ;;  %v11156_v52 = vld [vmem:[%s14928_s29 + $0x1240] ss:$16 sps:$4 sm:$0xff]   ;;  %v11206_v29 = vld [vmem:[%s14928_s29 + $0x1344] ss:$16 sps:$4 sm:$0xff]   ;;  %v11209_v30 = vld [vmem:[%s14928_s29 + $0x134c] ss:$16 sps:$4 sm:$0xff]  }
 0x228   :  { %v11227_v42 = vld [vmem:[%s14928_s29 + $0x13ac] ss:$16 sps:$4 sm:$0xff]  }
 0x22a   :  { %4758 = vmatpush1.bf16.msra.mxu0 %v11096_v53  ;;  %4947 = vmatpush1.bf16.msra.mxu1 %v11099_v54  ;;  %v11159_v53 = vld [vmem:[%s14928_s29 + $0x1248] ss:$16 sps:$4 sm:$0xff]   ;;  %v11164_v54 = vld [vmem:[%s14928_s29 + $0x1264] ss:$16 sps:$4 sm:$0xff]  }
 0x22b   :  { %4759 = vmatprep.subr.bf16.mxu0 %v11104_v57  ;;  %4948 = vmatprep.subr.bf16.mxu1 %v11107_v58  ;;  %v11167_v57 = vld [vmem:[%s14928_s29 + $0x126c] ss:$16 sps:$4 sm:$0xff]   ;;  %v9063_v58 = vcombine.high %v3368_v47, %v3371_v48 }
 0x22e   :  { %4760 = vmatpush1.bf16.msra.mxu0 %v11102_v59  ;;  %4949 = vmatpush1.bf16.msra.mxu1 %v11105_v60  ;;  %v11162_v59 = vld [vmem:[%s14928_s29 + $0x1260] ss:$16 sps:$4 sm:$0xff]   ;;  %v11165_v60 = vld [vmem:[%s14928_s29 + $0x1268] ss:$16 sps:$4 sm:$0xff]  }
 0x22f   :  { %4761 = vmatprep.subr.bf16.mxu0 %v11110_v63  ;;  %4950 = vmatprep.subr.bf16.mxu1 %v11113_v0  ;;  %v11170_v63 = vld [vmem:[%s14928_s29 + $0x1284] ss:$16 sps:$4 sm:$0xff]   ;;  %v11173_v0 = vld [vmem:[%s14928_s29 + $0x128c] ss:$16 sps:$4 sm:$0xff]  }
 0x232   :  { %4762 = vmatpush1.bf16.msra.mxu0 %v11108_v1  ;;  %4951 = vmatpush1.bf16.msra.mxu1 %v11111_v2  ;;  %v11586_v1 = vld [vmem:[%s14929_s23] sm:$0xff] }
 0x233   :  { %4763 = vmatprep.subr.bf16.mxu0 %v11116_v61  ;;  %4952 = vmatprep.subr.bf16.mxu1 %v11119_v62  ;;  %v11587_v2 = vld [vmem:[%s14930_s26] sm:$0xff]  ;;  %v11588_v62 = vld [vmem:[%s14929_s23 + $0x18] sm:$0xff] }
 0x234   :  { %v13797_v61 = vmul.bf16 %v11587_v2, %v11586_v1  ;;  %v11593_v1 = vld [vmem:[%s14930_s26 + $0x48] sm:$0xff] }
 0x236   :  { %4764 = vmatpush1.bf16.msra.mxu0 %v11114_v3  ;;  %4953 = vmatpush1.bf16.msra.mxu1 %v11117_v4  ;;  %v11589_v3 = vld [vmem:[%s14930_s26 + $0x18] sm:$0xff] }
 0x237   :  { %4765 = vmatprep.subr.bf16.mxu0 %v11122_v5  ;;  %4954 = vmatprep.subr.bf16.mxu1 %v11125_v6  ;;  %v13805_v4 = vmul.bf16 %v11589_v3, %v11588_v62  ;;  %v9062_v5 = vcombine.low %v3368_v47, %v3371_v48  ;;  %v11168_v6 = vld [vmem:[%s14928_s29 + $0x1280] ss:$16 sps:$4 sm:$0xff]   ;;  %v11231_v48 = vld [vmem:[%s14928_s29 + $0x13c8] ss:$16 sps:$4 sm:$0xff]  }
 0x238   :  { %v11228_v47 = vld [vmem:[%s14928_s29 + $0x13c0] ss:$16 sps:$4 sm:$0xff]  }
 0x239   :  { %v9448_v62 = vcombine.low %v13797_v61, %v13805_v4  ;;  %v11240_v3 = vld [vmem:[%s14928_s29 + $0x1400] ss:$16 sps:$4 sm:$0xff]  }
 0x23a   :  { %4766 = vmatpush1.bf16.msra.mxu0 %v11120_v7  ;;  %4955 = vmatpush1.bf16.msra.mxu1 %v11123_v8  ;;  %v11171_v7 = vld [vmem:[%s14928_s29 + $0x1288] ss:$16 sps:$4 sm:$0xff]   ;;  %v11176_v8 = vld [vmem:[%s14928_s29 + $0x12a4] ss:$16 sps:$4 sm:$0xff]  }
 0x23b   :  { %4767 = vmatprep.subr.bf16.mxu0 %v11128_v9  ;;  %4956 = vmatprep.subr.bf16.mxu1 %v11131_v10  ;;  %v11179_v9 = vld [vmem:[%s14928_s29 + $0x12ac] ss:$16 sps:$4 sm:$0xff]   ;;  %v9449_v10 = vcombine.high %v13797_v61, %v13805_v4 }
 0x23c   :  { %v11251_v61 = vld [vmem:[%s14928_s29 + $0x142c] ss:$16 sps:$4 sm:$0xff]  }
 0x23e   :  { %4768 = vmatpush1.bf16.msra.mxu0 %v11126_v11  ;;  %4957 = vmatpush1.bf16.msra.mxu1 %v11129_v12  ;;  %v11174_v11 = vld [vmem:[%s14928_s29 + $0x12a0] ss:$16 sps:$4 sm:$0xff]   ;;  %v11177_v12 = vld [vmem:[%s14928_s29 + $0x12a8] ss:$16 sps:$4 sm:$0xff]  }
 0x23f   :  { %4769 = vmatprep.subr.bf16.mxu0 %v11134_v13  ;;  %4958 = vmatprep.subr.bf16.mxu1 %v11137_v14  ;;  %v11182_v13 = vld [vmem:[%s14928_s29 + $0x12c4] ss:$16 sps:$4 sm:$0xff]   ;;  %v11185_v14 = vld [vmem:[%s14928_s29 + $0x12cc] ss:$16 sps:$4 sm:$0xff]  }
 0x242   :  { %4770 = vmatpush1.bf16.msra.mxu0 %v11132_v15  ;;  %4959 = vmatpush1.bf16.msra.mxu1 %v11135_v16  ;;  %v11180_v15 = vld [vmem:[%s14928_s29 + $0x12c0] ss:$16 sps:$4 sm:$0xff]   ;;  %v11183_v16 = vld [vmem:[%s14928_s29 + $0x12c8] ss:$16 sps:$4 sm:$0xff]  }
 0x243   :  { %4771 = vmatprep.subr.bf16.mxu0 %v11140_v17  ;;  %4960 = vmatprep.subr.bf16.mxu1 %v11143_v18  ;;  %v11188_v17 = vld [vmem:[%s14928_s29 + $0x12e4] ss:$16 sps:$4 sm:$0xff]   ;;  %v11191_v18 = vld [vmem:[%s14928_s29 + $0x12ec] ss:$16 sps:$4 sm:$0xff]  }
 0x246   :  { %4772 = vmatpush1.bf16.msra.mxu0 %v11138_v25  ;;  %4961 = vmatpush1.bf16.msra.mxu1 %v11141_v26  ;;  %v11200_v25 = vld [vmem:[%s14928_s29 + $0x1324] ss:$16 sps:$4 sm:$0xff]   ;;  %v11203_v26 = vld [vmem:[%s14928_s29 + $0x132c] ss:$16 sps:$4 sm:$0xff]  }
 0x247   :  { %6278 = vmatprep.subr.bf16.mxu0 %v11146_v27  ;;  %6467 = vmatprep.subr.bf16.mxu1 %v11149_v28  ;;  %v11198_v27 = vld [vmem:[%s14928_s29 + $0x1320] ss:$16 sps:$4 sm:$0xff]   ;;  %v11201_v28 = vld [vmem:[%s14928_s29 + $0x1328] ss:$16 sps:$4 sm:$0xff]  }
 0x249   :  { %4774 = vmatmul.mubr.bf16.vlgmr.msra.gmra.mrb[0].mxu0 %v9050_v33  ;;  %4963 = vmatmul.mubr.bf16.vlgmr.msra.gmra.mrb[0].mxu1 %v9050_v33  ;;  %v11204_v33 = vld [vmem:[%s14928_s29 + $0x1340] ss:$16 sps:$4 sm:$0xff]  }
 0x24a   :  { %6279 = vmatpush1.bf16.msra.mxu0 %v11144_v34  ;;  %6468 = vmatpush1.bf16.msra.mxu1 %v11147_v35  ;;  %v11207_v34 = vld [vmem:[%s14928_s29 + $0x1348] ss:$16 sps:$4 sm:$0xff]   ;;  %v11212_v35 = vld [vmem:[%s14928_s29 + $0x1364] ss:$16 sps:$4 sm:$0xff]  }
 0x24b   :  { %6280 = vmatprep.subr.bf16.mxu0 %v11152_v36  ;;  %6469 = vmatprep.subr.bf16.mxu1 %v11155_v31  ;;  %v11215_v36 = vld [vmem:[%s14928_s29 + $0x136c] ss:$16 sps:$4 sm:$0xff]   ;;  %v11210_v31 = vld [vmem:[%s14928_s29 + $0x1360] ss:$16 sps:$4 sm:$0xff]  }
 0x24c   :  { %4783 = vmatprep.mubr.bf16.mxu0 %v9057_v32  ;;  %4972 = vmatprep.mubr.bf16.mxu1 %v9057_v32  ;;  %v11213_v32 = vld [vmem:[%s14928_s29 + $0x1368] ss:$16 sps:$4 sm:$0xff]  }
 0x24e   :  { %6281 = vmatpush1.bf16.msra.mxu0 %v11150_v43  ;;  %6470 = vmatpush1.bf16.msra.mxu1 %v11153_v44  ;;  %v11222_v43 = vld [vmem:[%s14928_s29 + $0x13a0] ss:$16 sps:$4 sm:$0xff]   ;;  %v11225_v44 = vld [vmem:[%s14928_s29 + $0x13a8] ss:$16 sps:$4 sm:$0xff]  }
 0x24f   :  { %6282 = vmatprep.subr.bf16.mxu0 %v11158_v45  ;;  %6471 = vmatprep.subr.bf16.mxu1 %v11161_v46  ;;  %v11230_v45 = vld [vmem:[%s14928_s29 + $0x13c4] ss:$16 sps:$4 sm:$0xff]   ;;  %v11233_v46 = vld [vmem:[%s14928_s29 + $0x13cc] ss:$16 sps:$4 sm:$0xff]  }
 0x251   :  { %4784 = vmatmul.mubr.bf16.gmra.mrb[4].mxu0 %v9056_v49  ;;  %4973 = vmatmul.mubr.bf16.gmra.mrb[4].mxu1 %v9056_v49  ;;  %v11236_v49 = vld [vmem:[%s14928_s29 + $0x13e4] ss:$16 sps:$4 sm:$0xff]  }
 0x252   :  { %6283 = vmatpush1.bf16.msra.mxu0 %v11156_v52  ;;  %6472 = vmatpush1.bf16.msra.mxu1 %v11159_v53  ;;  %v11239_v52 = vld [vmem:[%s14928_s29 + $0x13ec] ss:$16 sps:$4 sm:$0xff]   ;;  %v11234_v53 = vld [vmem:[%s14928_s29 + $0x13e0] ss:$16 sps:$4 sm:$0xff]  }
 0x253   :  { %6284 = vmatprep.subr.bf16.mxu0 %v11164_v54  ;;  %6473 = vmatprep.subr.bf16.mxu1 %v11167_v57  ;;  %v11237_v54 = vld [vmem:[%s14928_s29 + $0x13e8] ss:$16 sps:$4 sm:$0xff]   ;;  %v11242_v57 = vld [vmem:[%s14928_s29 + $0x1404] ss:$16 sps:$4 sm:$0xff]  }
 0x254   :  { %4793 = vmatprep.mubr.bf16.mxu0 %v9063_v58  ;;  %4982 = vmatprep.mubr.bf16.mxu1 %v9063_v58  ;;  %v11245_v58 = vld [vmem:[%s14928_s29 + $0x140c] ss:$16 sps:$4 sm:$0xff]  }
 0x256   :  { %6285 = vmatpush1.bf16.msra.mxu0 %v11162_v59  ;;  %6474 = vmatpush1.bf16.msra.mxu1 %v11165_v60  ;;  %v11590_v59 = vld [vmem:[%s14929_s23 + $0x30] sm:$0xff] }
 0x257   :  { %6286 = vmatprep.subr.bf16.mxu0 %v11170_v63  ;;  %6475 = vmatprep.subr.bf16.mxu1 %v11173_v0  ;;  %v11591_v60 = vld [vmem:[%s14930_s26 + $0x30] sm:$0xff]  ;;  %v11592_v0 = vld [vmem:[%s14929_s23 + $0x48] sm:$0xff] }
 0x258   :  { %v5023_v63 = vmul.bf16 %v11591_v60, %v11590_v59  ;;  %v5026_v2 = vmul.bf16 %v11593_v1, %v11592_v0  ;;  %v11306_v59 = vld [vmem:[%s14928_s29 + $0x1560] ss:$16 sps:$4 sm:$0xff]   ;;  %v11309_v60 = vld [vmem:[%s14928_s29 + $0x1568] ss:$16 sps:$4 sm:$0xff]   ;;  %v11317_v0 = vld [vmem:[%s14928_s29 + $0x158c] ss:$16 sps:$4 sm:$0xff]  }
 0x259   :  { %4794 = vmatmul.mubr.bf16.gmra.mrb[8].mxu0 %v9062_v5  ;;  %4983 = vmatmul.mubr.bf16.gmra.mrb[8].mxu1 %v9062_v5  ;;  %v11243_v5 = vld [vmem:[%s14928_s29 + $0x1408] ss:$16 sps:$4 sm:$0xff]   ;;  %v11312_v1 = vld [vmem:[%s14928_s29 + $0x1580] ss:$16 sps:$4 sm:$0xff]  }
 0x25a   :  { %6287 = vmatpush1.bf16.msra.mxu0 %v11168_v6  ;;  %6476 = vmatpush1.bf16.msra.mxu1 %v11171_v7  ;;  %v11248_v6 = vld [vmem:[%s14928_s29 + $0x1424] ss:$16 sps:$4 sm:$0xff]   ;;  %v9455_v4 = vcombine.high %v5023_v63, %v5026_v2  ;;  %v11246_v7 = vld [vmem:[%s14928_s29 + $0x1420] ss:$16 sps:$4 sm:$0xff]  }
 0x25b   :  { %6288 = vmatprep.subr.bf16.mxu0 %v11176_v8  ;;  %6477 = vmatprep.subr.bf16.mxu1 %v11179_v9  ;;  %v11249_v8 = vld [vmem:[%s14928_s29 + $0x1428] ss:$16 sps:$4 sm:$0xff]   ;;  %v11254_v9 = vld [vmem:[%s14928_s29 + $0x1444] ss:$16 sps:$4 sm:$0xff]  }
 0x25c   :  { %6310 = vmatprep.mubr.bf16.mxu0 %v9449_v10  ;;  %6499 = vmatprep.mubr.bf16.mxu1 %v9449_v10  ;;  %v11257_v10 = vld [vmem:[%s14928_s29 + $0x144c] ss:$16 sps:$4 sm:$0xff]  }
 0x25e   :  { %6289 = vmatpush1.bf16.msra.mxu0 %v11174_v11  ;;  %6478 = vmatpush1.bf16.msra.mxu1 %v11177_v12  ;;  %v11594_v11 = vld [vmem:[%s14929_s23 + $0x60] sm:$0xff] }
 0x25f   :  { %6290 = vmatprep.subr.bf16.mxu0 %v11182_v13  ;;  %6479 = vmatprep.subr.bf16.mxu1 %v11185_v14  ;;  %v11595_v12 = vld [vmem:[%s14930_s26 + $0x60] sm:$0xff]  ;;  %v11596_v14 = vld [vmem:[%s14929_s23 + $0x78] sm:$0xff] }
 0x260   :  { %v5029_v13 = vmul.bf16 %v11595_v12, %v11594_v11  ;;  %v11330_v11 = vld [vmem:[%s14928_s29 + $0x15e0] ss:$16 sps:$4 sm:$0xff]   ;;  %v11333_v12 = vld [vmem:[%s14928_s29 + $0x15e8] ss:$16 sps:$4 sm:$0xff]  }
 0x262   :  { %6291 = vmatpush1.bf16.msra.mxu0 %v11180_v15  ;;  %6480 = vmatpush1.bf16.msra.mxu1 %v11183_v16  ;;  %v11597_v15 = vld [vmem:[%s14930_s26 + $0x78] sm:$0xff] }
 0x263   :  { %6292 = vmatprep.subr.bf16.mxu0 %v11188_v17  ;;  %6481 = vmatprep.subr.bf16.mxu1 %v11191_v18  ;;  %v5032_v16 = vmul.bf16 %v11597_v15, %v11596_v14  ;;  %v9454_v17 = vcombine.low %v5023_v63, %v5026_v2  ;;  %v11252_v18 = vld [vmem:[%s14928_s29 + $0x1440] ss:$16 sps:$4 sm:$0xff]   ;;  %v11314_v63 = vld [vmem:[%s14928_s29 + $0x1584] ss:$16 sps:$4 sm:$0xff]   ;;  %v11315_v2 = vld [vmem:[%s14928_s29 + $0x1588] ss:$16 sps:$4 sm:$0xff]  }
 0x264   :  { %v11341_v14 = vld [vmem:[%s14928_s29 + $0x160c] ss:$16 sps:$4 sm:$0xff]  }
 0x265   :  { %v11598_v15 = vld [vmem:[%s14929_s23 + $0x38] sm:$0xff] }
 0x266   :  { %6293 = vmatpush1.bf16.msra.mxu0 %v11186_v19  ;;  %6482 = vmatpush1.bf16.msra.mxu1 %v11189_v20  ;;  %v11255_v19 = vld [vmem:[%s14928_s29 + $0x1448] ss:$16 sps:$4 sm:$0xff]   ;;  %v11260_v20 = vld [vmem:[%s14928_s29 + $0x1464] ss:$16 sps:$4 sm:$0xff]  }
 0x267   :  { %6294 = vmatprep.subr.bf16.mxu0 %v11194_v21  ;;  %6483 = vmatprep.subr.bf16.mxu1 %v11197_v22  ;;  %v11263_v21 = vld [vmem:[%s14928_s29 + $0x146c] ss:$16 sps:$4 sm:$0xff]   ;;  %v9461_v22 = vcombine.high %v5029_v13, %v5032_v16 }
 0x26a   :  { %6295 = vmatpush1.bf16.msra.mxu0 %v11192_v23  ;;  %6484 = vmatpush1.bf16.msra.mxu1 %v11195_v24  ;;  %v11258_v23 = vld [vmem:[%s14928_s29 + $0x1460] ss:$16 sps:$4 sm:$0xff]   ;;  %v11261_v24 = vld [vmem:[%s14928_s29 + $0x1468] ss:$16 sps:$4 sm:$0xff]  }
 0x26b   :  { %6296 = vmatprep.subr.bf16.mxu0 %v11200_v25  ;;  %6485 = vmatprep.subr.bf16.mxu1 %v11203_v26  ;;  %v11266_v25 = vld [vmem:[%s14928_s29 + $0x1484] ss:$16 sps:$4 sm:$0xff]   ;;  %v11269_v26 = vld [vmem:[%s14928_s29 + $0x148c] ss:$16 sps:$4 sm:$0xff]  }
 0x26e   :  { %6297 = vmatpush1.bf16.msra.mxu0 %v11198_v27  ;;  %6486 = vmatpush1.bf16.msra.mxu1 %v11201_v28  ;;  %v14029_v27 = vmul.bf16 %v13303_v51, %v13298_v50  ;;  %v14033_v28 = vmul.bf16 %v13318_v56, %v13313_v55  ;;  %v11272_v50 = vld [vmem:[%s14928_s29 + $0x14a4] ss:$16 sps:$4 sm:$0xff]   ;;  %v11275_v51 = vld [vmem:[%s14928_s29 + $0x14ac] ss:$16 sps:$4 sm:$0xff]   ;;  %v11270_v56 = vld [vmem:[%s14928_s29 + $0x14a0] ss:$16 sps:$4 sm:$0xff]  }
 0x26f   :  { %6298 = vmatprep.subr.bf16.mxu0 %v11206_v29  ;;  %6487 = vmatprep.subr.bf16.mxu1 %v11209_v30  ;;  %v9460_v29 = vcombine.low %v5029_v13, %v5032_v16  ;;  %v11264_v30 = vld [vmem:[%s14928_s29 + $0x1480] ss:$16 sps:$4 sm:$0xff]   ;;  %v11338_v13 = vld [vmem:[%s14928_s29 + $0x1604] ss:$16 sps:$4 sm:$0xff]   ;;  %v11599_v16 = vld [vmem:[%s14930_s26 + $0x38] sm:$0xff] }
 0x270   :  { %v9451_v55 = vcombine.high %v14029_v27, %v14033_v28 }
 0x272   :  { %6299 = vmatpush1.bf16.msra.mxu0 %v11204_v33  ;;  %6488 = vmatpush1.bf16.msra.mxu1 %v11207_v34  ;;  %v11267_v33 = vld [vmem:[%s14928_s29 + $0x1488] ss:$16 sps:$4 sm:$0xff]  }
 0x273   :  { %6300 = vmatprep.subr.bf16.mxu0 %v11212_v35  ;;  %6489 = vmatprep.subr.bf16.mxu1 %v11215_v36  ;;  %v11273_v34 = vld [vmem:[%s14928_s29 + $0x14a8] ss:$16 sps:$4 sm:$0xff]   ;;  %v11278_v35 = vld [vmem:[%s14928_s29 + $0x14c4] ss:$16 sps:$4 sm:$0xff]   ;;  %v11281_v36 = vld [vmem:[%s14928_s29 + $0x14cc] ss:$16 sps:$4 sm:$0xff]  }
 0x276   :  { %6301 = vmatpush1.bf16.msra.mxu0 %v11210_v31  ;;  %6490 = vmatpush1.bf16.msra.mxu1 %v11213_v32  ;;  %v11276_v31 = vld [vmem:[%s14928_s29 + $0x14c0] ss:$16 sps:$4 sm:$0xff]   ;;  %v11279_v32 = vld [vmem:[%s14928_s29 + $0x14c8] ss:$16 sps:$4 sm:$0xff]  }
 0x277   :  { %6302 = vmatprep.subr.bf16.mxu0 %v11218_v37  ;;  %6491 = vmatprep.subr.bf16.mxu1 %v11221_v38  ;;  %v11284_v37 = vld [vmem:[%s14928_s29 + $0x14e4] ss:$16 sps:$4 sm:$0xff]   ;;  %v11287_v38 = vld [vmem:[%s14928_s29 + $0x14ec] ss:$16 sps:$4 sm:$0xff]  }
 0x27a   :  { %6303 = vmatpush1.bf16.msra.mxu0 %v11216_v39  ;;  %6492 = vmatpush1.bf16.msra.mxu1 %v11219_v40  ;;  %v11282_v39 = vld [vmem:[%s14928_s29 + $0x14e0] ss:$16 sps:$4 sm:$0xff]   ;;  %v11285_v40 = vld [vmem:[%s14928_s29 + $0x14e8] ss:$16 sps:$4 sm:$0xff]  }
 0x27b   :  { %6304 = vmatprep.subr.bf16.mxu0 %v11224_v41  ;;  %6493 = vmatprep.subr.bf16.mxu1 %v11227_v42  ;;  %v11290_v41 = vld [vmem:[%s14928_s29 + $0x1504] ss:$16 sps:$4 sm:$0xff]   ;;  %v11293_v42 = vld [vmem:[%s14928_s29 + $0x150c] ss:$16 sps:$4 sm:$0xff]  }
 0x27e   :  { %6305 = vmatpush1.bf16.msra.mxu0 %v11222_v43  ;;  %6494 = vmatpush1.bf16.msra.mxu1 %v11225_v44  ;;  %v11288_v43 = vld [vmem:[%s14928_s29 + $0x1500] ss:$16 sps:$4 sm:$0xff]   ;;  %v11291_v44 = vld [vmem:[%s14928_s29 + $0x1508] ss:$16 sps:$4 sm:$0xff]  }
 0x27f   :  { %6306 = vmatprep.subr.bf16.mxu0 %v11230_v45  ;;  %6495 = vmatprep.subr.bf16.mxu1 %v11233_v46  ;;  %v11296_v45 = vld [vmem:[%s14928_s29 + $0x1524] ss:$16 sps:$4 sm:$0xff]   ;;  %v11299_v46 = vld [vmem:[%s14928_s29 + $0x152c] ss:$16 sps:$4 sm:$0xff]  }
 0x282   :  { %6307 = vmatpush1.bf16.msra.mxu0 %v11228_v47  ;;  %6496 = vmatpush1.bf16.msra.mxu1 %v11231_v48  ;;  %v11294_v47 = vld [vmem:[%s14928_s29 + $0x1520] ss:$16 sps:$4 sm:$0xff]   ;;  %v11297_v48 = vld [vmem:[%s14928_s29 + $0x1528] ss:$16 sps:$4 sm:$0xff]  }
 0x283   :  { %6308 = vmatprep.subr.bf16.mxu0 %v11236_v49  ;;  %6497 = vmatprep.subr.bf16.mxu1 %v11239_v52  ;;  %v11302_v49 = vld [vmem:[%s14928_s29 + $0x1544] ss:$16 sps:$4 sm:$0xff]   ;;  %v11305_v52 = vld [vmem:[%s14928_s29 + $0x154c] ss:$16 sps:$4 sm:$0xff]  }
 0x286   :  { %6309 = vmatpush1.bf16.msra.mxu0 %v11234_v53  ;;  %6498 = vmatpush1.bf16.msra.mxu1 %v11237_v54  ;;  %v11300_v53 = vld [vmem:[%s14928_s29 + $0x1540] ss:$16 sps:$4 sm:$0xff]   ;;  %v11303_v54 = vld [vmem:[%s14928_s29 + $0x1548] ss:$16 sps:$4 sm:$0xff]  }
 0x287   :  { %6341 = vmatprep.subr.bf16.mxu0 %v11242_v57  ;;  %6530 = vmatprep.subr.bf16.mxu1 %v11245_v58  ;;  %v11308_v57 = vld [vmem:[%s14928_s29 + $0x1564] ss:$16 sps:$4 sm:$0xff]   ;;  %v11311_v58 = vld [vmem:[%s14928_s29 + $0x156c] ss:$16 sps:$4 sm:$0xff]  }
 0x289   :  { %6311 = vmatmul.mubr.bf16.vlgmr.msra.gmra.mrb[0].mxu0 %v9448_v62  ;;  %6500 = vmatmul.mubr.bf16.vlgmr.msra.gmra.mrb[0].mxu1 %v9448_v62  ;;  %v11320_v62 = vld [vmem:[%s14928_s29 + $0x15a4] ss:$16 sps:$4 sm:$0xff]  }
 0x28a   :  { %6342 = vmatpush1.bf16.msra.mxu0 %v11240_v3  ;;  %6531 = vmatpush1.bf16.msra.mxu1 %v11243_v5  ;;  %v11323_v3 = vld [vmem:[%s14928_s29 + $0x15ac] ss:$16 sps:$4 sm:$0xff]   ;;  %v11318_v5 = vld [vmem:[%s14928_s29 + $0x15a0] ss:$16 sps:$4 sm:$0xff]  }
 0x28b   :  { %6343 = vmatprep.subr.bf16.mxu0 %v11248_v6  ;;  %6532 = vmatprep.subr.bf16.mxu1 %v11251_v61  ;;  %v11321_v6 = vld [vmem:[%s14928_s29 + $0x15a8] ss:$16 sps:$4 sm:$0xff]   ;;  %v11326_v61 = vld [vmem:[%s14928_s29 + $0x15c4] ss:$16 sps:$4 sm:$0xff]  }
 0x28c   :  { %6320 = vmatprep.mubr.bf16.mxu0 %v9455_v4  ;;  %6509 = vmatprep.mubr.bf16.mxu1 %v9455_v4  ;;  %v11329_v4 = vld [vmem:[%s14928_s29 + $0x15cc] ss:$16 sps:$4 sm:$0xff]  }
 0x28e   :  { %6344 = vmatpush1.bf16.msra.mxu0 %v11246_v7  ;;  %6533 = vmatpush1.bf16.msra.mxu1 %v11249_v8  ;;  %v11324_v7 = vld [vmem:[%s14928_s29 + $0x15c0] ss:$16 sps:$4 sm:$0xff]   ;;  %v11327_v8 = vld [vmem:[%s14928_s29 + $0x15c8] ss:$16 sps:$4 sm:$0xff]  }
 0x28f   :  { %6345 = vmatprep.subr.bf16.mxu0 %v11254_v9  ;;  %6534 = vmatprep.subr.bf16.mxu1 %v11257_v10  ;;  %v11332_v9 = vld [vmem:[%s14928_s29 + $0x15e4] ss:$16 sps:$4 sm:$0xff]   ;;  %v11335_v10 = vld [vmem:[%s14928_s29 + $0x15ec] ss:$16 sps:$4 sm:$0xff]  }
 0x291   :  { %6321 = vmatmul.mubr.bf16.gmra.mrb[4].mxu0 %v9454_v17  ;;  %6510 = vmatmul.mubr.bf16.gmra.mrb[4].mxu1 %v9454_v17  ;;  %v5024_v17 = vmul.bf16 %v11599_v16, %v11598_v15  ;;  %v11396_v15 = vld [vmem:[%s14928_s29 + $0x1740] ss:$16 sps:$4 sm:$0xff]   ;;  %v11399_v16 = vld [vmem:[%s14928_s29 + $0x1748] ss:$16 sps:$4 sm:$0xff]  }
 0x292   :  { %6346 = vmatpush1.bf16.msra.mxu0 %v11252_v18  ;;  %6535 = vmatpush1.bf16.msra.mxu1 %v11255_v19  ;;  %v11600_v18 = vld [vmem:[%s14929_s23 + $0x50] sm:$0xff] }
 0x293   :  { %6347 = vmatprep.subr.bf16.mxu0 %v11260_v20  ;;  %6536 = vmatprep.subr.bf16.mxu1 %v11263_v21  ;;  %v11601_v19 = vld [vmem:[%s14930_s26 + $0x50] sm:$0xff]  ;;  %v9450_v21 = vcombine.low %v14029_v27, %v14033_v28  ;;  %v11345_v28 = vld [vmem:[%s14928_s29 + $0x1628] ss:$16 sps:$4 sm:$0xff]  }
 0x294   :  { %6330 = vmatprep.mubr.bf16.mxu0 %v9461_v22  ;;  %6519 = vmatprep.mubr.bf16.mxu1 %v9461_v22  ;;  %v5027_v20 = vmul.bf16 %v11601_v19, %v11600_v18  ;;  %v11336_v22 = vld [vmem:[%s14928_s29 + $0x1600] ss:$16 sps:$4 sm:$0xff]   ;;  %v11407_v18 = vld [vmem:[%s14928_s29 + $0x176c] ss:$16 sps:$4 sm:$0xff]  }
 0x295   :  { %v11342_v27 = vld [vmem:[%s14928_s29 + $0x1620] ss:$16 sps:$4 sm:$0xff]  }
 0x296   :  { %6348 = vmatpush1.bf16.msra.mxu0 %v11258_v23  ;;  %6537 = vmatpush1.bf16.msra.mxu1 %v11261_v24  ;;  %v11339_v23 = vld [vmem:[%s14928_s29 + $0x1608] ss:$16 sps:$4 sm:$0xff]   ;;  %v11344_v24 = vld [vmem:[%s14928_s29 + $0x1624] ss:$16 sps:$4 sm:$0xff]   ;;  %v11402_v19 = vld [vmem:[%s14928_s29 + $0x1760] ss:$16 sps:$4 sm:$0xff]  }
 0x297   :  { %6349 = vmatprep.subr.bf16.mxu0 %v11266_v25  ;;  %6538 = vmatprep.subr.bf16.mxu1 %v11269_v26  ;;  %v11347_v25 = vld [vmem:[%s14928_s29 + $0x162c] ss:$16 sps:$4 sm:$0xff]   ;;  %v9457_v26 = vcombine.high %v5024_v17, %v5027_v20 }
 0x299   :  { %6331 = vmatmul.mubr.bf16.gmra.mrb[8].mxu0 %v9460_v29  ;;  %6520 = vmatmul.mubr.bf16.gmra.mrb[8].mxu1 %v9460_v29  ;;  %v11350_v29 = vld [vmem:[%s14928_s29 + $0x1644] ss:$16 sps:$4 sm:$0xff]  }
 0x29a   :  { %6350 = vmatpush1.bf16.msra.mxu0 %v11264_v30  ;;  %6539 = vmatpush1.bf16.msra.mxu1 %v11267_v33  ;;  %v11353_v30 = vld [vmem:[%s14928_s29 + $0x164c] ss:$16 sps:$4 sm:$0xff]  }
 0x29b   :  { %6351 = vmatprep.subr.bf16.mxu0 %v11272_v50  ;;  %6540 = vmatprep.subr.bf16.mxu1 %v11275_v51  ;;  %v11602_v33 = vld [vmem:[%s14929_s23 + $0x68] sm:$0xff] }
 0x29c   :  { %6373 = vmatprep.mubr.bf16.mxu0 %v9451_v55  ;;  %6562 = vmatprep.mubr.bf16.mxu1 %v9451_v55  ;;  %v11603_v50 = vld [vmem:[%s14930_s26 + $0x68] sm:$0xff]  ;;  %v11604_v55 = vld [vmem:[%s14929_s23 + $0x80] sm:$0xff] }
 0x29d   :  { %v5030_v51 = vmul.bf16 %v11603_v50, %v11602_v33  ;;  %v11420_v33 = vld [vmem:[%s14928_s29 + $0x17c0] ss:$16 sps:$4 sm:$0xff]   ;;  %v11423_v50 = vld [vmem:[%s14928_s29 + $0x17c8] ss:$16 sps:$4 sm:$0xff]  }
 0x29e   :  { %6352 = vmatpush1.bf16.msra.mxu0 %v11270_v56  ;;  %6541 = vmatpush1.bf16.msra.mxu1 %v11273_v34  ;;  %v11605_v56 = vld [vmem:[%s14930_s26 + $0x80] sm:$0xff] }
 0x29f   :  { %6353 = vmatprep.subr.bf16.mxu0 %v11278_v35  ;;  %6542 = vmatprep.subr.bf16.mxu1 %v11281_v36  ;;  %v5033_v34 = vmul.bf16 %v11605_v56, %v11604_v55  ;;  %v9456_v35 = vcombine.low %v5024_v17, %v5027_v20  ;;  %v11348_v36 = vld [vmem:[%s14928_s29 + $0x1640] ss:$16 sps:$4 sm:$0xff]   ;;  %v11404_v17 = vld [vmem:[%s14928_s29 + $0x1764] ss:$16 sps:$4 sm:$0xff]   ;;  %v11405_v20 = vld [vmem:[%s14928_s29 + $0x1768] ss:$16 sps:$4 sm:$0xff]  }
 0x2a0   :  { %v11431_v55 = vld [vmem:[%s14928_s29 + $0x17ec] ss:$16 sps:$4 sm:$0xff]   ;;  %v11426_v56 = vld [vmem:[%s14928_s29 + $0x17e0] ss:$16 sps:$4 sm:$0xff]  }
 0x2a2   :  { %6354 = vmatpush1.bf16.msra.mxu0 %v11276_v31  ;;  %6543 = vmatpush1.bf16.msra.mxu1 %v11279_v32  ;;  %v11351_v31 = vld [vmem:[%s14928_s29 + $0x1648] ss:$16 sps:$4 sm:$0xff]   ;;  %v11356_v32 = vld [vmem:[%s14928_s29 + $0x1664] ss:$16 sps:$4 sm:$0xff]  }
 0x2a3   :  { %6355 = vmatprep.subr.bf16.mxu0 %v11284_v37  ;;  %6544 = vmatprep.subr.bf16.mxu1 %v11287_v38  ;;  %v11359_v37 = vld [vmem:[%s14928_s29 + $0x166c] ss:$16 sps:$4 sm:$0xff]   ;;  %v9463_v38 = vcombine.high %v5030_v51, %v5033_v34 }
 0x2a6   :  { %6356 = vmatpush1.bf16.msra.mxu0 %v11282_v39  ;;  %6545 = vmatpush1.bf16.msra.mxu1 %v11285_v40  ;;  %v11354_v39 = vld [vmem:[%s14928_s29 + $0x1660] ss:$16 sps:$4 sm:$0xff]   ;;  %v11357_v40 = vld [vmem:[%s14928_s29 + $0x1668] ss:$16 sps:$4 sm:$0xff]  }
 0x2a7   :  { %6357 = vmatprep.subr.bf16.mxu0 %v11290_v41  ;;  %6546 = vmatprep.subr.bf16.mxu1 %v11293_v42  ;;  %v11362_v41 = vld [vmem:[%s14928_s29 + $0x1684] ss:$16 sps:$4 sm:$0xff]   ;;  %v11365_v42 = vld [vmem:[%s14928_s29 + $0x168c] ss:$16 sps:$4 sm:$0xff]  }
 0x2aa   :  { %6358 = vmatpush1.bf16.msra.mxu0 %v11288_v43  ;;  %6547 = vmatpush1.bf16.msra.mxu1 %v11291_v44  ;;  %v11606_v43 = vld [vmem:[%s14929_s23 + $0x10] sm:$0xff] }
 0x2ab   :  { %6359 = vmatprep.subr.bf16.mxu0 %v11296_v45  ;;  %6548 = vmatprep.subr.bf16.mxu1 %v11299_v46  ;;  %v11607_v44 = vld [vmem:[%s14930_s26 + $0x10] sm:$0xff]  ;;  %v11608_v46 = vld [vmem:[%s14929_s23 + $0x28] sm:$0xff] }
 0x2ac   :  { %v14261_v45 = vmul.bf16 %v11607_v44, %v11606_v43  ;;  %v11434_v43 = vld [vmem:[%s14906_s5] sm:$0xff]  }
 0x2ad   :  { %v11435_v44 = vld [vmem:[%s14906_s5 + $0x80] sm:$0xff]  }
 0x2ae   :  { %6360 = vmatpush1.bf16.msra.mxu0 %v11294_v47  ;;  %6549 = vmatpush1.bf16.msra.mxu1 %v11297_v48  ;;  %v11609_v47 = vld [vmem:[%s14930_s26 + $0x28] sm:$0xff] }
 0x2af   :  { %6361 = vmatprep.subr.bf16.mxu0 %v11302_v49  ;;  %6550 = vmatprep.subr.bf16.mxu1 %v11305_v52  ;;  %v14269_v48 = vmul.bf16 %v11609_v47, %v11608_v46  ;;  %v9462_v49 = vcombine.low %v5030_v51, %v5033_v34  ;;  %v11360_v52 = vld [vmem:[%s14928_s29 + $0x1680] ss:$16 sps:$4 sm:$0xff]   ;;  %v11428_v51 = vld [vmem:[%s14928_s29 + $0x17e4] ss:$16 sps:$4 sm:$0xff]   ;;  %v11429_v34 = vld [vmem:[%s14928_s29 + $0x17e8] ss:$16 sps:$4 sm:$0xff]  }
 0x2b0   :  { %v11436_v46 = vld [vmem:[%s14906_s5 + $0x48] sm:$0xff]   ;;  %v11614_v47 = vld [vmem:[%s14929_s23 + $0x70] sm:$0xff] }
 0x2b2   :  { %6362 = vmatpush1.bf16.msra.mxu0 %v11300_v53  ;;  %6551 = vmatpush1.bf16.msra.mxu1 %v11303_v54  ;;  %v11363_v53 = vld [vmem:[%s14928_s29 + $0x1688] ss:$16 sps:$4 sm:$0xff]   ;;  %v11368_v54 = vld [vmem:[%s14928_s29 + $0x16a4] ss:$16 sps:$4 sm:$0xff]  }
 0x2b3   :  { %6363 = vmatprep.subr.bf16.mxu0 %v11308_v57  ;;  %6552 = vmatprep.subr.bf16.mxu1 %v11311_v58  ;;  %v11371_v57 = vld [vmem:[%s14928_s29 + $0x16ac] ss:$16 sps:$4 sm:$0xff]   ;;  %v9453_v58 = vcombine.high %v14261_v45, %v14269_v48 }
 0x2b6   :  { %6364 = vmatpush1.bf16.msra.mxu0 %v11306_v59  ;;  %6553 = vmatpush1.bf16.msra.mxu1 %v11309_v60  ;;  %v11366_v59 = vld [vmem:[%s14928_s29 + $0x16a0] ss:$16 sps:$4 sm:$0xff]   ;;  %v11369_v60 = vld [vmem:[%s14928_s29 + $0x16a8] ss:$16 sps:$4 sm:$0xff]  }
 0x2b7   :  { %6365 = vmatprep.subr.bf16.mxu0 %v11314_v63  ;;  %6554 = vmatprep.subr.bf16.mxu1 %v11317_v0  ;;  %v11374_v63 = vld [vmem:[%s14928_s29 + $0x16c4] ss:$16 sps:$4 sm:$0xff]   ;;  %v11377_v0 = vld [vmem:[%s14928_s29 + $0x16cc] ss:$16 sps:$4 sm:$0xff]  }
 0x2ba   :  { %6366 = vmatpush1.bf16.msra.mxu0 %v11312_v1  ;;  %6555 = vmatpush1.bf16.msra.mxu1 %v11315_v2  ;;  %v11372_v1 = vld [vmem:[%s14928_s29 + $0x16c0] ss:$16 sps:$4 sm:$0xff]   ;;  %v11375_v2 = vld [vmem:[%s14928_s29 + $0x16c8] ss:$16 sps:$4 sm:$0xff]  }
 0x2bb   :  { %6367 = vmatprep.subr.bf16.mxu0 %v11320_v62  ;;  %6556 = vmatprep.subr.bf16.mxu1 %v11323_v3  ;;  %v11380_v62 = vld [vmem:[%s14928_s29 + $0x16e4] ss:$16 sps:$4 sm:$0xff]   ;;  %v11383_v3 = vld [vmem:[%s14928_s29 + $0x16ec] ss:$16 sps:$4 sm:$0xff]  }
 0x2be   :  { %6368 = vmatpush1.bf16.msra.mxu0 %v11318_v5  ;;  %6557 = vmatpush1.bf16.msra.mxu1 %v11321_v6  ;;  %v11378_v5 = vld [vmem:[%s14928_s29 + $0x16e0] ss:$16 sps:$4 sm:$0xff]   ;;  %v11381_v6 = vld [vmem:[%s14928_s29 + $0x16e8] ss:$16 sps:$4 sm:$0xff]  }
 0x2bf   :  { %6369 = vmatprep.subr.bf16.mxu0 %v11326_v61  ;;  %6558 = vmatprep.subr.bf16.mxu1 %v11329_v4  ;;  %v11386_v61 = vld [vmem:[%s14928_s29 + $0x1704] ss:$16 sps:$4 sm:$0xff]   ;;  %v11389_v4 = vld [vmem:[%s14928_s29 + $0x170c] ss:$16 sps:$4 sm:$0xff]  }
 0x2c2   :  { %6370 = vmatpush1.bf16.msra.mxu0 %v11324_v7  ;;  %6559 = vmatpush1.bf16.msra.mxu1 %v11327_v8  ;;  %v11384_v7 = vld [vmem:[%s14928_s29 + $0x1700] ss:$16 sps:$4 sm:$0xff]   ;;  %v11387_v8 = vld [vmem:[%s14928_s29 + $0x1708] ss:$16 sps:$4 sm:$0xff]  }
 0x2c3   :  { %6371 = vmatprep.subr.bf16.mxu0 %v11332_v9  ;;  %6560 = vmatprep.subr.bf16.mxu1 %v11335_v10  ;;  %v11392_v9 = vld [vmem:[%s14928_s29 + $0x1724] ss:$16 sps:$4 sm:$0xff]   ;;  %v11395_v10 = vld [vmem:[%s14928_s29 + $0x172c] ss:$16 sps:$4 sm:$0xff]  }
 0x2c6   :  { %6372 = vmatpush1.bf16.msra.mxu0 %v11330_v11  ;;  %6561 = vmatpush1.bf16.msra.mxu1 %v11333_v12  ;;  %v11390_v11 = vld [vmem:[%s14928_s29 + $0x1720] ss:$16 sps:$4 sm:$0xff]   ;;  %v11393_v12 = vld [vmem:[%s14928_s29 + $0x1728] ss:$16 sps:$4 sm:$0xff]  }
 0x2c7   :  { %6404 = vmatprep.subr.bf16.mxu0 %v11338_v13  ;;  %6593 = vmatprep.subr.bf16.mxu1 %v11341_v14  ;;  %v11398_v13 = vld [vmem:[%s14928_s29 + $0x1744] ss:$16 sps:$4 sm:$0xff]   ;;  %v11401_v14 = vld [vmem:[%s14928_s29 + $0x174c] ss:$16 sps:$4 sm:$0xff]  }
 0x2c9   :  { %6374 = vmatmul.mubr.bf16.vlgmr.msra.gmra.mrb[0].mxu0 %v9450_v21  ;;  %6563 = vmatmul.mubr.bf16.vlgmr.msra.gmra.mrb[0].mxu1 %v9450_v21  ;;  %v11410_v21 = vld [vmem:[%s14928_s29 + $0x1784] ss:$16 sps:$4 sm:$0xff]  }
 0x2ca   :  { %6405 = vmatpush1.bf16.msra.mxu0 %v11336_v22  ;;  %6594 = vmatpush1.bf16.msra.mxu1 %v11339_v23  ;;  %v11413_v22 = vld [vmem:[%s14928_s29 + $0x178c] ss:$16 sps:$4 sm:$0xff]   ;;  %v11408_v23 = vld [vmem:[%s14928_s29 + $0x1780] ss:$16 sps:$4 sm:$0xff]  }
 0x2cb   :  { %6406 = vmatprep.subr.bf16.mxu0 %v11344_v24  ;;  %6595 = vmatprep.subr.bf16.mxu1 %v11347_v25  ;;  %v11411_v24 = vld [vmem:[%s14928_s29 + $0x1788] ss:$16 sps:$4 sm:$0xff]   ;;  %v11416_v25 = vld [vmem:[%s14928_s29 + $0x17a4] ss:$16 sps:$4 sm:$0xff]  }
 0x2cc   :  { %6383 = vmatprep.mubr.bf16.mxu0 %v9457_v26  ;;  %6572 = vmatprep.mubr.bf16.mxu1 %v9457_v26  ;;  %v11419_v26 = vld [vmem:[%s14928_s29 + $0x17ac] ss:$16 sps:$4 sm:$0xff]  }
 0x2ce   :  { %6407 = vmatpush1.bf16.msra.mxu0 %v11342_v27  ;;  %6596 = vmatpush1.bf16.msra.mxu1 %v11345_v28  ;;  %v11414_v27 = vld [vmem:[%s14928_s29 + $0x17a0] ss:$16 sps:$4 sm:$0xff]   ;;  %v11417_v28 = vld [vmem:[%s14928_s29 + $0x17a8] ss:$16 sps:$4 sm:$0xff]  }
 0x2cf   :  { %6408 = vmatprep.subr.bf16.mxu0 %v11350_v29  ;;  %6597 = vmatprep.subr.bf16.mxu1 %v11353_v30  ;;  %v11422_v29 = vld [vmem:[%s14928_s29 + $0x17c4] ss:$16 sps:$4 sm:$0xff]   ;;  %v11425_v30 = vld [vmem:[%s14928_s29 + $0x17cc] ss:$16 sps:$4 sm:$0xff]  }
 0x2d1   :  { %6384 = vmatmul.mubr.bf16.gmra.mrb[4].mxu0 %v9456_v35  ;;  %6573 = vmatmul.mubr.bf16.gmra.mrb[4].mxu1 %v9456_v35  ;;  %v11610_v35 = vld [vmem:[%s14929_s23 + $0x40] sm:$0xff] }
 0x2d2   :  { %6409 = vmatpush1.bf16.msra.mxu0 %v11348_v36  ;;  %6598 = vmatpush1.bf16.msra.mxu1 %v11351_v31  ;;  %v11611_v36 = vld [vmem:[%s14930_s26 + $0x40] sm:$0xff] }
 0x2d3   :  { %6410 = vmatprep.subr.bf16.mxu0 %v11356_v32  ;;  %6599 = vmatprep.subr.bf16.mxu1 %v11359_v37  ;;  %v5025_v31 = vmul.bf16 %v11611_v36, %v11610_v35  ;;  %v11612_v32 = vld [vmem:[%s14929_s23 + $0x58] sm:$0xff] }
 0x2d4   :  { %6393 = vmatprep.mubr.bf16.mxu0 %v9463_v38  ;;  %6582 = vmatprep.mubr.bf16.mxu1 %v9463_v38  ;;  %v11613_v37 = vld [vmem:[%s14930_s26 + $0x58] sm:$0xff] }
 0x2d5   :  { %v5028_v38 = vmul.bf16 %v11613_v37, %v11612_v32 }
 0x2d6   :  { %6411 = vmatpush1.bf16.msra.mxu0 %v11354_v39  ;;  %6600 = vmatpush1.bf16.msra.mxu1 %v11357_v40  ;;  %v11432_v39 = vld [vmem:[%s14906_s5 + $0x40] sm:$0xff]  }
 0x2d7   :  { %6412 = vmatprep.subr.bf16.mxu0 %v11362_v41  ;;  %6601 = vmatprep.subr.bf16.mxu1 %v11365_v42  ;;  %v11433_v40 = vld [vmem:[%s14906_s5 + $0xc0] sm:$0xff]   ;;  %v9452_v41 = vcombine.low %v14261_v45, %v14269_v48  ;;  %v9459_v42 = vcombine.high %v5025_v31, %v5028_v38  ;;  %v11437_v45 = vld [vmem:[%s14906_s5 + $0xc8] sm:$0xff]   ;;  %v11615_v48 = vld [vmem:[%s14930_s26 + $0x70] sm:$0xff] }
 0x2d9   :  { %6394 = vmatmul.mubr.bf16.gmra.mrb[8].mxu0 %v9462_v49  ;;  %6583 = vmatmul.mubr.bf16.gmra.mrb[8].mxu1 %v9462_v49  ;;  %v5031_v49 = vmul.bf16 %v11615_v48, %v11614_v47 }
 0x2da   :  { %6413 = vmatpush1.bf16.msra.mxu0 %v11360_v52  ;;  %6602 = vmatpush1.bf16.msra.mxu1 %v11363_v53  ;;  %v11616_v52 = vld [vmem:[%s14929_s23 + $0x88] sm:$0xff] }
 0x2db   :  { %6414 = vmatprep.subr.bf16.mxu0 %v11368_v54  ;;  %6603 = vmatprep.subr.bf16.mxu1 %v11371_v57  ;;  %v11617_v53 = vld [vmem:[%s14930_s26 + $0x88] sm:$0xff] }
 0x2dc   :  { %6436 = vmatprep.mubr.bf16.mxu0 %v9453_v58  ;;  %6625 = vmatprep.mubr.bf16.mxu1 %v9453_v58  ;;  %v5034_v54 = vmul.bf16 %v11617_v53, %v11616_v52  ;;  %v11438_v57 = vld [vmem:[%s14906_s5 + $0x8] sm:$0xff]  }
 0x2dd   :  { %v11439_v58 = vld [vmem:[%s14906_s5 + $0x88] sm:$0xff]  }
 0x2de   :  { %6415 = vmatpush1.bf16.msra.mxu0 %v11366_v59  ;;  %6604 = vmatpush1.bf16.msra.mxu1 %v11369_v60  ;;  %v11440_v59 = vld [vmem:[%s14906_s5 + $0x50] sm:$0xff]  }
 0x2df   :  { %6416 = vmatprep.subr.bf16.mxu0 %v11374_v63  ;;  %6605 = vmatprep.subr.bf16.mxu1 %v11377_v0  ;;  %v11441_v60 = vld [vmem:[%s14906_s5 + $0xd0] sm:$0xff]   ;;  %v9458_v63 = vcombine.low %v5025_v31, %v5028_v38  ;;  %v9465_v0 = vcombine.high %v5031_v49, %v5034_v54 }
 0x2e2   :  { %6417 = vmatpush1.bf16.msra.mxu0 %v11372_v1  ;;  %6606 = vmatpush1.bf16.msra.mxu1 %v11375_v2  ;;  %v11442_v1 = vld [vmem:[%s14906_s5 + $0x10] sm:$0xff]  }
 0x2e3   :  { %6418 = vmatprep.subr.bf16.mxu0 %v11380_v62  ;;  %6607 = vmatprep.subr.bf16.mxu1 %v11383_v3  ;;  %v11443_v2 = vld [vmem:[%s14906_s5 + $0x90] sm:$0xff]   ;;  %v11444_v62 = vld [vmem:[%s14906_s5 + $0x58] sm:$0xff]  }
 0x2e4   :  { %v11445_v3 = vld [vmem:[%s14906_s5 + $0xd8] sm:$0xff]  }
 0x2e6   :  { %6419 = vmatpush1.bf16.msra.mxu0 %v11378_v5  ;;  %6608 = vmatpush1.bf16.msra.mxu1 %v11381_v6  ;;  %v11446_v5 = vld [vmem:[%s14906_s5 + $0x18] sm:$0xff]  }
 0x2e7   :  { %6420 = vmatprep.subr.bf16.mxu0 %v11386_v61  ;;  %6609 = vmatprep.subr.bf16.mxu1 %v11389_v4  ;;  %v11447_v6 = vld [vmem:[%s14906_s5 + $0x98] sm:$0xff]   ;;  %v11448_v61 = vld [vmem:[%s14906_s5 + $0x60] sm:$0xff]  }
 0x2e8   :  { %v11449_v4 = vld [vmem:[%s14906_s5 + $0xe0] sm:$0xff]  }
 0x2ea   :  { %6421 = vmatpush1.bf16.msra.mxu0 %v11384_v7  ;;  %6610 = vmatpush1.bf16.msra.mxu1 %v11387_v8  ;;  %v9464_v7 = vcombine.low %v5031_v49, %v5034_v54  ;;  %v11450_v8 = vld [vmem:[%s14906_s5 + $0x20] sm:$0xff]  }
 0x2eb   :  { %6422 = vmatprep.subr.bf16.mxu0 %v11392_v9  ;;  %6611 = vmatprep.subr.bf16.mxu1 %v11395_v10  ;;  %v11451_v9 = vld [vmem:[%s14906_s5 + $0xa0] sm:$0xff]   ;;  %v11452_v10 = vld [vmem:[%s14906_s5 + $0x68] sm:$0xff]  }
 0x2ee   :  { %6423 = vmatpush1.bf16.msra.mxu0 %v11390_v11  ;;  %6612 = vmatpush1.bf16.msra.mxu1 %v11393_v12  ;;  %v11453_v11 = vld [vmem:[%s14906_s5 + $0xe8] sm:$0xff]  }
 0x2ef   :  { %6424 = vmatprep.subr.bf16.mxu0 %v11398_v13  ;;  %6613 = vmatprep.subr.bf16.mxu1 %v11401_v14  ;;  %v11454_v12 = vld [vmem:[%s14906_s5 + $0x28] sm:$0xff]   ;;  %v11456_v14 = vld [vmem:[%s14906_s5 + $0x70] sm:$0xff]  }
 0x2f0   :  { %v11455_v13 = vld [vmem:[%s14906_s5 + $0xa8] sm:$0xff]  }
 0x2f2   :  { %6425 = vmatpush1.bf16.msra.mxu0 %v11396_v15  ;;  %6614 = vmatpush1.bf16.msra.mxu1 %v11399_v16  ;;  %v11457_v15 = vld [vmem:[%s14906_s5 + $0xf0] sm:$0xff]  }
 0x2f3   :  { %6426 = vmatprep.subr.bf16.mxu0 %v11404_v17  ;;  %6615 = vmatprep.subr.bf16.mxu1 %v11407_v18  ;;  %v11458_v16 = vld [vmem:[%s14906_s5 + $0x30] sm:$0xff]   ;;  %v11460_v18 = vld [vmem:[%s14906_s5 + $0x78] sm:$0xff]  }
 0x2f4   :  { %v11459_v17 = vld [vmem:[%s14906_s5 + $0xb0] sm:$0xff]  }
 0x2f6   :  { %6427 = vmatpush1.bf16.msra.mxu0 %v11402_v19  ;;  %6616 = vmatpush1.bf16.msra.mxu1 %v11405_v20  ;;  %v11461_v19 = vld [vmem:[%s14906_s5 + $0xf8] sm:$0xff]  }
 0x2f7   :  { %6428 = vmatprep.subr.bf16.mxu0 %v11410_v21  ;;  %6617 = vmatprep.subr.bf16.mxu1 %v11413_v22  ;;  %v11462_v20 = vld [vmem:[%s14906_s5 + $0x38] sm:$0xff]   ;;  %v11618_v22 = vmov 0.0  }
 0x2f8   :  { %v11463_v21 = vld [vmem:[%s14906_s5 + $0xb8] sm:$0xff]  }
 0x2fa   :  { %6429 = vmatpush1.bf16.msra.mxu0 %v11408_v23  ;;  %6618 = vmatpush1.bf16.msra.mxu1 %v11411_v24  ;;  %v6682_v23 = vlaneseq }
 0x2fb   :  { %6430 = vmatprep.subr.bf16.mxu0 %v11416_v25  ;;  %6619 = vmatprep.subr.bf16.mxu1 %v11419_v26 }
 0x2fc   :  { %v14536_v24 = vshrl.u32 %v6682_v23, 7 }
 0x2fe   :  { %6431 = vmatpush1.bf16.msra.mxu0 %v11414_v27  ;;  %6620 = vmatpush1.bf16.msra.mxu1 %v11417_v28  ;;  %v6684_v25 = vsub.s32 0, %v14536_v24  ;;  %v6692_v26 = vsub.s32 2, %v14536_v24  ;;  %v6680_v27 = vld [vmem:[%s14908_s4] sm:$0xf]  ;;  %v6688_v28 = vsub.s32 1, %v14536_v24 }
 0x2ff   :  { %6432 = vmatprep.subr.bf16.mxu0 %v11422_v29  ;;  %6621 = vmatprep.subr.bf16.mxu1 %v11425_v30  ;;  %v6696_v29 = vsub.s32 3, %v14536_v24 }
 0x300   :  { %v14545_v30 = vrot.slane %v6680_v27, %v6684_v25 }
 0x302   :  { %6433 = vmatpush1.bf16.msra.mxu0 %v11420_v33  ;;  %6622 = vmatpush1.bf16.msra.mxu1 %v11423_v50  ;;  %v14547_v33 = vrot.slane %v6680_v27, %v6692_v26  ;;  %v14549_v50 = vrot.slane %v6680_v27, %v6688_v28 }
 0x303   :  { %6434 = vmatprep.subr.bf16.mxu0 %v11428_v51  ;;  %6623 = vmatprep.subr.bf16.mxu1 %v11431_v55  ;;  %v14551_v51 = vrot.slane %v6680_v27, %v6696_v29 }
 0x306   :  { %6435 = vmatpush1.bf16.msra.mxu0 %v11426_v56  ;;  %6624 = vmatpush1.bf16.msra.mxu1 %v11429_v34 }
 0x307   :  { %9765 = vmatprep.subr.bf16.mxu0 %v11432_v39  ;;  %9799 = vmatprep.subr.bf16.mxu1 %v11433_v40 }
 0x309   :  { %6437 = vmatmul.mubr.bf16.vlgmr.msra.gmra.mrb[0].mxu0 %v9452_v41  ;;  %6626 = vmatmul.mubr.bf16.vlgmr.msra.gmra.mrb[0].mxu1 %v9452_v41 }
 0x30a   :  { %6446 = vmatprep.mubr.bf16.mxu0 %v9459_v42  ;;  %6635 = vmatprep.mubr.bf16.mxu1 %v9459_v42 }
 0x30b   :  { %9766 = vmatpush3.bf16.msra.mxu0 %v11434_v43  ;;  %9800 = vmatpush3.bf16.msra.mxu1 %v11435_v44 }
 0x30c   :  { %9767 = vmatprep.subr.bf16.mxu0 %v11436_v46  ;;  %9801 = vmatprep.subr.bf16.mxu1 %v11437_v45 }
 0x30f   :  { %9768 = vmatpush3.bf16.msra.mxu0 %v11438_v57  ;;  %9802 = vmatpush3.bf16.msra.mxu1 %v11439_v58 }
 0x310   :  { %9769 = vmatprep.subr.bf16.mxu0 %v11440_v59  ;;  %9803 = vmatprep.subr.bf16.mxu1 %v11441_v60 }
 0x311   :  { %6447 = vmatmul.mubr.bf16.gmra.mrb[4].mxu0 %v9458_v63  ;;  %6636 = vmatmul.mubr.bf16.gmra.mrb[4].mxu1 %v9458_v63 }
 0x312   :  { %6456 = vmatprep.mubr.bf16.mxu0 %v9465_v0  ;;  %6645 = vmatprep.mubr.bf16.mxu1 %v9465_v0 }
 0x313   :  { %9770 = vmatpush3.bf16.msra.mxu0 %v11442_v1  ;;  %9804 = vmatpush3.bf16.msra.mxu1 %v11443_v2  ;;  %v11464_v2 = vld [vmem:[%s14907_s7] sm:$0xff]  }
 0x314   :  { %9771 = vmatprep.subr.bf16.mxu0 %v11444_v62  ;;  %9805 = vmatprep.subr.bf16.mxu1 %v11445_v3 }
 0x317   :  { %9772 = vmatpush3.bf16.msra.mxu0 %v11446_v5  ;;  %9806 = vmatpush3.bf16.msra.mxu1 %v11447_v6 }
 0x318   :  { %9773 = vmatprep.subr.bf16.mxu0 %v11448_v61  ;;  %9807 = vmatprep.subr.bf16.mxu1 %v11449_v4 }
 0x319   :  { %6457 = vmatmul.mubr.bf16.gmra.mrb[8].mxu0 %v9464_v7  ;;  %6646 = vmatmul.mubr.bf16.gmra.mrb[8].mxu1 %v9464_v7 }
 0x31b   :  { %9774 = vmatpush3.bf16.msra.mxu0 %v11450_v8  ;;  %9808 = vmatpush3.bf16.msra.mxu1 %v11451_v9 }
 0x31c   :  { %9775 = vmatprep.subr.bf16.mxu0 %v11452_v10  ;;  %9809 = vmatprep.subr.bf16.mxu1 %v11453_v11 }
 0x31f   :  { %9776 = vmatpush3.bf16.msra.mxu0 %v11454_v12  ;;  %9810 = vmatpush3.bf16.msra.mxu1 %v11455_v13 }
 0x320   :  { %9777 = vmatprep.subr.bf16.mxu0 %v11456_v14  ;;  %9811 = vmatprep.subr.bf16.mxu1 %v11457_v15 }
 0x323   :  { %9778 = vmatpush3.bf16.msra.mxu0 %v11458_v16  ;;  %9812 = vmatpush3.bf16.msra.mxu1 %v11459_v17 }
 0x324   :  { %9779 = vmatprep.subr.bf16.mxu0 %v11460_v18  ;;  %9813 = vmatprep.subr.bf16.mxu1 %v11461_v19 }
 0x327   :  { %9780 = vmatpush3.bf16.msra.mxu0 %v11462_v20  ;;  %9814 = vmatpush3.bf16.msra.mxu1 %v11463_v21 }
 0x328   :  { %9919 = vmatprep.subr.bf16.mxu0 %v11618_v22  ;;  %9939 = vmatprep.subr.bf16.mxu1 %v11618_v22 }
 0x3dc   :  { %v6438_v55 = vpop.f32.mrb[0].mxu0  ;;  %v6627_v56 = vpop.f32.mrb[0].mxu1 }
 0x3dd   :  { %v6702_v34 = vadd.f32 %v14545_v30, %v6438_v55  ;;  %v6704_v35 = vadd.f32 %v14547_v33, %v6627_v56  ;;  %v6440_v36 = vpop.f32.mrb[1].mxu0  ;;  %v6629_v31 = vpop.f32.mrb[1].mxu1 }
 0x3de   :  { %v6703_v32 = vadd.f32 %v14549_v50, %v6440_v36  ;;  %v6705_v37 = vadd.f32 %v14551_v51, %v6629_v31  ;;  %v6442_v38 = vpop.f32.mrb[2].mxu0  ;;  %v6631_v39 = vpop.f32.mrb[2].mxu1 }
 0x3df   :  { %v6706_v40 = vadd.f32 %v14545_v30, %v6442_v38  ;;  %v6708_v41 = vadd.f32 %v14547_v33, %v6631_v39  ;;  %v6444_v42 = vpop.f32.mrb[3].mxu0  ;;  %v6633_v43 = vpop.f32.mrb[3].mxu1  ;;  %v6726_v45 = vmax.f32 %v6702_v34, 0.0  ;;  %v6728_v47 = vmax.f32 %v6704_v35, 0.0 }
 0x3e0   :  { %v6707_v44 = vadd.f32 %v14549_v50, %v6444_v42  ;;  %v6709_v46 = vadd.f32 %v14551_v51, %v6633_v43  ;;  %v6727_v52 = vmax.f32 %v6703_v32, 0.0  ;;  %v6729_v53 = vmax.f32 %v6705_v37, 0.0 }
 0x3e1   :  { %v6730_v48 = vmax.f32 %v6706_v40, 0.0  ;;  %v6732_v49 = vmax.f32 %v6708_v41, 0.0 }
 0x3e2   :  { %v6731_v54 = vmax.f32 %v6707_v44, 0.0  ;;  %v6733_v57 = vmax.f32 %v6709_v46, 0.0 }
 0x3e3   :  { %v6750_v58 = vpack.c.bf16 %v6730_v48, %v6726_v45  ;;  %v6752_v59 = vpack.c.bf16 %v6732_v49, %v6728_v47 }
 0x3e4   :  { %v6751_v60 = vpack.c.bf16 %v6731_v54, %v6727_v52  ;;  %v6753_v63 = vpack.c.bf16 %v6733_v57, %v6729_v53  ;;  %v6448_v0 = vpop.f32.mrb[4].mxu0  ;;  %v6637_v1 = vpop.f32.mrb[4].mxu1 }
 0x3e5   :  { %v6710_v62 = vadd.f32 %v14545_v30, %v6448_v0  ;;  %v6712_v3 = vadd.f32 %v14547_v33, %v6637_v1  ;;  %v6450_v5 = vpop.f32.mrb[5].mxu0  ;;  %v6639_v6 = vpop.f32.mrb[5].mxu1  ;;  %v11469_v0 = vld [vmem:[%s14909_s9 + $0x8] sm:$0xff]  }
 0x3e6   :  { %v6711_v61 = vadd.f32 %v14549_v50, %v6450_v5  ;;  %v6713_v4 = vadd.f32 %v14551_v51, %v6639_v6  ;;  %v6452_v7 = vpop.f32.mrb[6].mxu0  ;;  %v6641_v8 = vpop.f32.mrb[6].mxu1  ;;  %7057 = vmatprep.mubr.bf16.mxu0 %v6751_v60  ;;  %7114 = vmatprep.mubr.bf16.mxu1 %v6753_v63  ;;  %v11467_v60 = vld [vmem:[%s14907_s7 + $0x18] sm:$0xff]   ;;  %v11468_v63 = vld [vmem:[%s14909_s9] sm:$0xff]  }
 0x3e7   :  { %v6714_v9 = vadd.f32 %v14545_v30, %v6452_v7  ;;  %v6716_v10 = vadd.f32 %v14547_v33, %v6641_v8  ;;  %v6454_v11 = vpop.f32.mrb[7].mxu0  ;;  %v6643_v12 = vpop.f32.mrb[7].mxu1  ;;  %7058 = vmatmul.mubr.bf16.vlgmr.msra.gmra.mrb[12].mxu0 %v6750_v58  ;;  %7115 = vmatmul.mubr.bf16.vlgmr.msra.gmra.mrb[12].mxu1 %v6752_v59  ;;  %v6734_v15 = vmax.f32 %v6710_v62, 0.0  ;;  %v6736_v16 = vmax.f32 %v6712_v3, 0.0  ;;  %v9658_v62 = vld [vmem:[%s14910_s6] ss:$0 sm:$0xff] }
 0x3e8   :  { %v6715_v13 = vadd.f32 %v14549_v50, %v6454_v11  ;;  %v6717_v14 = vadd.f32 %v14551_v51, %v6643_v12  ;;  %9920 = vmatpush3.bf16.msra.mxu0 %v11464_v2  ;;  %v6735_v19 = vmax.f32 %v6711_v61, 0.0  ;;  %v6737_v20 = vmax.f32 %v6713_v4, 0.0  ;;  %9940 = vmatpush3.bf16.msra.mxu1 %v11468_v63  ;;  %v11471_v63 = vld [vmem:[%s14909_s9 + $0x18] sm:$0xff]  }
 0x3e9   :  { %v6738_v17 = vmax.f32 %v6714_v9, 0.0  ;;  %v6740_v18 = vmax.f32 %v6716_v10, 0.0  ;;  %9921 = vmatprep.subr.bf16.mxu0 %v11618_v22  ;;  %9941 = vmatprep.subr.bf16.mxu1 %v11618_v22 }
 0x3ea   :  { %v6739_v21 = vmax.f32 %v6715_v13, 0.0  ;;  %v6741_v25 = vmax.f32 %v6717_v14, 0.0 }
 0x3eb   :  { %v6754_v26 = vpack.c.bf16 %v6738_v17, %v6734_v15  ;;  %v6756_v27 = vpack.c.bf16 %v6740_v18, %v6736_v16 }
 0x3ec   :  { %v6755_v28 = vpack.c.bf16 %v6739_v21, %v6735_v19  ;;  %v6757_v29 = vpack.c.bf16 %v6741_v25, %v6737_v20  ;;  %v6458_v55 = vpop.f32.mrb[8].mxu0  ;;  %v6647_v56 = vpop.f32.mrb[8].mxu1  ;;  %9942 = vmatpush3.bf16.msra.mxu1 %v11469_v0  ;;  %v9691_v0 = vld [vmem:[%s14911_s8] ss:$0 sm:$0xff] }
 0x3ed   :  { %v6718_v34 = vadd.f32 %v14545_v30, %v6458_v55  ;;  %v6720_v35 = vadd.f32 %v14547_v33, %v6647_v56  ;;  %v6460_v36 = vpop.f32.mrb[9].mxu0  ;;  %v6649_v31 = vpop.f32.mrb[9].mxu1  ;;  %9943 = vmatprep.subr.bf16.mxu1 %v11618_v22 }
 0x3ee   :  { %v6719_v32 = vadd.f32 %v14549_v50, %v6460_v36  ;;  %v6721_v37 = vadd.f32 %v14551_v51, %v6649_v31  ;;  %v6462_v38 = vpop.f32.mrb[10].mxu0  ;;  %v6651_v39 = vpop.f32.mrb[10].mxu1  ;;  %7065 = vmatprep.mubr.bf16.mxu0 %v6755_v28  ;;  %7122 = vmatprep.mubr.bf16.mxu1 %v6757_v29 }
 0x3ef   :  { %v6722_v40 = vadd.f32 %v14545_v30, %v6462_v38  ;;  %v6724_v41 = vadd.f32 %v14547_v33, %v6651_v39  ;;  %v6464_v42 = vpop.f32.mrb[11].mxu0  ;;  %v6653_v43 = vpop.f32.mrb[11].mxu1  ;;  %7066 = vmatmul.mubr.bf16.gmra.mrb[16].mxu0 %v6754_v26  ;;  %7123 = vmatmul.mubr.bf16.gmra.mrb[16].mxu1 %v6756_v27  ;;  %v6742_v45 = vmax.f32 %v6718_v34, 0.0  ;;  %v6744_v47 = vmax.f32 %v6720_v35, 0.0 }
 0x3f0   :  { %v6723_v44 = vadd.f32 %v14549_v50, %v6464_v42  ;;  %v6725_v46 = vadd.f32 %v14551_v51, %v6653_v43  ;;  %v6743_v52 = vmax.f32 %v6719_v32, 0.0  ;;  %v6745_v53 = vmax.f32 %v6721_v37, 0.0  ;;  %v11465_v50 = vld [vmem:[%s14907_s7 + $0x8] sm:$0xff]   ;;  %v11466_v51 = vld [vmem:[%s14907_s7 + $0x10] sm:$0xff]  }
 0x3f1   :  { %v6746_v48 = vmax.f32 %v6722_v40, 0.0  ;;  %v6748_v49 = vmax.f32 %v6724_v41, 0.0  ;;  %9922 = vmatpush3.bf16.msra.mxu0 %v11465_v50 }
 0x3f2   :  { %v6747_v54 = vmax.f32 %v6723_v44, 0.0  ;;  %v6749_v57 = vmax.f32 %v6725_v46, 0.0  ;;  %9923 = vmatprep.subr.bf16.mxu0 %v11618_v22 }
 0x3f3   :  { %v6758_v58 = vpack.c.bf16 %v6746_v48, %v6742_v45  ;;  %v6760_v30 = vpack.c.bf16 %v6748_v49, %v6744_v47 }
 0x3f4   :  { %v6759_v59 = vpack.c.bf16 %v6747_v54, %v6743_v52  ;;  %v6761_v33 = vpack.c.bf16 %v6749_v57, %v6745_v53 }
 0x3f5   :  { %9924 = vmatpush3.bf16.msra.mxu0 %v11466_v51 }
 0x3f6   :  { %7073 = vmatprep.mubr.bf16.mxu0 %v6759_v59  ;;  %7130 = vmatprep.mubr.bf16.mxu1 %v6761_v33 }
 0x3f7   :  { %7074 = vmatmul.mubr.bf16.gmra.mrb[20].mxu0 %v6758_v58  ;;  %7131 = vmatmul.mubr.bf16.gmra.mrb[20].mxu1 %v6760_v30 }
 0x3f8   :  { %9925 = vmatprep.subr.bf16.mxu0 %v11618_v22  ;;  %9927 = vmatprep.mubr.msk.bf16.mxu0 %vm11619_vm0, %v11618_v22 }
 0x3f9   :  { %9926 = vmatpush3.bf16.msra.mxu0 %v11467_v60  ;;  %9947 = vmatprep.mubr.msk.bf16.mxu1 %vm11619_vm0, %v11618_v22  ;;  %v11470_v60 = vld [vmem:[%s14909_s9 + $0x10] sm:$0xff]  }
 0x3fa   :  { %9959 = vmatprep.subr.bf16.mxu0 %v11618_v22  ;;  %9944 = vmatpush3.bf16.msra.mxu1 %v11470_v60 }
 0x3fb   :  { %9945 = vmatprep.subr.bf16.mxu1 %v11618_v22 }
 0x3fe   :  { %9946 = vmatpush3.bf16.msra.mxu1 %v11471_v63 }
 0x4ba   :  { %v9781_v1 = vpop.f32.mrb[12].mxu0  ;;  %v9815_v2 = vpop.f32.mrb[12].mxu1 }
 0x4bb   :  { %v9782_v3 = vpop.f32.mrb[13].mxu0  ;;  %v9816_v5 = vpop.f32.mrb[13].mxu1 }
 0x4bc   :  { %v9783_v6 = vadd.f32 %v9782_v3, %v9781_v1  ;;  %v9817_v61 = vadd.f32 %v9816_v5, %v9815_v2  ;;  %v9784_v4 = vpop.f32.mrb[14].mxu0  ;;  %v9818_v7 = vpop.f32.mrb[14].mxu1 }
 0x4bd   :  { %v9785_v8 = vpop.f32.mrb[15].mxu0  ;;  %v9819_v9 = vpop.f32.mrb[15].mxu1 }
 0x4be   :  { %v7060_v10 = vadd.f32 %v9783_v6, %v9658_v62  ;;  %v9786_v11 = vadd.f32 %v9785_v8, %v9784_v4  ;;  %v9820_v12 = vadd.f32 %v9819_v9, %v9818_v7 }
 0x4c0   :  { %v7117_v13 = vadd.f32 %v9817_v61, %v7060_v10  ;;  %v7063_v14 = vadd.f32 %v9786_v11, %v9658_v62 }
 0x4c2   :  { %v7120_v15 = vadd.f32 %v9820_v12, %v7063_v14  ;;  %v9787_v16 = vpop.f32.mrb[16].mxu0  ;;  %v9821_v17 = vpop.f32.mrb[16].mxu1  ;;  %v7139_v20 = vmax.f32 %v7117_v13, 0.0 }
 0x4c3   :  { %v9788_v18 = vpop.f32.mrb[17].mxu0  ;;  %v9822_v19 = vpop.f32.mrb[17].mxu1 }
 0x4c4   :  { %v7140_v21 = vmax.f32 %v7120_v15, 0.0  ;;  %v9789_v25 = vadd.f32 %v9788_v18, %v9787_v16  ;;  %v9823_v26 = vadd.f32 %v9822_v19, %v9821_v17  ;;  %v9790_v27 = vpop.f32.mrb[18].mxu0  ;;  %v9824_v28 = vpop.f32.mrb[18].mxu1 }
 0x4c5   :  { %v9791_v29 = vpop.f32.mrb[19].mxu0  ;;  %v9825_v55 = vpop.f32.mrb[19].mxu1 }
 0x4c6   :  { %v7145_v56 = vpack.c.bf16 %v7140_v21, %v7139_v20  ;;  %v7068_v34 = vadd.f32 %v9789_v25, %v9658_v62  ;;  %v9792_v35 = vadd.f32 %v9791_v29, %v9790_v27  ;;  %v9826_v36 = vadd.f32 %v9825_v55, %v9824_v28  ;;  %v9699_v29 = vld [vmem:[%s14912_s10] ss:$0 sm:$0xff] }
 0x4c8   :  { %v7125_v31 = vadd.f32 %v9823_v26, %v7068_v34  ;;  %v7071_v32 = vadd.f32 %v9792_v35, %v9658_v62  ;;  %9928 = vmatmul.mubr.msk.bf16.vlgmr.msra.gmra.mrb[24].mxu0 %vm7187_vm1, %v7145_v56 }
 0x4c9   :  { %9931 = vmatprep.mubr.msk.bf16.mxu0 %vm11619_vm0, %v11618_v22 }
 0x4ca   :  { %v7128_v37 = vadd.f32 %v9826_v36, %v7071_v32  ;;  %v9793_v38 = vpop.f32.mrb[20].mxu0  ;;  %v9827_v39 = vpop.f32.mrb[20].mxu1  ;;  %v7141_v42 = vmax.f32 %v7125_v31, 0.0 }
 0x4cb   :  { %v9794_v40 = vpop.f32.mrb[21].mxu0  ;;  %v9828_v41 = vpop.f32.mrb[21].mxu1 }
 0x4cc   :  { %v7142_v43 = vmax.f32 %v7128_v37, 0.0  ;;  %v9795_v44 = vadd.f32 %v9794_v40, %v9793_v38  ;;  %v9829_v46 = vadd.f32 %v9828_v41, %v9827_v39  ;;  %v9796_v45 = vpop.f32.mrb[22].mxu0  ;;  %v9830_v47 = vpop.f32.mrb[22].mxu1 }
 0x4cd   :  { %v9797_v48 = vpop.f32.mrb[23].mxu0  ;;  %v9831_v49 = vpop.f32.mrb[23].mxu1 }
 0x4ce   :  { %v7146_v52 = vpack.c.bf16 %v7142_v43, %v7141_v42  ;;  %v7076_v53 = vadd.f32 %v9795_v44, %v9658_v62  ;;  %v9798_v54 = vadd.f32 %v9797_v48, %v9796_v45  ;;  %v9832_v57 = vadd.f32 %v9831_v49, %v9830_v47 }
 0x4cf   :  { %v11621_v48 = vmov 0  }
 0x4d0   :  { %v7133_v58 = vadd.f32 %v9829_v46, %v7076_v53  ;;  %v7079_v30 = vadd.f32 %v9798_v54, %v9658_v62  ;;  %9932 = vmatmul.mubr.msk.bf16.gmra.mrb[28].mxu0 %vm7187_vm1, %v7146_v52  ;;  %10242 = vset.pattern.permute.xlu0 %v11621_v48 }
 0x4d1   :  { %9935 = vmatprep.mubr.msk.bf16.mxu0 %vm11619_vm0, %v11618_v22  ;;  %10243 = vset.pattern.permute.xlu1 %v11621_v48  ;;  %v11478_v48 = vld [vmem:[%s14914_s11 + $0x58] sm:$0xff]  }
 0x4d2   :  { %v7136_v59 = vadd.f32 %v9832_v57, %v7079_v30  ;;  %v7143_v33 = vmax.f32 %v7133_v58, 0.0 }
 0x4d4   :  { %v7144_v50 = vmax.f32 %v7136_v59, 0.0 }
 0x4d6   :  { %v7147_v51 = vpack.c.bf16 %v7144_v50, %v7143_v33 }
 0x4d8   :  { %9936 = vmatmul.mubr.msk.bf16.gmra.mrb[32].mxu0 %vm7187_vm1, %v7147_v51 }
 0x4d9   :  { %9965 = vmatprep.mubr.msk.bf16.mxu0 %vm11619_vm0, %v11618_v22 }
 0x59b   :  { %v7231_v1 = vpop.f32.mrb[24].mxu0 }
 0x59c   :  { %v7232_v2 = vadd.f32 %v9691_v0, %v7231_v1  ;;  %v9929_v62 = vpop.f32.mrb[25].mxu0 }
 0x59d   :  { %v7234_v3 = vpop.f32.mrb[26].mxu0 }
 0x59e   :  { %v7235_v5 = vadd.f32 %v9691_v0, %v7234_v3  ;;  %v9930_v6 = vpop.f32.mrb[27].mxu0  ;;  %v7254_v61 = vmax.f32 %v7232_v2, 0.0 }
 0x5a0   :  { %v7255_v4 = vmax.f32 %v7235_v5, 0.0 }
 0x5a2   :  { %v7260_v7 = vpack.c.bf16 %v7255_v4, %v7254_v61 }
 0x5a3   :  { %v7239_v8 = vpop.f32.mrb[28].mxu0 }
 0x5a4   :  { %v7240_v9 = vadd.f32 %v9691_v0, %v7239_v8  ;;  %v9933_v10 = vpop.f32.mrb[29].mxu0  ;;  %9948 = vmatmul.mubr.msk.bf16.vlgmr.msra.gmra.mrb[24].mxu1 %vm7187_vm1, %v7260_v7 }
 0x5a5   :  { %v7242_v11 = vpop.f32.mrb[30].mxu0  ;;  %9951 = vmatprep.mubr.msk.bf16.mxu1 %vm11619_vm0, %v11618_v22 }
 0x5a6   :  { %v7243_v12 = vadd.f32 %v9691_v0, %v7242_v11  ;;  %v9934_v13 = vpop.f32.mrb[31].mxu0  ;;  %v7256_v14 = vmax.f32 %v7240_v9, 0.0 }
 0x5a8   :  { %v7257_v15 = vmax.f32 %v7243_v12, 0.0 }
 0x5aa   :  { %v7261_v16 = vpack.c.bf16 %v7257_v15, %v7256_v14 }
 0x5ab   :  { %v7247_v17 = vpop.f32.mrb[32].mxu0 }
 0x5ac   :  { %v7248_v18 = vadd.f32 %v9691_v0, %v7247_v17  ;;  %v9937_v19 = vpop.f32.mrb[33].mxu0  ;;  %9952 = vmatmul.mubr.msk.bf16.gmra.mrb[28].mxu1 %vm7187_vm1, %v7261_v16 }
 0x5ad   :  { %v7250_v20 = vpop.f32.mrb[34].mxu0  ;;  %9955 = vmatprep.mubr.msk.bf16.mxu1 %vm11619_vm0, %v11618_v22 }
 0x5ae   :  { %v7251_v21 = vadd.f32 %v9691_v0, %v7250_v20  ;;  %v9938_v25 = vpop.f32.mrb[35].mxu0  ;;  %v7258_v26 = vmax.f32 %v7248_v18, 0.0 }
 0x5b0   :  { %v7259_v27 = vmax.f32 %v7251_v21, 0.0 }
 0x5b2   :  { %v7262_v28 = vpack.c.bf16 %v7259_v27, %v7258_v26 }
 0x5b4   :  { %9956 = vmatmul.mubr.msk.bf16.gmra.mrb[32].mxu1 %vm7187_vm1, %v7262_v28  ;;  %v11472_v28 = vld [vmem:[%s14914_s11 + $0x40] sm:$0xff]  }
 0x5b5   :  { %9851 = vmatprep.subr.bf16.mxu1 %v11472_v28  ;;  %v7572_v28 = vld [vmem:[%s14915_s2 + $0x10] sm:$0xff] }
 0x677   :  { %v7345_v55 = vpop.f32.mrb[24].mxu1 }
 0x678   :  { %v7346_v56 = vadd.f32 %v9699_v29, %v7345_v55  ;;  %v9949_v34 = vpop.f32.mrb[25].mxu1 }
 0x679   :  { %v7348_v35 = vpop.f32.mrb[26].mxu1 }
 0x67a   :  { %7369 = vst.msk [vmem:[%s14913_s17] sm:$0xff] %vm7368_vm2, %v7346_v56  ;;  %v7349_v36 = vadd.f32 %v9699_v29, %v7348_v35  ;;  %7381 = vrot.lane.b32.xlu0 %v7346_v56, %s11620_s1  ;;  %v9950_v31 = vpop.f32.mrb[27].mxu1 }
 0x67c   :  { %7370 = vst.msk [vmem:[%s14913_s17 + $0x8] sm:$0xff] %vm7368_vm2, %v7349_v36 }
 0x67e   :  { %7383 = vrot.lane.b32.xlu0 %v7349_v36, %s11620_s1 }
 0x67f   :  { %v7353_v32 = vpop.f32.mrb[28].mxu1 }
 0x680   :  { %v7354_v37 = vadd.f32 %v9699_v29, %v7353_v32  ;;  %v9953_v38 = vpop.f32.mrb[29].mxu1  ;;  %v11474_v32 = vld [vmem:[%s14914_s11 + $0x48] sm:$0xff]  }
 0x681   :  { %v7356_v39 = vpop.f32.mrb[30].mxu1  ;;  %v11475_v38 = vld [vmem:[%s14914_s11 + $0x8] sm:$0xff]  }
 0x682   :  { %7371 = vst.msk [vmem:[%s14913_s17 + $0x10] sm:$0xff] %vm7368_vm2, %v7354_v37  ;;  %v7357_v40 = vadd.f32 %v9699_v29, %v7356_v39  ;;  %7385 = vrot.lane.b32.xlu1 %v7354_v37, %s11620_s1  ;;  %v9954_v41 = vpop.f32.mrb[31].mxu1 }
 0x684   :  { %7372 = vst.msk [vmem:[%s14913_s17 + $0x18] sm:$0xff] %vm7368_vm2, %v7357_v40 }
 0x686   :  { %7387 = vrot.lane.b32.xlu1 %v7357_v40, %s11620_s1 }
 0x687   :  { %v7361_v42 = vpop.f32.mrb[32].mxu1 }
 0x688   :  { %v7362_v43 = vadd.f32 %v9699_v29, %v7361_v42  ;;  %v9957_v44 = vpop.f32.mrb[33].mxu1  ;;  %v11476_v42 = vld [vmem:[%s14914_s11 + $0x50] sm:$0xff]  }
 0x689   :  { %v7364_v46 = vpop.f32.mrb[34].mxu1  ;;  %v11477_v44 = vld [vmem:[%s14914_s11 + $0x10] sm:$0xff]  }
 0x68a   :  { %7373 = vst.msk [vmem:[%s14913_s17 + $0x20] sm:$0xff] %vm7368_vm2, %v7362_v43  ;;  %v7365_v45 = vadd.f32 %v9699_v29, %v7364_v46  ;;  %7389 = vrot.lane.b32.xlu0 %v7362_v43, %s11620_s1  ;;  %v9958_v47 = vpop.f32.mrb[35].mxu1  ;;  %v11473_v29 = vld [vmem:[%s14914_s11] sm:$0xff]  }
 0x68b   :  { %9852 = vmatpush3.bf16.msra.mxu1 %v11473_v29  ;;  %v9713_v29 = vcombine.high %v7572_v28, %v7572_v28 }
 0x68c   :  { %7374 = vst.msk [vmem:[%s14913_s17 + $0x28] sm:$0xff] %vm7368_vm2, %v7365_v45  ;;  %7391 = vrot.lane.b32.xlu1 %v7365_v45, %s11620_s1  ;;  %9853 = vmatprep.subr.bf16.mxu1 %v11474_v32 }
 0x68f   :  { %9854 = vmatpush3.bf16.msra.mxu1 %v11475_v38 }
 0x690   :  { %9855 = vmatprep.subr.bf16.mxu1 %v11476_v42 }
 0x693   :  { %9856 = vmatpush3.bf16.msra.mxu1 %v11477_v44 }
 0x694   :  { %9857 = vmatprep.subr.bf16.mxu1 %v11478_v48 }
 0x6ec   :  { %v7382_v49 = vpop.permute.xlu0 %7381 }
 0x6ed   :  { %v7399_v52 = vsub.f32 %v7346_v56, %v7382_v49  ;;  %v11479_v49 = vld [vmem:[%s14914_s11 + $0x18] sm:$0xff]  }
 0x6ee   :  { %9858 = vmatpush3.bf16.msra.mxu1 %v11479_v49  ;;  %v7468_v49 = vld [vmem:[%s14917_s12 + $0x18] sm:$0xff] }
 0x6ef   :  { %v7405_v53 = vand.u32 2147483647, %v7399_v52  ;;  %vm7441_vm3 = vcmp.ge.f32.partialorder %v7399_v52, 0.0 }
 0x6f0   :  { %v7384_v54 = vpop.permute.xlu0 %7383 }
 0x6f1   :  { %v7411_v57 = vsub.f32 0.0, %v7405_v53  ;;  %v14661_v58 = vsub.f32 %v7349_v36, %v7384_v54 }
 0x6f3   :  { %v7417_v30 = vmul.f32 1.442695, %v7411_v57  ;;  %v7406_v59 = vand.u32 2147483647, %v14661_v58  ;;  %vm7442_vm4 = vcmp.ge.f32.partialorder %v14661_v58, 0.0  ;;  %v11480_v57 = vld [vmem:[%s14914_s11 + $0x60] sm:$0xff]  }
 0x6f4   :  { %v7386_v33 = vpop.permute.xlu1 %7385  ;;  %9859 = vmatprep.subr.bf16.mxu1 %v11480_v57 }
 0x6f5   :  { %11526 = vpow2.f32 %v7417_v30  ;;  %v7412_v50 = vsub.f32 0.0, %v7406_v59  ;;  %v14664_v51 = vsub.f32 %v7354_v37, %v7386_v33  ;;  %v11481_v33 = vld [vmem:[%s14914_s11 + $0x20] sm:$0xff]  }
 0x6f6   :  { %9860 = vmatpush3.bf16.msra.mxu1 %v11481_v33 }
 0x6f7   :  { %v7419_v60 = vmul.f32 1.442695, %v7412_v50  ;;  %v7407_v63 = vand.u32 2147483647, %v14664_v51  ;;  %vm7443_vm5 = vcmp.ge.f32.partialorder %v14664_v51, 0.0 }
 0x6f8   :  { %v7388_v0 = vpop.permute.xlu1 %7387 }
 0x6f9   :  { %11528 = vpow2.f32 %v7419_v60  ;;  %v7413_v1 = vsub.f32 0.0, %v7407_v63  ;;  %v14667_v2 = vsub.f32 %v7357_v40, %v7388_v0  ;;  %v11482_v60 = vld [vmem:[%s14914_s11 + $0x68] sm:$0xff]  }
 0x6fa   :  { %v11483_v63 = vld [vmem:[%s14914_s11 + $0x28] sm:$0xff]   ;;  %9861 = vmatprep.subr.bf16.mxu1 %v11482_v60 }
 0x6fb   :  { %v7421_v62 = vmul.f32 1.442695, %v7413_v1  ;;  %v7408_v3 = vand.u32 2147483647, %v14667_v2  ;;  %vm7444_vm6 = vcmp.ge.f32.partialorder %v14667_v2, 0.0  ;;  %9862 = vmatpush3.bf16.msra.mxu1 %v11483_v63  ;;  %v11484_v2 = vld [vmem:[%s14914_s11 + $0x70] sm:$0xff]  }
 0x6fc   :  { %v7390_v5 = vpop.permute.xlu0 %7389  ;;  %9863 = vmatprep.subr.bf16.mxu1 %v11484_v2 }
 0x6fd   :  { %11530 = vpow2.f32 %v7421_v62  ;;  %v7414_v6 = vsub.f32 0.0, %v7408_v3  ;;  %v14670_v61 = vsub.f32 %v7362_v43, %v7390_v5  ;;  %v11485_v5 = vld [vmem:[%s14914_s11 + $0x30] sm:$0xff]  }
 0x6fe   :  { %v7392_v4 = vpop.permute.xlu1 %7391 }
 0x6ff   :  { %v11527_v7 = vpop.eup %11526  ;;  %v7423_v8 = vmul.f32 1.442695, %v7414_v6  ;;  %v7409_v9 = vand.u32 2147483647, %v14670_v61  ;;  %v14673_v10 = vsub.f32 %v7365_v45, %v7392_v4  ;;  %vm7445_vm7 = vcmp.ge.f32.partialorder %v14670_v61, 0.0  ;;  %9864 = vmatpush3.bf16.msra.mxu1 %v11485_v5  ;;  %v11486_v6 = vld [vmem:[%s14914_s11 + $0x78] sm:$0xff]  }
 0x700   :  { %v7429_v11 = vadd.f32 1.0, %v11527_v7  ;;  %v11487_v61 = vld [vmem:[%s14914_s11 + $0x38] sm:$0xff]   ;;  %9865 = vmatprep.subr.bf16.mxu1 %v11486_v6  ;;  %v7570_v4 = vld [vmem:[%s14915_s2] sm:$0xff]  ;;  %v7470_v5 = vld [vmem:[%s14917_s12 + $0x28] sm:$0xff] }
 0x701   :  { %11532 = vpow2.f32 %v7423_v8  ;;  %v7415_v12 = vsub.f32 0.0, %v7409_v9  ;;  %v7410_v13 = vand.u32 2147483647, %v14673_v10  ;;  %vm7446_vm8 = vcmp.ge.f32.partialorder %v14673_v10, 0.0  ;;  %v11492_v9 = vld [vmem:[%s14914_s11 + $0x140] sm:$0xff]  }
 0x702   :  { %11534 = vrcp.f32 %v7429_v11  ;;  %v9709_v7 = vcombine.high %v7570_v4, %v7570_v4  ;;  %v9708_v8 = vcombine.low %v7570_v4, %v7570_v4  ;;  %v11493_v10 = vld [vmem:[%s14914_s11 + $0x100] sm:$0xff]   ;;  %v11496_v11 = vld [vmem:[%s14914_s11 + $0x148] sm:$0xff]  }
 0x703   :  { %v11529_v14 = vpop.eup %11528  ;;  %v7425_v15 = vmul.f32 1.442695, %v7415_v12  ;;  %v7416_v16 = vsub.f32 0.0, %v7410_v13  ;;  %9866 = vmatpush3.bf16.msra.mxu1 %v11487_v61  ;;  %v11497_v12 = vld [vmem:[%s14914_s11 + $0x108] sm:$0xff]   ;;  %v11500_v13 = vld [vmem:[%s14914_s11 + $0x150] sm:$0xff]   ;;  %v7511_v4 = vld [vmem:[%s14916_s13 + $0x20] sm:$0xff] }
 0x704   :  { %v7430_v17 = vadd.f32 1.0, %v11529_v14  ;;  %8054 = vmatprep.mubr.bf16.mxu1 %v9709_v7  ;;  %9895 = vmatprep.subr.bf16.mxu1 %v11492_v9  ;;  %v11501_v14 = vld [vmem:[%s14914_s11 + $0x110] sm:$0xff]   ;;  %v7512_v61 = vld [vmem:[%s14916_s13 + $0x28] sm:$0xff] }
 0x705   :  { %11536 = vpow2.f32 %v7425_v15  ;;  %v7427_v18 = vmul.f32 1.442695, %v7416_v16  ;;  %v11504_v15 = vld [vmem:[%s14914_s11 + $0x158] sm:$0xff]  }
 0x706   :  { %11538 = vrcp.f32 %v7430_v17  ;;  %8055 = vmatmul.mubr.bf16.vlgmr.msra.gmra.mrb[36].mxu1 %v9708_v8  ;;  %v11505_v16 = vld [vmem:[%s14914_s11 + $0x118] sm:$0xff]   ;;  %v11508_v17 = vld [vmem:[%s14914_s11 + $0x160] sm:$0xff]  }
 0x707   :  { %v11531_v19 = vpop.eup %11530  ;;  %11540 = vpow2.f32 %v7427_v18  ;;  %9896 = vmatpush3.bf16.msra.mxu1 %v11493_v10  ;;  %v11509_v18 = vld [vmem:[%s14914_s11 + $0x120] sm:$0xff]   ;;  %8134 = vmatprep.mubr.bf16.mxu1 %v9713_v29  ;;  %v11502_v29 = vld [vmem:[%s14914_s11 + $0xd8] sm:$0xff]  }
 0x708   :  { %v7431_v20 = vadd.f32 1.0, %v11531_v19  ;;  %9897 = vmatprep.subr.bf16.mxu1 %v11496_v11  ;;  %v11512_v19 = vld [vmem:[%s14914_s11 + $0x168] sm:$0xff]  }
 0x70a   :  { %11542 = vrcp.f32 %v7431_v20  ;;  %v11513_v20 = vld [vmem:[%s14914_s11 + $0x128] sm:$0xff]  }
 0x70b   :  { %v11533_v21 = vpop.eup %11532  ;;  %9898 = vmatpush3.bf16.msra.mxu1 %v11497_v12 }
 0x70c   :  { %v11535_v25 = vpop.eup %11534  ;;  %v7432_v26 = vadd.f32 1.0, %v11533_v21  ;;  %9899 = vmatprep.subr.bf16.mxu1 %v11500_v13  ;;  %v11516_v21 = vld [vmem:[%s14914_s11 + $0x170] sm:$0xff]  }
 0x70d   :  { %v7447_v27 = vsub.f32 1.0, %v11535_v25 }
 0x70e   :  { %11544 = vrcp.f32 %v7432_v26  ;;  %v11520_v26 = vld [vmem:[%s14914_s11 + $0x178] sm:$0xff]  }
 0x70f   :  { %v11537_v55 = vpop.eup %11536  ;;  %v7453_v56 = vsel %vm7441_vm3, %v11535_v25, %v7447_v27  ;;  %9900 = vmatpush3.bf16.msra.mxu1 %v11501_v14  ;;  %v11517_v25 = vld [vmem:[%s14914_s11 + $0x130] sm:$0xff]   ;;  %v11523_v27 = vld [vmem:[%s14914_s11 + $0x138] sm:$0xff]  }
 0x710   :  { %v11539_v34 = vpop.eup %11538  ;;  %v7433_v35 = vadd.f32 1.0, %v11537_v55  ;;  %7473 = vperm.xlu0 %10242, %v7453_v56   ;;  %v7459_v43 = vsub.f32 1.0, %v7453_v56  ;;  %9901 = vmatprep.subr.bf16.mxu1 %v11504_v15  ;;  %v9712_v55 = vcombine.low %v7572_v28, %v7572_v28  ;;  %v11499_v28 = vld [vmem:[%s14914_s11 + $0x90] sm:$0xff]  }
 0x711   :  { %v11541_v36 = vpop.eup %11540  ;;  %v7448_v31 = vsub.f32 1.0, %v11539_v34 }
 0x712   :  { %11546 = vrcp.f32 %v7433_v35  ;;  %v7434_v37 = vadd.f32 1.0, %v11541_v36  ;;  %v7508_v35 = vld [vmem:[%s14916_s13 + $0x8] sm:$0xff]  ;;  %v7465_v36 = vld [vmem:[%s14917_s12] sm:$0xff] }
 0x713   :  { %v7454_v39 = vsel %vm7442_vm4, %v11539_v34, %v7448_v31  ;;  %9902 = vmatpush3.bf16.msra.mxu1 %v11505_v16  ;;  %v7466_v31 = vld [vmem:[%s14917_s12 + $0x8] sm:$0xff]  ;;  %v11488_v16 = vld [vmem:[%s14914_s11 + $0xc0] sm:$0xff]  }
 0x714   :  { %v11543_v40 = vpop.eup %11542  ;;  %11548 = vrcp.f32 %v7434_v37  ;;  %v7460_v41 = vsub.f32 1.0, %v7454_v39  ;;  %7478 = vperm.xlu1 %10243, %v7454_v39   ;;  %9903 = vmatprep.subr.bf16.mxu1 %v11508_v17  ;;  %v7507_v37 = vld [vmem:[%s14916_s13] sm:$0xff]  ;;  %v7571_v17 = vld [vmem:[%s14915_s2 + $0x8] sm:$0xff] }
 0x715   :  { %v7449_v46 = vsub.f32 1.0, %v11543_v40 }
 0x716   :  { %7520 = vperm.xlu0 %10242, %v7460_v41  }
 0x717   :  { %v7455_v53 = vsel %vm7443_vm5, %v11543_v40, %v7449_v46  ;;  %9904 = vmatpush3.bf16.msra.mxu1 %v11509_v18 }
 0x718   :  { %v11545_v45 = vpop.eup %11544  ;;  %7515 = vperm.xlu1 %10243, %v7459_v43   ;;  %v7461_v59 = vsub.f32 1.0, %v7455_v53  ;;  %9905 = vmatprep.subr.bf16.mxu1 %v11512_v19 }
 0x719   :  { %v7450_v47 = vsub.f32 1.0, %v11545_v45 }
 0x71b   :  { %v7456_v52 = vsel %vm7444_vm6, %v11545_v45, %v7450_v47  ;;  %9906 = vmatpush3.bf16.msra.mxu1 %v11513_v20  ;;  %v7564_v47 = vadd.s32 1, %v14536_v24  ;;  %v11491_v20 = vld [vmem:[%s14914_s11 + $0x80] sm:$0xff]  }
 0x71c   :  { %v11547_v54 = vpop.eup %11546  ;;  %7488 = vperm.xlu0 %10242, %v7456_v52   ;;  %7483 = vperm.xlu1 %10243, %v7455_v53   ;;  %v7462_v30 = vsub.f32 1.0, %v7456_v52  ;;  %v7467_v52 = vld [vmem:[%s14917_s12 + $0x10] sm:$0xff]  ;;  %v7510_v53 = vld [vmem:[%s14916_s13 + $0x18] sm:$0xff] }
 0x71d   :  { %v7451_v50 = vsub.f32 1.0, %v11547_v54  ;;  %9907 = vmatprep.subr.bf16.mxu1 %v11516_v21  ;;  %v7565_v33 = vmul.u32 6, %v7564_v47  ;;  %v9711_v21 = vcombine.high %v7571_v17, %v7571_v17 }
 0x71e   :  { %v11549_v58 = vpop.eup %11548 }
 0x71f   :  { %v7452_v51 = vsub.f32 1.0, %v11549_v58  ;;  %v7457_v0 = vsel %vm7445_vm7, %v11547_v54, %v7451_v50  ;;  %9908 = vmatpush3.bf16.msra.mxu1 %v11517_v25  ;;  %v7509_v54 = vld [vmem:[%s14916_s13 + $0x10] sm:$0xff]  ;;  %v11494_v25 = vld [vmem:[%s14914_s11 + $0xc8] sm:$0xff]  }
 0x720   :  { %7530 = vperm.xlu0 %10242, %v7462_v30   ;;  %7525 = vperm.xlu1 %10243, %v7461_v59   ;;  %v7463_v62 = vsub.f32 1.0, %v7457_v0  ;;  %v7561_v30 = vand.u32 127, %v6682_v23  ;;  %v7562_v59 = vmul.u32 6, %v14536_v24  ;;  %v7469_v24 = vld [vmem:[%s14917_s12 + $0x20] sm:$0xff] }
 0x721   :  { %v7458_v1 = vsel %vm7446_vm8, %v11549_v58, %v7452_v51  ;;  %9909 = vmatprep.subr.bf16.mxu1 %v11520_v26  ;;  %v11495_v26 = vld [vmem:[%s14914_s11 + $0x88] sm:$0xff]  }
 0x722   :  { %v7464_v3 = vsub.f32 1.0, %v7458_v1  ;;  %vm14814_vm9 = vcmp.ge.s32.totalorder %v7561_v30, %v7562_v59  ;;  %vm14818_vm10 = vcmp.lt.s32.totalorder %v7561_v30, %v7565_v33 }
 0x723   :  { %9910 = vmatpush3.bf16.msra.mxu1 %v11523_v27  ;;  %vm7567_vm11 = vmand %vm14814_vm9, %vm14818_vm10  ;;  %v11498_v27 = vld [vmem:[%s14914_s11 + $0xd0] sm:$0xff]  }
 0x724   :  { %7493 = vperm.xlu1 %10243, %v7457_v0   ;;  %7498 = vperm.xlu0 %10242, %v7458_v1   ;;  %v7568_v15 = vsel %vm7567_vm11, 1.0, %v11618_v22 }
 0x725   :  { %v7569_v19 = vpack.c.bf16 %v7568_v15, %v7568_v15 }
 0x726   :  { %8135 = vmatmul.mubr.bf16.vlgmr.msra.gmra.mrb[40].mxu1 %v9712_v55  ;;  %v11503_v55 = vld [vmem:[%s14914_s11 + $0x98] sm:$0xff]  }
 0x728   :  { %7535 = vperm.xlu1 %10243, %v7463_v62   ;;  %7540 = vperm.xlu0 %10242, %v7464_v3  }
 0x78f   :  { %v7474_v56 = vpop.permute.xlu0 %7473 }
 0x790   :  { %v7501_v40 = vmul.f32 %v7474_v56, %v7465_v36  ;;  %v11506_v56 = vld [vmem:[%s14914_s11 + $0xe0] sm:$0xff]   ;;  %v11511_v36 = vld [vmem:[%s14914_s11 + $0xa8] sm:$0xff]  }
 0x793   :  { %v7479_v34 = vpop.permute.xlu1 %7478 }
 0x794   :  { %v7502_v41 = vmul.f32 %v7479_v34, %v7466_v31  ;;  %v11507_v34 = vld [vmem:[%s14914_s11 + $0xa0] sm:$0xff]   ;;  %v11514_v31 = vld [vmem:[%s14914_s11 + $0xf0] sm:$0xff]  }
 0x795   :  { %v7521_v32 = vpop.permute.xlu0 %7520 }
 0x796   :  { %v7544_v38 = vmul.f32 %v7521_v32, %v7508_v35  ;;  %v11510_v35 = vld [vmem:[%s14914_s11 + $0xe8] sm:$0xff]   ;;  %v11515_v32 = vld [vmem:[%s14914_s11 + $0xb0] sm:$0xff]  }
 0x797   :  { %v7516_v39 = vpop.permute.xlu1 %7515 }
 0x798   :  { %v7543_v42 = vmul.f32 %v7516_v39, %v7507_v37  ;;  %v7550_v43 = vadd.f32 %v7544_v38, %v7502_v41  ;;  %v11518_v37 = vld [vmem:[%s14914_s11 + $0xf8] sm:$0xff]   ;;  %v9710_v39 = vcombine.low %v7571_v17, %v7571_v17 }
 0x799   :  { %v11519_v38 = vld [vmem:[%s14914_s11 + $0xb8] sm:$0xff]  }
 0x79a   :  { %v7549_v44 = vadd.f32 %v7543_v42, %v7501_v40 }
 0x79b   :  { %v7489_v46 = vpop.permute.xlu0 %7488  ;;  %v7484_v45 = vpop.permute.xlu1 %7483 }
 0x79c   :  { %v7555_v48 = vpack.c.bf16 %v7550_v43, %v7549_v44  ;;  %v7504_v50 = vmul.f32 %v7489_v46, %v7468_v49  ;;  %v7503_v51 = vmul.f32 %v7484_v45, %v7467_v52  ;;  %v8150_v52 = vld [vmem:[%s14918_s15] sm:$0xff] }
 0x79e   :  { %9960 = vmatpush3.bf16.msra.mxu0 %v7555_v48 }
 0x79f   :  { %v7531_v57 = vpop.permute.xlu0 %7530  ;;  %v7526_v58 = vpop.permute.xlu1 %7525  ;;  %9961 = vmatprep.subr.bf16.mxu0 %v11618_v22 }
 0x7a0   :  { %v7546_v60 = vmul.f32 %v7531_v57, %v7510_v53  ;;  %v7545_v63 = vmul.f32 %v7526_v58, %v7509_v54 }
 0x7a2   :  { %v7552_v0 = vadd.f32 %v7546_v60, %v7504_v50  ;;  %v7551_v1 = vadd.f32 %v7545_v63, %v7503_v51  ;;  %v9762_v63 = vld [vmem:[%s14919_s14] ss:$0 sm:$0xff] }
 0x7a3   :  { %v7499_v2 = vpop.permute.xlu0 %7498  ;;  %v7494_v62 = vpop.permute.xlu1 %7493 }
 0x7a4   :  { %v7556_v3 = vpack.c.bf16 %v7552_v0, %v7551_v1  ;;  %v7506_v9 = vmul.f32 %v7499_v2, %v7470_v5  ;;  %v7505_v10 = vmul.f32 %v7494_v62, %v7469_v24  ;;  %v9763_v2 = vld [vmem:[%s14920_s16] ss:$0 sm:$0xff] }
 0x7a6   :  { %9962 = vmatpush3.bf16.msra.mxu0 %v7556_v3 }
 0x7a7   :  { %v7541_v7 = vpop.permute.xlu0 %7540  ;;  %v7536_v8 = vpop.permute.xlu1 %7535  ;;  %9963 = vmatprep.subr.bf16.mxu0 %v11618_v22 }
 0x7a8   :  { %v7548_v11 = vmul.f32 %v7541_v7, %v7512_v61  ;;  %v7547_v12 = vmul.f32 %v7536_v8, %v7511_v4 }
 0x7aa   :  { %v7554_v13 = vadd.f32 %v7548_v11, %v7506_v9  ;;  %v7553_v14 = vadd.f32 %v7547_v12, %v7505_v10 }
 0x7ac   :  { %v7557_v18 = vpack.c.bf16 %v7554_v13, %v7553_v14 }
 0x7ae   :  { %9964 = vmatpush3.bf16.msra.mxu0 %v7557_v18 }
 0x7af   :  { %9873 = vmatprep.subr.bf16.mxu0 %v11488_v16 }
 0x7b1   :  { %9966 = vmatmul.mubr.msk.bf16.vlgmr.msra.gmra.mrb[36].mxu0 %vm7669_vm12, %v7569_v19 }
 0x7b2   :  { %9874 = vmatpush3.bf16.msra.mxu0 %v11491_v20  ;;  %8094 = vmatprep.mubr.bf16.mxu0 %v9711_v21 }
 0x7b3   :  { %9875 = vmatprep.subr.bf16.mxu0 %v11494_v25 }
 0x7b6   :  { %9876 = vmatpush3.bf16.msra.mxu0 %v11495_v26 }
 0x7b7   :  { %9877 = vmatprep.subr.bf16.mxu0 %v11498_v27 }
 0x7ba   :  { %9878 = vmatpush3.bf16.msra.mxu0 %v11499_v28 }
 0x7bb   :  { %9879 = vmatprep.subr.bf16.mxu0 %v11502_v29 }
 0x7be   :  { %9880 = vmatpush3.bf16.msra.mxu0 %v11503_v55 }
 0x7bf   :  { %9881 = vmatprep.subr.bf16.mxu0 %v11506_v56 }
 0x7c2   :  { %9882 = vmatpush3.bf16.msra.mxu0 %v11507_v34 }
 0x7c3   :  { %9883 = vmatprep.subr.bf16.mxu0 %v11510_v35 }
 0x7c6   :  { %9884 = vmatpush3.bf16.msra.mxu0 %v11511_v36 }
 0x7c7   :  { %9885 = vmatprep.subr.bf16.mxu0 %v11514_v31 }
 0x7ca   :  { %9886 = vmatpush3.bf16.msra.mxu0 %v11515_v32 }
 0x7cb   :  { %9887 = vmatprep.subr.bf16.mxu0 %v11518_v37 }
 0x7ce   :  { %9888 = vmatpush3.bf16.msra.mxu0 %v11519_v38 }
 0x7cf   :  { %9969 = vmatprep.subr.mxu0 %v11618_v22 }
 0x7d1   :  { %8095 = vmatmul.mubr.bf16.vlgmr.msra.gmra.mrb[40].mxu0 %v9710_v39 }
 0x7d2   :  { %9971 = vmatprep.mubr.msk.f32.mxu0 %vm11619_vm0, %v11618_v22  ;;  %9970 = vmatpush3.msra.mxu0 %v8150_v52 }
 0x7d9   :  { %v9867_v40 = vpop.f32.mrb[36].mxu1 }
 0x7da   :  { %v9868_v41 = vpop.f32.mrb[37].mxu1 }
 0x7db   :  { %v9869_v42 = vadd.f32 %v9868_v41, %v9867_v40  ;;  %v9870_v43 = vpop.f32.mrb[38].mxu1 }
 0x7dc   :  { %v9871_v44 = vpop.f32.mrb[39].mxu1 }
 0x7f9   :  { %v9911_v46 = vpop.f32.mrb[40].mxu1 }
 0x7fa   :  { %v9912_v45 = vpop.f32.mrb[41].mxu1 }
 0x7fb   :  { %v9914_v47 = vpop.f32.mrb[42].mxu1  ;;  %v9913_v49 = vadd.f32 %v9912_v45, %v9911_v46 }
 0x7fc   :  { %v9915_v48 = vpop.f32.mrb[43].mxu1 }
 0x884   :  { %v7707_v53 = vpop.f32.mrb[36].mxu0 }
 0x885   :  { %v9967_v54 = vpop.f32.mrb[37].mxu0  ;;  %v8057_v57 = vadd.f32 %v9869_v42, %v7707_v53 }
 0x886   :  { %v7710_v58 = vpop.f32.mrb[38].mxu0 }
 0x887   :  { %v9968_v22 = vpop.f32.mrb[39].mxu0 }
 0x8a4   :  { %v9889_v30 = vpop.f32.mrb[40].mxu0 }
 0x8a5   :  { %v9890_v59 = vpop.f32.mrb[41].mxu0 }
 0x8a6   :  { %v9891_v33 = vadd.f32 %v9890_v59, %v9889_v30  ;;  %v9892_v50 = vpop.f32.mrb[42].mxu0 }
 0x8a7   :  { %v9893_v51 = vpop.f32.mrb[43].mxu0 }
 0x8a8   :  { %v8097_v60 = vadd.f32 %v9891_v33, %v8057_v57 }
 0x8aa   :  { %v8137_v0 = vadd.f32 %v9913_v49, %v8097_v60 }
 0x8ac   :  { %v8149_v1 = vadd.f32 %v9762_v63, %v8137_v0 }
 0x8ae   :  { %9972 = vmatmul.mubr.msk.f32.vlgmr.msra.gmra.mrb[44].mxu0 %vm8158_vm13, %v8149_v1 }
 0x981   :  { %v8228_v62 = vpop.f32.mrb[44].mxu0 }
 0x982   :  { %v8229_v3 = vadd.f32 %v9763_v2, %v8228_v62  ;;  %v9973_v5 = vpop.f32.mrb[45].mxu0 }
 0x984   :  { %8233 = vst.msk [vmem:[%s14921_s18] sm:$0xff] %vm8232_vm14, %v8229_v3 }

</bundles_post_ra>
